<compile_context>
chip_gen: v5e
topology: v5e:2x2
jax: 0.10.0
libtpu: 0.0.40
codegen_flags: <defaults>
</compile_context>

<pallas_src>
import math
import functools

import jax
import jax.numpy as jnp
from jax.experimental import pallas as pl
from jax.experimental.pallas import tpu as pltpu


# Activations/weights travel as bf16 (MXU dtype, halves HBM traffic);
# matmul accumulation, softmax and LayerNorm statistics stay in f32.
ACT_DTYPE = jnp.bfloat16
_LANE = 128


def _round_up(n, m=_LANE):
    return ((n + m - 1) // m) * m


# --------------------------- in-kernel helpers -------------------------------

def _ln_f32(x, g, b, eps=1e-5):
    """LayerNorm over the last dim, f32 statistics. g, b are (1, D) f32."""
    mu = jnp.mean(x, axis=-1, keepdims=True)
    var = jnp.mean(jnp.square(x - mu), axis=-1, keepdims=True)
    return (x - mu) * jax.lax.rsqrt(var + eps) * g + b


def _attn_core(qx, qp, kx, kp, w_in, b_in, wo, bo, g, be, nhead):
    """Fused multi-head attention block:
       LN( qx + out_proj( MHA(q = qx+qp, k = kx+kp, v = kx) ) )
       qx/kx may be bf16 or f32; w_in = [Wq|Wk|Wv] (D,3D) bf16; b_in (1,3D) f32;
       wo (D,D) bf16; bo/g/be (1,D) f32.  No concat: per-head PV results are
       folded into the out_proj accumulation."""
    D = wo.shape[0]
    dh = D // nhead
    scale = 1.0 / math.sqrt(dh)

    qin = qx.astype(ACT_DTYPE) + qp.astype(ACT_DTYPE)      # bf16 VPU add
    kin = kx.astype(ACT_DTYPE) + kp.astype(ACT_DTYPE)
    kxb = kx.astype(ACT_DTYPE)

    q = (jnp.dot(qin, w_in[:, :D], preferred_element_type=jnp.float32)
         + b_in[:, :D]) * scale
    k = (jnp.dot(kin, w_in[:, D:2 * D], preferred_element_type=jnp.float32)
         + b_in[:, D:2 * D])
    v = (jnp.dot(kxb, w_in[:, 2 * D:], preferred_element_type=jnp.float32)
         + b_in[:, 2 * D:])
    q = q.astype(ACT_DTYPE)
    k = k.astype(ACT_DTYPE)
    v = v.astype(ACT_DTYPE)

    Lq = qx.shape[0]
    acc = jnp.zeros((Lq, D), jnp.float32)
    for h in range(nhead):                                   # static unroll
        sl = slice(h * dh, (h + 1) * dh)
        # contract the shared head dim directly (no k.T relayout)
        s = jax.lax.dot_general(q[:, sl], k[:, sl],
                                (((1,), (1,)), ((), ())),
                                preferred_element_type=jnp.float32)   # (Lq, Lk)
        s = s - jnp.max(s, axis=-1, keepdims=True)
        p = jnp.exp(s)
        p = p * pl.reciprocal(jnp.sum(p, axis=-1, keepdims=True), approx=True)
        pv = jnp.dot(p.astype(ACT_DTYPE), v[:, sl],
                     preferred_element_type=jnp.float32)               # (Lq, dh)
        # fold straight into out_proj: concat-free epilogue
        acc = acc + jnp.dot(pv.astype(ACT_DTYPE), wo[sl, :],
                            preferred_element_type=jnp.float32)        # (Lq, D)

    y = acc + bo + qx.astype(jnp.float32)                    # residual
    return _ln_f32(y, g, be)


def _ffn_core(x, w1, b1, w2, b2, g, be):
    """LN( x + Linear2( ReLU( Linear1(x) ) ) ), fused."""
    xb = x.astype(ACT_DTYPE)
    h = jnp.maximum(jnp.dot(xb, w1, preferred_element_type=jnp.float32) + b1, 0.0)
    y = jnp.dot(h.astype(ACT_DTYPE), w2, preferred_element_type=jnp.float32) + b2
    return _ln_f32(y + x.astype(jnp.float32), g, be)


# --------------------------- fused layer kernels -----------------------------

def _enc_layer_kernel(src_ref, pos_ref,
                      sa_w, sa_b, sa_wo, sa_obn,
                      ff_w1, ff_b1, ff_w2, ff_obn,
                      o_ref, *, nhead):
    src = src_ref[0]                       # (L, D) bf16
    pos = pos_ref[0]
    o1 = sa_obn[...]                       # (3, D) f32: [bo | gamma | beta]
    x1 = _attn_core(src, pos, src, pos, sa_w[...], sa_b[...], sa_wo[...],
                    o1[0:1], o1[1:2], o1[2:3], nhead)
    o2 = ff_obn[...]
    x2 = _ffn_core(x1, ff_w1[...], ff_b1[...], ff_w2[...],
                   o2[0:1], o2[1:2], o2[2:3])
    o_ref[0] = x2.astype(o_ref.dtype)


def _dec_layer_kernel(tgt_ref, qpos_ref, mem_ref, pos_ref,
                      sa_w, sa_b, sa_wo, sa_obn,
                      ca_w, ca_b, ca_wo, ca_obn,
                      ff_w1, ff_b1, ff_w2, ff_obn,
                      o_ref, *, nhead):
    tgt = tgt_ref[0]                       # (Q, D) bf16
    qp = qpos_ref[...]                     # (Q, D) bf16 (shared across batch)
    mem = mem_ref[0]                       # (L, D) bf16
    pos = pos_ref[0]
    o1 = sa_obn[...]
    x1 = _attn_core(tgt, qp, tgt, qp, sa_w[...], sa_b[...], sa_wo[...],
                    o1[0:1], o1[1:2], o1[2:3], nhead)
    o2 = ca_obn[...]
    x2 = _attn_core(x1, qp, mem, pos, ca_w[...], ca_b[...], ca_wo[...],
                    o2[0:1], o2[1:2], o2[2:3], nhead)
    o3 = ff_obn[...]
    x3 = _ffn_core(x2, ff_w1[...], ff_b1[...], ff_w2[...],
                   o3[0:1], o3[1:2], o3[2:3])
    o_ref[0] = x3.astype(o_ref.dtype)


def _stem_kernel(x_ref, wb_ref, bb_ref, wp_ref, bp_ref, o_ref):
    """Synthetic backbone (patchify conv == per-patch linear + ReLU) fused with
    the 1x1 input_proj conv (per-pixel linear)."""
    f = jnp.maximum(jnp.dot(x_ref[...], wb_ref[...],
                            preferred_element_type=jnp.float32) + bb_ref[...], 0.0)
    o_ref[...] = (jnp.dot(f.astype(ACT_DTYPE), wp_ref[...],
                          preferred_element_type=jnp.float32)
                  + bp_ref[...]).astype(o_ref.dtype)


def _heads_kernel(x_ref, norm_ref, wc_ref, bc_ref,
                  w0_ref, b0_ref, w1_ref, b1_ref, w2_ref, b2_ref,
                  cls_ref, box_ref):
    """Final decoder LayerNorm + class head + 3-layer bbox MLP, fused.
    Head weight columns are zero-padded to a multiple of 128, so both outputs
    are lane-dense; valid columns are sliced outside the kernel."""
    x = x_ref[...].astype(jnp.float32)
    nm = norm_ref[...]                                     # (2, D): [gamma|beta]
    h = _ln_f32(x, nm[0:1], nm[1:2])
    hb = h.astype(ACT_DTYPE)
    cls_ref[...] = (jnp.dot(hb, wc_ref[...], preferred_element_type=jnp.float32)
                    + bc_ref[...]).astype(cls_ref.dtype)
    t = jnp.maximum(jnp.dot(hb, w0_ref[...],
                            preferred_element_type=jnp.float32) + b0_ref[...], 0.0)
    t = jnp.maximum(jnp.dot(t.astype(ACT_DTYPE), w1_ref[...],
                            preferred_element_type=jnp.float32) + b1_ref[...], 0.0)
    box_ref[...] = jax.nn.sigmoid(
        jnp.dot(t.astype(ACT_DTYPE), w2_ref[...],
                preferred_element_type=jnp.float32) + b2_ref[...]
    ).astype(box_ref.dtype)


# ------------------------------ kernel wrappers -------------------------------

def encoder_layer(p, src, pos, nhead):
    B, L, D = src.shape
    dff = p['ff_w1'].shape[1]
    full = lambda b: (0, 0)
    perb = lambda b: (b, 0, 0)
    return pl.pallas_call(
        functools.partial(_enc_layer_kernel, nhead=nhead),
        out_shape=jax.ShapeDtypeStruct((B, L, D), ACT_DTYPE),
        grid=(B,),
        in_specs=[pl.BlockSpec((1, L, D), perb),
                  pl.BlockSpec((1, L, D), perb),
                  pl.BlockSpec((D, 3 * D), full),
                  pl.BlockSpec((1, 3 * D), full),
                  pl.BlockSpec((D, D), full),
                  pl.BlockSpec((3, D), full),
                  pl.BlockSpec((D, dff), full),
                  pl.BlockSpec((1, dff), full),
                  pl.BlockSpec((dff, D), full),
                  pl.BlockSpec((3, D), full)],
        out_specs=pl.BlockSpec((1, L, D), perb),
        compiler_params=pltpu.CompilerParams(dimension_semantics=("parallel",)),
    )(src, pos, p['sa']['w_in'], p['sa']['b_in'], p['sa']['wo'], p['sa']['obn'],
      p['ff_w1'], p['ff_b1'], p['ff_w2'], p['ff_obn'])


def decoder_layer(p, tgt, qpos, memory, pos, nhead):
    B, Q, D = tgt.shape
    L = memory.shape[1]
    dff = p['ff_w1'].shape[1]
    full = lambda b: (0, 0)
    perb = lambda b: (b, 0, 0)
    return pl.pallas_call(
        functools.partial(_dec_layer_kernel, nhead=nhead),
        out_shape=jax.ShapeDtypeStruct((B, Q, D), ACT_DTYPE),
        grid=(B,),
        in_specs=[pl.BlockSpec((1, Q, D), perb),
                  pl.BlockSpec((Q, D), full),
                  pl.BlockSpec((1, L, D), perb),
                  pl.BlockSpec((1, L, D), perb),
                  pl.BlockSpec((D, 3 * D), full),
                  pl.BlockSpec((1, 3 * D), full),
                  pl.BlockSpec((D, D), full),
                  pl.BlockSpec((3, D), full),
                  pl.BlockSpec((D, 3 * D), full),
                  pl.BlockSpec((1, 3 * D), full),
                  pl.BlockSpec((D, D), full),
                  pl.BlockSpec((3, D), full),
                  pl.BlockSpec((D, dff), full),
                  pl.BlockSpec((1, dff), full),
                  pl.BlockSpec((dff, D), full),
                  pl.BlockSpec((3, D), full)],
        out_specs=pl.BlockSpec((1, Q, D), perb),
        compiler_params=pltpu.CompilerParams(dimension_semantics=("parallel",)),
    )(tgt, qpos, memory, pos,
      p['sa']['w_in'], p['sa']['b_in'], p['sa']['wo'], p['sa']['obn'],
      p['ca']['w_in'], p['ca']['b_in'], p['ca']['wo'], p['ca']['obn'],
      p['ff_w1'], p['ff_b1'], p['ff_w2'], p['ff_obn'])


def stem(params, xp):
    """Fused synthetic backbone + input_proj (both per-pixel linears)."""
    lead = xp.shape[:-1]
    Cin = xp.shape[-1]
    bk = params['backbone_wt'].shape[1]
    D = params['proj_wt'].shape[1]
    x2 = xp.reshape(-1, Cin).astype(ACT_DTYPE)
    M = x2.shape[0]
    tm = M if M <= 256 else 256
    full = lambda i: (0, 0)
    out = pl.pallas_call(
        _stem_kernel,
        out_shape=jax.ShapeDtypeStruct((M, D), ACT_DTYPE),
        grid=(pl.cdiv(M, tm),),
        in_specs=[pl.BlockSpec((tm, Cin), lambda i: (i, 0)),
                  pl.BlockSpec((Cin, bk), full),
                  pl.BlockSpec((1, bk), full),
                  pl.BlockSpec((bk, D), full),
                  pl.BlockSpec((1, D), full)],
        out_specs=pl.BlockSpec((tm, D), lambda i: (i, 0)),
        compiler_params=pltpu.CompilerParams(dimension_semantics=("parallel",)),
    )(x2, params['backbone_wt'], params['backbone_b'],
      params['proj_wt'], params['proj_b'])
    return out.reshape(*lead, D)


def heads(params, h_last, num_classes):
    """Final decoder norm + class head + bbox MLP on the LAST layer only."""
    B, Q, D = h_last.shape
    M = B * Q
    x2 = h_last.reshape(M, D)
    nc_pad = params['class_wt'].shape[1]
    box_pad = params['bbox_wt2'].shape[1]
    full = lambda i: (0, 0)
    cls, box = pl.pallas_call(
        _heads_kernel,
        out_shape=(jax.ShapeDtypeStruct((M, nc_pad), jnp.float32),
                   jax.ShapeDtypeStruct((M, box_pad), jnp.float32)),
        grid=(1,),
        in_specs=[pl.BlockSpec((M, D), full),
                  pl.BlockSpec((2, D), full),
                  pl.BlockSpec((D, nc_pad), full),
                  pl.BlockSpec((1, nc_pad), full),
                  pl.BlockSpec((D, D), full),
                  pl.BlockSpec((1, D), full),
                  pl.BlockSpec((D, D), full),
                  pl.BlockSpec((1, D), full),
                  pl.BlockSpec((D, box_pad), full),
                  pl.BlockSpec((1, box_pad), full)],
        out_specs=(pl.BlockSpec((M, nc_pad), full),
                   pl.BlockSpec((M, box_pad), full)),
    )(x2, params['dec_norm'], params['class_wt'], params['class_b'],
      params['bbox_wt0'], params['bbox_b0'], params['bbox_wt1'], params['bbox_b1'],
      params['bbox_wt2'], params['bbox_b2'])
    logits = cls[:, :num_classes + 1].reshape(B, Q, num_classes + 1)
    boxes = box[:, :4].reshape(B, Q, 4)
    return logits, boxes


# ------------------------------- model pieces --------------------------------

def position_embedding(B, H, W, hidden_dim, temperature=10000.0):
    """Sine position embedding, normalize=True, mask = all-False (DETR)."""
    num_pos_feats = hidden_dim // 2
    not_mask = jnp.ones((B, H, W), jnp.float32)
    y_embed = jnp.cumsum(not_mask, axis=1)
    x_embed = jnp.cumsum(not_mask, axis=2)
    eps = 1e-6
    scale = 2.0 * math.pi
    y_embed = y_embed / (y_embed[:, -1:, :] + eps) * scale
    x_embed = x_embed / (x_embed[:, :, -1:] + eps) * scale
    dim_t = jnp.arange(num_pos_feats, dtype=jnp.float32)
    dim_t = temperature ** (2.0 * (jnp.floor(dim_t / 2.0) / num_pos_feats))
    pos_x = x_embed[:, :, :, None] / dim_t
    pos_y = y_embed[:, :, :, None] / dim_t
    pos_x = jnp.stack((jnp.sin(pos_x[..., 0::2]), jnp.cos(pos_x[..., 1::2])),
                      axis=4).reshape(B, H, W, -1)
    pos_y = jnp.stack((jnp.sin(pos_y[..., 0::2]), jnp.cos(pos_y[..., 1::2])),
                      axis=4).reshape(B, H, W, -1)
    return jnp.concatenate((pos_y, pos_x), axis=3)      # (B, H, W, hidden_dim)


def transformer(params, src, pos, query_embed, cfg):
    nhead = cfg['nhead']
    B, L, D = src.shape
    Q = query_embed.shape[0]
    memory = src
    for lp in params['enc_layers']:
        memory = encoder_layer(lp, memory, pos, nhead)
    tgt = jnp.zeros((B, Q, D), ACT_DTYPE)
    for lp in params['dec_layers']:
        tgt = decoder_layer(lp, tgt, query_embed, memory, pos, nhead)
    # Only the last decoder layer feeds pred_logits / pred_boxes (no aux_loss),
    # so intermediate LayerNorms / heads are skipped; the final decoder norm
    # is fused into the heads kernel.
    return tgt                                          # (B, Q, D)


def detr_forward(params, x, cfg):
    """Equivalent of DeTR.forward(x, mask=None) in the trainable branch
    (pred_logits / pred_boxes from the last decoder layer, aux_loss=False)."""
    B, C, H, W = x.shape
    s = cfg['stride']
    Hf, Wf = H // s, W // s
    D = cfg['hidden_dim']

    # TODO(synk): build_backbone (ResNet) is external to the module; a single
    # synthetic patchify conv (kernel=stride, stride=stride) + ReLU stands in,
    # fused with the 1x1 input_proj conv inside one Pallas kernel.
    xp = x.reshape(B, C, Hf, s, Wf, s).transpose(0, 2, 4, 1, 3, 5)
    xp = xp.reshape(B, Hf, Wf, C * s * s)
    src = stem(params, xp)                                  # (B, Hf, Wf, D)

    pos = position_embedding(B, Hf, Wf, D).astype(ACT_DTYPE)
    src = src.reshape(B, Hf * Wf, D)
    pos = pos.reshape(B, Hf * Wf, D)

    h_last = transformer(params, src, pos, params['query_embed'], cfg)
    logits, boxes = heads(params, h_last, cfg['num_classes'])

    # TODO(synk): inference() branch (softmax top-class, conf-threshold, NumPy
    # NMS) has data-dependent output shapes and is not translated.
    return {'pred_logits': logits, 'pred_boxes': boxes}


# ------------------------------ parameter init -------------------------------

def init_params(key, cfg, num_classes, in_ch=3, bk_dim=64):
    keys = iter(jax.random.split(key, 512))
    nk = lambda: next(keys)
    D = cfg['hidden_dim']
    dff = cfg['dim_feedforward']
    s = cfg['stride']

    def dense(k_in, n_out):
        # stored pre-transposed (K, N) bf16: MXU dtype, no per-call transpose
        return (0.02 * jax.random.normal(nk(), (k_in, n_out), jnp.float32)
                ).astype(ACT_DTYPE)

    def row(n):                               # (1, n) f32 bias, pre-reshaped
        return jnp.zeros((1, n), jnp.float32)

    def obn():                                # packed [out_bias | gamma | beta]
        return jnp.stack([jnp.zeros((D,)), jnp.ones((D,)), jnp.zeros((D,))]
                         ).astype(jnp.float32)

    def attn_params():
        w_in = jnp.concatenate([dense(D, D), dense(D, D), dense(D, D)], axis=1)
        return dict(w_in=w_in, b_in=row(3 * D), wo=dense(D, D), obn=obn())

    def padded_head(k_in, n_out):
        n_pad = _round_up(n_out)
        w = jnp.zeros((k_in, n_pad), jnp.float32)
        w = w.at[:, :n_out].set(
            0.02 * jax.random.normal(nk(), (k_in, n_out), jnp.float32))
        return w.astype(ACT_DTYPE), jnp.zeros((1, n_pad), jnp.float32)

    p = {}
    p['backbone_wt'] = dense(in_ch * s * s, bk_dim)
    p['backbone_b'] = row(bk_dim)
    p['proj_wt'] = dense(bk_dim, D)
    p['proj_b'] = row(D)
    p['query_embed'] = (0.02 * jax.random.normal(
        nk(), (cfg['num_queries'], D), jnp.float32)).astype(ACT_DTYPE)

    enc = []
    for _ in range(cfg['num_encoder_layers']):
        enc.append(dict(sa=attn_params(),
                        ff_w1=dense(D, dff), ff_b1=row(dff),
                        ff_w2=dense(dff, D), ff_obn=obn()))
    p['enc_layers'] = enc

    dec = []
    for _ in range(cfg['num_decoder_layers']):
        dec.append(dict(sa=attn_params(), ca=attn_params(),
                        ff_w1=dense(D, dff), ff_b1=row(dff),
                        ff_w2=dense(dff, D), ff_obn=obn()))
    p['dec_layers'] = dec
    p['dec_norm'] = jnp.stack([jnp.ones((D,)), jnp.zeros((D,))]
                              ).astype(jnp.float32)      # [gamma | beta]

    # heads: lane-dense (128-padded) output columns
    p['class_wt'], p['class_b'] = padded_head(D, num_classes + 1)
    p['bbox_wt0'] = dense(D, D); p['bbox_b0'] = row(D)
    p['bbox_wt1'] = dense(D, D); p['bbox_b1'] = row(D)
    p['bbox_wt2'], p['bbox_b2'] = padded_head(D, 4)
    return p


# ----------------------------------- main ------------------------------------

if __name__ == "__main__":
    CFG = dict(num_queries=8, hidden_dim=32, nhead=4,
               num_encoder_layers=2, num_decoder_layers=2,
               dim_feedforward=64, stride=8, num_classes=10,
               conf_thresh=0.3, nms_thresh=0.5, pretrained=False)
    num_classes = CFG['num_classes']

    key = jax.random.PRNGKey(0)
    pkey, xkey = jax.random.split(key)
    params = init_params(pkey, CFG, num_classes, in_ch=3, bk_dim=64)
    x = jax.random.normal(xkey, (2, 3, 32, 32), jnp.float32)   # NCHW like PyTorch

    fwd = jax.jit(functools.partial(detr_forward, cfg=CFG))
    out = jax.block_until_ready(fwd(params, x))

    assert out['pred_logits'].shape == (2, CFG['num_queries'], num_classes + 1)
    assert out['pred_boxes'].shape == (2, CFG['num_queries'], 4)
    assert bool(jnp.all(jnp.isfinite(out['pred_logits'])))
    assert bool(jnp.all(jnp.isfinite(out['pred_boxes'])))
    print("KERNEL_OK")
</pallas_src>

<mosaic_0001>
module attributes {stable_mosaic.version = 11 : i64} {
  func.func @_stem_kernel(%arg0: i32, %arg1: memref<32x192xbf16, #tpu.memory_space<vmem>>, %arg2: memref<192x64xbf16, #tpu.memory_space<vmem>>, %arg3: memref<1x64xf32, #tpu.memory_space<vmem>>, %arg4: memref<64x32xbf16, #tpu.memory_space<vmem>>, %arg5: memref<1x32xf32, #tpu.memory_space<vmem>>, %arg6: memref<32x32xbf16, #tpu.memory_space<vmem>>) attributes {dimension_semantics = [#tpu.dimension_semantics<parallel>], iteration_bounds = array<i64: 1>, scalar_prefetch = 0 : i64, scratch_operands = 0 : i64, tpu.core_type = #tpu.core_type<tc>, window_params = [{transform_indices = @transform_0, window_bounds = array<i64: 32, 192>}, {pipeline_mode = #tpu.pipeline_mode<synchronous>, transform_indices = @transform_1, window_bounds = array<i64: 192, 64>}, {pipeline_mode = #tpu.pipeline_mode<synchronous>, transform_indices = @transform_2, window_bounds = array<i64: 1, 64>}, {pipeline_mode = #tpu.pipeline_mode<synchronous>, transform_indices = @transform_3, window_bounds = array<i64: 64, 32>}, {pipeline_mode = #tpu.pipeline_mode<synchronous>, transform_indices = @transform_4, window_bounds = array<i64: 1, 32>}, {transform_indices = @transform_5, window_bounds = array<i64: 32, 32>}]} {
    %c0 = arith.constant 0 : index
    %c0_0 = arith.constant 0 : index
    %0 = vector.load %arg1[%c0, %c0_0] : memref<32x192xbf16, #tpu.memory_space<vmem>>, vector<32x192xbf16>
    %c0_1 = arith.constant 0 : index
    %c0_2 = arith.constant 0 : index
    %1 = vector.load %arg2[%c0_1, %c0_2] : memref<192x64xbf16, #tpu.memory_space<vmem>>, vector<192x64xbf16>
    %cst = arith.constant dense<0.000000e+00> : vector<32x64xf32>
    %2 = tpu.matmul %0, %1, %cst {dimension_numbers = #tpu.dot_dimension_numbers<[1], [0], [0], [1], [0, 0, 1, 1], [], []>} : vector<32x192xbf16>, vector<192x64xbf16>, vector<32x64xf32> -> vector<32x64xf32>
    %c0_3 = arith.constant 0 : index
    %c0_4 = arith.constant 0 : index
    %3 = vector.load %arg3[%c0_3, %c0_4] : memref<1x64xf32, #tpu.memory_space<vmem>>, vector<1x64xf32>
    %4 = vector.broadcast %3 : vector<1x64xf32> to vector<32x64xf32>
    %5 = arith.addf %2, %4 : vector<32x64xf32>
    %cst_5 = arith.constant 0.000000e+00 : f32
    %6 = vector.broadcast %cst_5 : f32 to vector<32x64xf32>
    %7 = arith.maximumf %5, %6 : vector<32x64xf32>
    %8 = arith.truncf %7 : vector<32x64xf32> to vector<32x64xbf16>
    %c0_6 = arith.constant 0 : index
    %c0_7 = arith.constant 0 : index
    %9 = vector.load %arg4[%c0_6, %c0_7] : memref<64x32xbf16, #tpu.memory_space<vmem>>, vector<64x32xbf16>
    %cst_8 = arith.constant dense<0.000000e+00> : vector<32x32xf32>
    %10 = tpu.matmul %8, %9, %cst_8 {dimension_numbers = #tpu.dot_dimension_numbers<[1], [0], [0], [1], [0, 0, 1, 1], [], []>} : vector<32x64xbf16>, vector<64x32xbf16>, vector<32x32xf32> -> vector<32x32xf32>
    %c0_9 = arith.constant 0 : index
    %c0_10 = arith.constant 0 : index
    %11 = vector.load %arg5[%c0_9, %c0_10] : memref<1x32xf32, #tpu.memory_space<vmem>>, vector<1x32xf32>
    %12 = vector.broadcast %11 : vector<1x32xf32> to vector<32x32xf32>
    %13 = arith.addf %10, %12 : vector<32x32xf32>
    %14 = arith.truncf %13 : vector<32x32xf32> to vector<32x32xbf16>
    %c0_11 = arith.constant 0 : index
    %c0_12 = arith.constant 0 : index
    %15 = vector.load %arg6[%c0_11, %c0_12] : memref<32x32xbf16, #tpu.memory_space<vmem>>, vector<32x32xbf16>
    tpu.vector_store %arg6[%c0_11, %c0_12], %14 {strides = array<i32>} : memref<32x32xbf16, #tpu.memory_space<vmem>>, vector<32x32xbf16>,
    return
  }
  func.func @transform_0(%arg0: i32) -> (i32, i32) {
    %c0_i32 = arith.constant 0 : i32
    %c0_i32_0 = arith.constant 0 : i32
    return %arg0, %c0_i32 : i32, i32
  }
  func.func @transform_1(%arg0: i32) -> (i32, i32) {
    %c0_i32 = arith.constant 0 : i32
    %c0_i32_0 = arith.constant 0 : i32
    %c0_i32_1 = arith.constant 0 : i32
    return %c0_i32, %c0_i32_0 : i32, i32
  }
  func.func @transform_2(%arg0: i32) -> (i32, i32) {
    %c0_i32 = arith.constant 0 : i32
    %c0_i32_0 = arith.constant 0 : i32
    %c0_i32_1 = arith.constant 0 : i32
    return %c0_i32, %c0_i32_0 : i32, i32
  }
  func.func @transform_3(%arg0: i32) -> (i32, i32) {
    %c0_i32 = arith.constant 0 : i32
    %c0_i32_0 = arith.constant 0 : i32
    %c0_i32_1 = arith.constant 0 : i32
    return %c0_i32, %c0_i32_0 : i32, i32
  }
  func.func @transform_4(%arg0: i32) -> (i32, i32) {
    %c0_i32 = arith.constant 0 : i32
    %c0_i32_0 = arith.constant 0 : i32
    %c0_i32_1 = arith.constant 0 : i32
    return %c0_i32, %c0_i32_0 : i32, i32
  }
  func.func @transform_5(%arg0: i32) -> (i32, i32) {
    %c0_i32 = arith.constant 0 : i32
    %c0_i32_0 = arith.constant 0 : i32
    return %arg0, %c0_i32 : i32, i32
  }
}

module attributes {stable_mosaic.version = 11 : i64} {
  func.func @_enc_layer_kernel(%arg0: i32, %arg1: memref<1x16x32xbf16, #tpu.memory_space<vmem>>, %arg2: memref<1x16x32xbf16, #tpu.memory_space<vmem>>, %arg3: memref<32x96xbf16, #tpu.memory_space<vmem>>, %arg4: memref<1x96xf32, #tpu.memory_space<vmem>>, %arg5: memref<32x32xbf16, #tpu.memory_space<vmem>>, %arg6: memref<3x32xf32, #tpu.memory_space<vmem>>, %arg7: memref<32x64xbf16, #tpu.memory_space<vmem>>, %arg8: memref<1x64xf32, #tpu.memory_space<vmem>>, %arg9: memref<64x32xbf16, #tpu.memory_space<vmem>>, %arg10: memref<3x32xf32, #tpu.memory_space<vmem>>, %arg11: memref<1x16x32xbf16, #tpu.memory_space<vmem>>) attributes {dimension_semantics = [#tpu.dimension_semantics<parallel>], iteration_bounds = array<i64: 2>, scalar_prefetch = 0 : i64, scratch_operands = 0 : i64, tpu.core_type = #tpu.core_type<tc>, window_params = [{transform_indices = @transform_0, window_bounds = array<i64: 1, 16, 32>}, {transform_indices = @transform_1, window_bounds = array<i64: 1, 16, 32>}, {pipeline_mode = #tpu.pipeline_mode<synchronous>, transform_indices = @transform_2, window_bounds = array<i64: 32, 96>}, {pipeline_mode = #tpu.pipeline_mode<synchronous>, transform_indices = @transform_3, window_bounds = array<i64: 1, 96>}, {pipeline_mode = #tpu.pipeline_mode<synchronous>, transform_indices = @transform_4, window_bounds = array<i64: 32, 32>}, {pipeline_mode = #tpu.pipeline_mode<synchronous>, transform_indices = @transform_5, window_bounds = array<i64: 3, 32>}, {pipeline_mode = #tpu.pipeline_mode<synchronous>, transform_indices = @transform_6, window_bounds = array<i64: 32, 64>}, {pipeline_mode = #tpu.pipeline_mode<synchronous>, transform_indices = @transform_7, window_bounds = array<i64: 1, 64>}, {pipeline_mode = #tpu.pipeline_mode<synchronous>, transform_indices = @transform_8, window_bounds = array<i64: 64, 32>}, {pipeline_mode = #tpu.pipeline_mode<synchronous>, transform_indices = @transform_9, window_bounds = array<i64: 3, 32>}, {transform_indices = @transform_10, window_bounds = array<i64: 1, 16, 32>}]} {
    %c0 = arith.constant 0 : index
    %c0_0 = arith.constant 0 : index
    %c0_1 = arith.constant 0 : index
    %0 = vector.load %arg1[%c0, %c0_0, %c0_1] : memref<1x16x32xbf16, #tpu.memory_space<vmem>>, vector<1x16x32xbf16>
    %1 = vector.shape_cast %0 : vector<1x16x32xbf16> to vector<16x32xbf16>
    %c0_2 = arith.constant 0 : index
    %c0_3 = arith.constant 0 : index
    %c0_4 = arith.constant 0 : index
    %2 = vector.load %arg2[%c0_2, %c0_3, %c0_4] : memref<1x16x32xbf16, #tpu.memory_space<vmem>>, vector<1x16x32xbf16>
    %3 = vector.shape_cast %2 : vector<1x16x32xbf16> to vector<16x32xbf16>
    %c0_5 = arith.constant 0 : index
    %c0_6 = arith.constant 0 : index
    %4 = vector.load %arg6[%c0_5, %c0_6] : memref<3x32xf32, #tpu.memory_space<vmem>>, vector<3x32xf32>
    %c0_7 = arith.constant 0 : index
    %c0_8 = arith.constant 0 : index
    %5 = vector.load %arg3[%c0_7, %c0_8] : memref<32x96xbf16, #tpu.memory_space<vmem>>, vector<32x96xbf16>
    %c0_9 = arith.constant 0 : index
    %c0_10 = arith.constant 0 : index
    %6 = vector.load %arg4[%c0_9, %c0_10] : memref<1x96xf32, #tpu.memory_space<vmem>>, vector<1x96xf32>
    %c0_11 = arith.constant 0 : index
    %c0_12 = arith.constant 0 : index
    %7 = vector.load %arg5[%c0_11, %c0_12] : memref<32x32xbf16, #tpu.memory_space<vmem>>, vector<32x32xbf16>
    %8 = vector.extract_strided_slice %4 {offsets = [0, 0], sizes = [1, 32], strides = [1, 1]} : vector<3x32xf32> to vector<1x32xf32>
    %9 = vector.extract_strided_slice %4 {offsets = [1, 0], sizes = [1, 32], strides = [1, 1]} : vector<3x32xf32> to vector<1x32xf32>
    %10 = vector.extract_strided_slice %4 {offsets = [2, 0], sizes = [1, 32], strides = [1, 1]} : vector<3x32xf32> to vector<1x32xf32>
    %11 = arith.addf %1, %3 : vector<16x32xbf16>
    %12 = arith.addf %1, %3 : vector<16x32xbf16>
    %13 = vector.extract_strided_slice %5 {offsets = [0, 0], sizes = [32, 32], strides = [1, 1]} : vector<32x96xbf16> to vector<32x32xbf16>
    %cst = arith.constant dense<0.000000e+00> : vector<16x32xf32>
    %14 = tpu.matmul %11, %13, %cst {dimension_numbers = #tpu.dot_dimension_numbers<[1], [0], [0], [1], [0, 0, 1, 1], [], []>} : vector<16x32xbf16>, vector<32x32xbf16>, vector<16x32xf32> -> vector<16x32xf32>
    %15 = vector.extract_strided_slice %6 {offsets = [0, 0], sizes = [1, 32], strides = [1, 1]} : vector<1x96xf32> to vector<1x32xf32>
    %16 = vector.broadcast %15 : vector<1x32xf32> to vector<16x32xf32>
    %17 = arith.addf %14, %16 : vector<16x32xf32>
    %cst_13 = arith.constant 0.353553385 : f32
    %18 = vector.broadcast %cst_13 : f32 to vector<16x32xf32>
    %19 = arith.mulf %17, %18 : vector<16x32xf32>
    %20 = vector.extract_strided_slice %5 {offsets = [0, 32], sizes = [32, 32], strides = [1, 1]} : vector<32x96xbf16> to vector<32x32xbf16>
    %cst_14 = arith.constant dense<0.000000e+00> : vector<16x32xf32>
    %21 = tpu.matmul %12, %20, %cst_14 {dimension_numbers = #tpu.dot_dimension_numbers<[1], [0], [0], [1], [0, 0, 1, 1], [], []>} : vector<16x32xbf16>, vector<32x32xbf16>, vector<16x32xf32> -> vector<16x32xf32>
    %22 = vector.extract_strided_slice %6 {offsets = [0, 32], sizes = [1, 32], strides = [1, 1]} : vector<1x96xf32> to vector<1x32xf32>
    %23 = vector.broadcast %22 : vector<1x32xf32> to vector<16x32xf32>
    %24 = arith.addf %21, %23 : vector<16x32xf32>
    %25 = vector.extract_strided_slice %5 {offsets = [0, 64], sizes = [32, 32], strides = [1, 1]} : vector<32x96xbf16> to vector<32x32xbf16>
    %cst_15 = arith.constant dense<0.000000e+00> : vector<16x32xf32>
    %26 = tpu.matmul %1, %25, %cst_15 {dimension_numbers = #tpu.dot_dimension_numbers<[1], [0], [0], [1], [0, 0, 1, 1], [], []>} : vector<16x32xbf16>, vector<32x32xbf16>, vector<16x32xf32> -> vector<16x32xf32>
    %27 = vector.extract_strided_slice %6 {offsets = [0, 64], sizes = [1, 32], strides = [1, 1]} : vector<1x96xf32> to vector<1x32xf32>
    %28 = vector.broadcast %27 : vector<1x32xf32> to vector<16x32xf32>
    %29 = arith.addf %26, %28 : vector<16x32xf32>
    %30 = arith.truncf %19 : vector<16x32xf32> to vector<16x32xbf16>
    %31 = arith.truncf %24 : vector<16x32xf32> to vector<16x32xbf16>
    %32 = arith.truncf %29 : vector<16x32xf32> to vector<16x32xbf16>
    %cst_16 = arith.constant 0.000000e+00 : f32
    %33 = vector.broadcast %cst_16 : f32 to vector<16x32xf32>
    %34 = vector.extract_strided_slice %30 {offsets = [0, 0], sizes = [16, 8], strides = [1, 1]} : vector<16x32xbf16> to vector<16x8xbf16>
    %35 = vector.extract_strided_slice %31 {offsets = [0, 0], sizes = [16, 8], strides = [1, 1]} : vector<16x32xbf16> to vector<16x8xbf16>
    %cst_17 = arith.constant dense<0.000000e+00> : vector<16x16xf32>
    %36 = tpu.matmul %34, %35, %cst_17 {dimension_numbers = #tpu.dot_dimension_numbers<[1], [1], [0], [0], [0, 0, 1, 0], [], []>} : vector<16x8xbf16>, vector<16x8xbf16>, vector<16x16xf32> -> vector<16x16xf32>
    %cst_18 = arith.constant dense<0xFF800000> : vector<16xf32>
    %37 = vector.multi_reduction <maximumf>, %36, %cst_18 [1] : vector<16x16xf32> to vector<16xf32>
    %38 = vector.shape_cast %37 : vector<16xf32> to vector<16x1xf32>
    %39 = vector.broadcast %38 : vector<16x1xf32> to vector<16x16xf32>
    %40 = arith.subf %36, %39 : vector<16x16xf32>
    %41 = math.exp %40 : vector<16x16xf32>
    %cst_19 = arith.constant dense<0.000000e+00> : vector<16xf32>
    %42 = vector.multi_reduction <add>, %41, %cst_19 [1] : vector<16x16xf32> to vector<16xf32>
    %43 = vector.shape_cast %42 : vector<16xf32> to vector<16x1xf32>
    %44 = tpu.reciprocal %43 {approx = true} : vector<16x1xf32> -> vector<16x1xf32>
    %45 = vector.broadcast %44 : vector<16x1xf32> to vector<16x16xf32>
    %46 = arith.mulf %41, %45 : vector<16x16xf32>
    %47 = arith.truncf %46 : vector<16x16xf32> to vector<16x16xbf16>
    %48 = vector.extract_strided_slice %32 {offsets = [0, 0], sizes = [16, 8], strides = [1, 1]} : vector<16x32xbf16> to vector<16x8xbf16>
    %cst_20 = arith.constant dense<0.000000e+00> : vector<16x8xf32>
    %49 = tpu.matmul %47, %48, %cst_20 {dimension_numbers = #tpu.dot_dimension_numbers<[1], [0], [0], [1], [0, 0, 1, 1], [], []>} : vector<16x16xbf16>, vector<16x8xbf16>, vector<16x8xf32> -> vector<16x8xf32>
    %50 = arith.truncf %49 : vector<16x8xf32> to vector<16x8xbf16>
    %51 = vector.extract_strided_slice %7 {offsets = [0, 0], sizes = [8, 32], strides = [1, 1]} : vector<32x32xbf16> to vector<8x32xbf16>
    %cst_21 = arith.constant dense<0.000000e+00> : vector<16x32xf32>
    %52 = tpu.matmul %50, %51, %cst_21 {dimension_numbers = #tpu.dot_dimension_numbers<[1], [0], [0], [1], [0, 0, 1, 1], [], []>} : vector<16x8xbf16>, vector<8x32xbf16>, vector<16x32xf32> -> vector<16x32xf32>
    %53 = arith.addf %33, %52 : vector<16x32xf32>
    %54 = vector.extract_strided_slice %30 {offsets = [0, 8], sizes = [16, 8], strides = [1, 1]} : vector<16x32xbf16> to vector<16x8xbf16>
    %55 = vector.extract_strided_slice %31 {offsets = [0, 8], sizes = [16, 8], strides = [1, 1]} : vector<16x32xbf16> to vector<16x8xbf16>
    %cst_22 = arith.constant dense<0.000000e+00> : vector<16x16xf32>
    %56 = tpu.matmul %54, %55, %cst_22 {dimension_numbers = #tpu.dot_dimension_numbers<[1], [1], [0], [0], [0, 0, 1, 0], [], []>} : vector<16x8xbf16>, vector<16x8xbf16>, vector<16x16xf32> -> vector<16x16xf32>
    %cst_23 = arith.constant dense<0xFF800000> : vector<16xf32>
    %57 = vector.multi_reduction <maximumf>, %56, %cst_23 [1] : vector<16x16xf32> to vector<16xf32>
    %58 = vector.shape_cast %57 : vector<16xf32> to vector<16x1xf32>
    %59 = vector.broadcast %58 : vector<16x1xf32> to vector<16x16xf32>
    %60 = arith.subf %56, %59 : vector<16x16xf32>
    %61 = math.exp %60 : vector<16x16xf32>
    %cst_24 = arith.constant dense<0.000000e+00> : vector<16xf32>
    %62 = vector.multi_reduction <add>, %61, %cst_24 [1] : vector<16x16xf32> to vector<16xf32>
    %63 = vector.shape_cast %62 : vector<16xf32> to vector<16x1xf32>
    %64 = tpu.reciprocal %63 {approx = true} : vector<16x1xf32> -> vector<16x1xf32>
    %65 = vector.broadcast %64 : vector<16x1xf32> to vector<16x16xf32>
    %66 = arith.mulf %61, %65 : vector<16x16xf32>
    %67 = arith.truncf %66 : vector<16x16xf32> to vector<16x16xbf16>
    %68 = vector.extract_strided_slice %32 {offsets = [0, 8], sizes = [16, 8], strides = [1, 1]} : vector<16x32xbf16> to vector<16x8xbf16>
    %cst_25 = arith.constant dense<0.000000e+00> : vector<16x8xf32>
    %69 = tpu.matmul %67, %68, %cst_25 {dimension_numbers = #tpu.dot_dimension_numbers<[1], [0], [0], [1], [0, 0, 1, 1], [], []>} : vector<16x16xbf16>, vector<16x8xbf16>, vector<16x8xf32> -> vector<16x8xf32>
    %70 = arith.truncf %69 : vector<16x8xf32> to vector<16x8xbf16>
    %71 = vector.extract_strided_slice %7 {offsets = [8, 0], sizes = [8, 32], strides = [1, 1]} : vector<32x32xbf16> to vector<8x32xbf16>
    %cst_26 = arith.constant dense<0.000000e+00> : vector<16x32xf32>
    %72 = tpu.matmul %70, %71, %cst_26 {dimension_numbers = #tpu.dot_dimension_numbers<[1], [0], [0], [1], [0, 0, 1, 1], [], []>} : vector<16x8xbf16>, vector<8x32xbf16>, vector<16x32xf32> -> vector<16x32xf32>
    %73 = arith.addf %53, %72 : vector<16x32xf32>
    %74 = vector.extract_strided_slice %30 {offsets = [0, 16], sizes = [16, 8], strides = [1, 1]} : vector<16x32xbf16> to vector<16x8xbf16>
    %75 = vector.extract_strided_slice %31 {offsets = [0, 16], sizes = [16, 8], strides = [1, 1]} : vector<16x32xbf16> to vector<16x8xbf16>
    %cst_27 = arith.constant dense<0.000000e+00> : vector<16x16xf32>
    %76 = tpu.matmul %74, %75, %cst_27 {dimension_numbers = #tpu.dot_dimension_numbers<[1], [1], [0], [0], [0, 0, 1, 0], [], []>} : vector<16x8xbf16>, vector<16x8xbf16>, vector<16x16xf32> -> vector<16x16xf32>
    %cst_28 = arith.constant dense<0xFF800000> : vector<16xf32>
    %77 = vector.multi_reduction <maximumf>, %76, %cst_28 [1] : vector<16x16xf32> to vector<16xf32>
    %78 = vector.shape_cast %77 : vector<16xf32> to vector<16x1xf32>
    %79 = vector.broadcast %78 : vector<16x1xf32> to vector<16x16xf32>
    %80 = arith.subf %76, %79 : vector<16x16xf32>
    %81 = math.exp %80 : vector<16x16xf32>
    %cst_29 = arith.constant dense<0.000000e+00> : vector<16xf32>
    %82 = vector.multi_reduction <add>, %81, %cst_29 [1] : vector<16x16xf32> to vector<16xf32>
    %83 = vector.shape_cast %82 : vector<16xf32> to vector<16x1xf32>
    %84 = tpu.reciprocal %83 {approx = true} : vector<16x1xf32> -> vector<16x1xf32>
    %85 = vector.broadcast %84 : vector<16x1xf32> to vector<16x16xf32>
    %86 = arith.mulf %81, %85 : vector<16x16xf32>
    %87 = arith.truncf %86 : vector<16x16xf32> to vector<16x16xbf16>
    %88 = vector.extract_strided_slice %32 {offsets = [0, 16], sizes = [16, 8], strides = [1, 1]} : vector<16x32xbf16> to vector<16x8xbf16>
    %cst_30 = arith.constant dense<0.000000e+00> : vector<16x8xf32>
    %89 = tpu.matmul %87, %88, %cst_30 {dimension_numbers = #tpu.dot_dimension_numbers<[1], [0], [0], [1], [0, 0, 1, 1], [], []>} : vector<16x16xbf16>, vector<16x8xbf16>, vector<16x8xf32> -> vector<16x8xf32>
    %90 = arith.truncf %89 : vector<16x8xf32> to vector<16x8xbf16>
    %91 = vector.extract_strided_slice %7 {offsets = [16, 0], sizes = [8, 32], strides = [1, 1]} : vector<32x32xbf16> to vector<8x32xbf16>
    %cst_31 = arith.constant dense<0.000000e+00> : vector<16x32xf32>
    %92 = tpu.matmul %90, %91, %cst_31 {dimension_numbers = #tpu.dot_dimension_numbers<[1], [0], [0], [1], [0, 0, 1, 1], [], []>} : vector<16x8xbf16>, vector<8x32xbf16>, vector<16x32xf32> -> vector<16x32xf32>
    %93 = arith.addf %73, %92 : vector<16x32xf32>
    %94 = vector.extract_strided_slice %30 {offsets = [0, 24], sizes = [16, 8], strides = [1, 1]} : vector<16x32xbf16> to vector<16x8xbf16>
    %95 = vector.extract_strided_slice %31 {offsets = [0, 24], sizes = [16, 8], strides = [1, 1]} : vector<16x32xbf16> to vector<16x8xbf16>
    %cst_32 = arith.constant dense<0.000000e+00> : vector<16x16xf32>
    %96 = tpu.matmul %94, %95, %cst_32 {dimension_numbers = #tpu.dot_dimension_numbers<[1], [1], [0], [0], [0, 0, 1, 0], [], []>} : vector<16x8xbf16>, vector<16x8xbf16>, vector<16x16xf32> -> vector<16x16xf32>
    %cst_33 = arith.constant dense<0xFF800000> : vector<16xf32>
    %97 = vector.multi_reduction <maximumf>, %96, %cst_33 [1] : vector<16x16xf32> to vector<16xf32>
    %98 = vector.shape_cast %97 : vector<16xf32> to vector<16x1xf32>
    %99 = vector.broadcast %98 : vector<16x1xf32> to vector<16x16xf32>
    %100 = arith.subf %96, %99 : vector<16x16xf32>
    %101 = math.exp %100 : vector<16x16xf32>
    %cst_34 = arith.constant dense<0.000000e+00> : vector<16xf32>
    %102 = vector.multi_reduction <add>, %101, %cst_34 [1] : vector<16x16xf32> to vector<16xf32>
    %103 = vector.shape_cast %102 : vector<16xf32> to vector<16x1xf32>
    %104 = tpu.reciprocal %103 {approx = true} : vector<16x1xf32> -> vector<16x1xf32>
    %105 = vector.broadcast %104 : vector<16x1xf32> to vector<16x16xf32>
    %106 = arith.mulf %101, %105 : vector<16x16xf32>
    %107 = arith.truncf %106 : vector<16x16xf32> to vector<16x16xbf16>
    %108 = vector.extract_strided_slice %32 {offsets = [0, 24], sizes = [16, 8], strides = [1, 1]} : vector<16x32xbf16> to vector<16x8xbf16>
    %cst_35 = arith.constant dense<0.000000e+00> : vector<16x8xf32>
    %109 = tpu.matmul %107, %108, %cst_35 {dimension_numbers = #tpu.dot_dimension_numbers<[1], [0], [0], [1], [0, 0, 1, 1], [], []>} : vector<16x16xbf16>, vector<16x8xbf16>, vector<16x8xf32> -> vector<16x8xf32>
    %110 = arith.truncf %109 : vector<16x8xf32> to vector<16x8xbf16>
    %111 = vector.extract_strided_slice %7 {offsets = [24, 0], sizes = [8, 32], strides = [1, 1]} : vector<32x32xbf16> to vector<8x32xbf16>
    %cst_36 = arith.constant dense<0.000000e+00> : vector<16x32xf32>
    %112 = tpu.matmul %110, %111, %cst_36 {dimension_numbers = #tpu.dot_dimension_numbers<[1], [0], [0], [1], [0, 0, 1, 1], [], []>} : vector<16x8xbf16>, vector<8x32xbf16>, vector<16x32xf32> -> vector<16x32xf32>
    %113 = arith.addf %93, %112 : vector<16x32xf32>
    %114 = vector.broadcast %8 : vector<1x32xf32> to vector<16x32xf32>
    %115 = arith.addf %113, %114 : vector<16x32xf32>
    %116 = arith.extf %1 : vector<16x32xbf16> to vector<16x32xf32>
    %117 = arith.addf %115, %116 : vector<16x32xf32>
    %cst_37 = arith.constant dense<0.000000e+00> : vector<16xf32>
    %118 = vector.multi_reduction <add>, %117, %cst_37 [1] : vector<16x32xf32> to vector<16xf32>
    %119 = vector.shape_cast %118 : vector<16xf32> to vector<16x1xf32>
    %cst_38 = arith.constant 3.200000e+01 : f32
    %120 = vector.broadcast %cst_38 : f32 to vector<16x1xf32>
    %121 = arith.divf %119, %120 : vector<16x1xf32>
    %122 = vector.broadcast %121 : vector<16x1xf32> to vector<16x32xf32>
    %123 = arith.subf %117, %122 : vector<16x32xf32>
    %124 = arith.mulf %123, %123 : vector<16x32xf32>
    %cst_39 = arith.constant dense<0.000000e+00> : vector<16xf32>
    %125 = vector.multi_reduction <add>, %124, %cst_39 [1] : vector<16x32xf32> to vector<16xf32>
    %126 = vector.shape_cast %125 : vector<16xf32> to vector<16x1xf32>
    %cst_40 = arith.constant 3.200000e+01 : f32
    %127 = vector.broadcast %cst_40 : f32 to vector<16x1xf32>
    %128 = arith.divf %126, %127 : vector<16x1xf32>
    %129 = vector.broadcast %121 : vector<16x1xf32> to vector<16x32xf32>
    %130 = arith.subf %117, %129 : vector<16x32xf32>
    %cst_41 = arith.constant 9.99999974E-6 : f32
    %131 = vector.broadcast %cst_41 : f32 to vector<16x1xf32>
    %132 = arith.addf %128, %131 : vector<16x1xf32>
    %133 = math.rsqrt %132 : vector<16x1xf32>
    %134 = vector.broadcast %133 : vector<16x1xf32> to vector<16x32xf32>
    %135 = arith.mulf %130, %134 : vector<16x32xf32>
    %136 = vector.broadcast %9 : vector<1x32xf32> to vector<16x32xf32>
    %137 = arith.mulf %135, %136 : vector<16x32xf32>
    %138 = vector.broadcast %10 : vector<1x32xf32> to vector<16x32xf32>
    %139 = arith.addf %137, %138 : vector<16x32xf32>
    %c0_42 = arith.constant 0 : index
    %c0_43 = arith.constant 0 : index
    %140 = vector.load %arg10[%c0_42, %c0_43] : memref<3x32xf32, #tpu.memory_space<vmem>>, vector<3x32xf32>
    %c0_44 = arith.constant 0 : index
    %c0_45 = arith.constant 0 : index
    %141 = vector.load %arg7[%c0_44, %c0_45] : memref<32x64xbf16, #tpu.memory_space<vmem>>, vector<32x64xbf16>
    %c0_46 = arith.constant 0 : index
    %c0_47 = arith.constant 0 : index
    %142 = vector.load %arg8[%c0_46, %c0_47] : memref<1x64xf32, #tpu.memory_space<vmem>>, vector<1x64xf32>
    %c0_48 = arith.constant 0 : index
    %c0_49 = arith.constant 0 : index
    %143 = vector.load %arg9[%c0_48, %c0_49] : memref<64x32xbf16, #tpu.memory_space<vmem>>, vector<64x32xbf16>
    %144 = vector.extract_strided_slice %140 {offsets = [0, 0], sizes = [1, 32], strides = [1, 1]} : vector<3x32xf32> to vector<1x32xf32>
    %145 = vector.extract_strided_slice %140 {offsets = [1, 0], sizes = [1, 32], strides = [1, 1]} : vector<3x32xf32> to vector<1x32xf32>
    %146 = vector.extract_strided_slice %140 {offsets = [2, 0], sizes = [1, 32], strides = [1, 1]} : vector<3x32xf32> to vector<1x32xf32>
    %147 = arith.truncf %139 : vector<16x32xf32> to vector<16x32xbf16>
    %cst_50 = arith.constant dense<0.000000e+00> : vector<16x64xf32>
    %148 = tpu.matmul %147, %141, %cst_50 {dimension_numbers = #tpu.dot_dimension_numbers<[1], [0], [0], [1], [0, 0, 1, 1], [], []>} : vector<16x32xbf16>, vector<32x64xbf16>, vector<16x64xf32> -> vector<16x64xf32>
    %149 = vector.broadcast %142 : vector<1x64xf32> to vector<16x64xf32>
    %150 = arith.addf %148, %149 : vector<16x64xf32>
    %cst_51 = arith.constant 0.000000e+00 : f32
    %151 = vector.broadcast %cst_51 : f32 to vector<16x64xf32>
    %152 = arith.maximumf %150, %151 : vector<16x64xf32>
    %153 = arith.truncf %152 : vector<16x64xf32> to vector<16x64xbf16>
    %cst_52 = arith.constant dense<0.000000e+00> : vector<16x32xf32>
    %154 = tpu.matmul %153, %143, %cst_52 {dimension_numbers = #tpu.dot_dimension_numbers<[1], [0], [0], [1], [0, 0, 1, 1], [], []>} : vector<16x64xbf16>, vector<64x32xbf16>, vector<16x32xf32> -> vector<16x32xf32>
    %155 = vector.broadcast %144 : vector<1x32xf32> to vector<16x32xf32>
    %156 = arith.addf %154, %155 : vector<16x32xf32>
    %157 = arith.addf %156, %139 : vector<16x32xf32>
    %cst_53 = arith.constant dense<0.000000e+00> : vector<16xf32>
    %158 = vector.multi_reduction <add>, %157, %cst_53 [1] : vector<16x32xf32> to vector<16xf32>
    %159 = vector.shape_cast %158 : vector<16xf32> to vector<16x1xf32>
    %cst_54 = arith.constant 3.200000e+01 : f32
    %160 = vector.broadcast %cst_54 : f32 to vector<16x1xf32>
    %161 = arith.divf %159, %160 : vector<16x1xf32>
    %162 = vector.broadcast %161 : vector<16x1xf32> to vector<16x32xf32>
    %163 = arith.subf %157, %162 : vector<16x32xf32>
    %164 = arith.mulf %163, %163 : vector<16x32xf32>
    %cst_55 = arith.constant dense<0.000000e+00> : vector<16xf32>
    %165 = vector.multi_reduction <add>, %164, %cst_55 [1] : vector<16x32xf32> to vector<16xf32>
    %166 = vector.shape_cast %165 : vector<16xf32> to vector<16x1xf32>
    %cst_56 = arith.constant 3.200000e+01 : f32
    %167 = vector.broadcast %cst_56 : f32 to vector<16x1xf32>
    %168 = arith.divf %166, %167 : vector<16x1xf32>
    %169 = vector.broadcast %161 : vector<16x1xf32> to vector<16x32xf32>
    %170 = arith.subf %157, %169 : vector<16x32xf32>
    %cst_57 = arith.constant 9.99999974E-6 : f32
    %171 = vector.broadcast %cst_57 : f32 to vector<16x1xf32>
    %172 = arith.addf %168, %171 : vector<16x1xf32>
    %173 = math.rsqrt %172 : vector<16x1xf32>
    %174 = vector.broadcast %173 : vector<16x1xf32> to vector<16x32xf32>
    %175 = arith.mulf %170, %174 : vector<16x32xf32>
    %176 = vector.broadcast %145 : vector<1x32xf32> to vector<16x32xf32>
    %177 = arith.mulf %175, %176 : vector<16x32xf32>
    %178 = vector.broadcast %146 : vector<1x32xf32> to vector<16x32xf32>
    %179 = arith.addf %177, %178 : vector<16x32xf32>
    %180 = arith.truncf %179 : vector<16x32xf32> to vector<16x32xbf16>
    %c0_58 = arith.constant 0 : index
    %c0_59 = arith.constant 0 : index
    %c0_60 = arith.constant 0 : index
    %181 = vector.load %arg11[%c0_58, %c0_59, %c0_60] : memref<1x16x32xbf16, #tpu.memory_space<vmem>>, vector<1x16x32xbf16>
    %182 = vector.shape_cast %181 : vector<1x16x32xbf16> to vector<16x32xbf16>
    %183 = vector.shape_cast %180 : vector<16x32xbf16> to vector<1x16x32xbf16>
    tpu.vector_store %arg11[%c0_58, %c0_59, %c0_60], %183 {strides = array<i32>} : memref<1x16x32xbf16, #tpu.memory_space<vmem>>, vector<1x16x32xbf16>,
    return
  }
  func.func @transform_0(%arg0: i32) -> (i32, i32, i32) {
    %c0_i32 = arith.constant 0 : i32
    %c0_i32_0 = arith.constant 0 : i32
    %c0_i32_1 = arith.constant 0 : i32
    return %arg0, %c0_i32, %c0_i32_0 : i32, i32, i32
  }
  func.func @transform_1(%arg0: i32) -> (i32, i32, i32) {
    %c0_i32 = arith.constant 0 : i32
    %c0_i32_0 = arith.constant 0 : i32
    %c0_i32_1 = arith.constant 0 : i32
    return %arg0, %c0_i32, %c0_i32_0 : i32, i32, i32
  }
  func.func @transform_2(%arg0: i32) -> (i32, i32) {
    %c0_i32 = arith.constant 0 : i32
    %c0_i32_0 = arith.constant 0 : i32
    %c0_i32_1 = arith.constant 0 : i32
    return %c0_i32, %c0_i32_0 : i32, i32
  }
  func.func @transform_3(%arg0: i32) -> (i32, i32) {
    %c0_i32 = arith.constant 0 : i32
    %c0_i32_0 = arith.constant 0 : i32
    %c0_i32_1 = arith.constant 0 : i32
    return %c0_i32, %c0_i32_0 : i32, i32
  }
  func.func @transform_4(%arg0: i32) -> (i32, i32) {
    %c0_i32 = arith.constant 0 : i32
    %c0_i32_0 = arith.constant 0 : i32
    %c0_i32_1 = arith.constant 0 : i32
    return %c0_i32, %c0_i32_0 : i32, i32
  }
  func.func @transform_5(%arg0: i32) -> (i32, i32) {
    %c0_i32 = arith.constant 0 : i32
    %c0_i32_0 = arith.constant 0 : i32
    %c0_i32_1 = arith.constant 0 : i32
    return %c0_i32, %c0_i32_0 : i32, i32
  }
  func.func @transform_6(%arg0: i32) -> (i32, i32) {
    %c0_i32 = arith.constant 0 : i32
    %c0_i32_0 = arith.constant 0 : i32
    %c0_i32_1 = arith.constant 0 : i32
    return %c0_i32, %c0_i32_0 : i32, i32
  }
  func.func @transform_7(%arg0: i32) -> (i32, i32) {
    %c0_i32 = arith.constant 0 : i32
    %c0_i32_0 = arith.constant 0 : i32
    %c0_i32_1 = arith.constant 0 : i32
    return %c0_i32, %c0_i32_0 : i32, i32
  }
  func.func @transform_8(%arg0: i32) -> (i32, i32) {
    %c0_i32 = arith.constant 0 : i32
    %c0_i32_0 = arith.constant 0 : i32
    %c0_i32_1 = arith.constant 0 : i32
    return %c0_i32, %c0_i32_0 : i32, i32
  }
  func.func @transform_9(%arg0: i32) -> (i32, i32) {
    %c0_i32 = arith.constant 0 : i32
    %c0_i32_0 = arith.constant 0 : i32
    %c0_i32_1 = arith.constant 0 : i32
    return %c0_i32, %c0_i32_0 : i32, i32
  }
  func.func @transform_10(%arg0: i32) -> (i32, i32, i32) {
    %c0_i32 = arith.constant 0 : i32
    %c0_i32_0 = arith.constant 0 : i32
    %c0_i32_1 = arith.constant 0 : i32
    return %arg0, %c0_i32, %c0_i32_0 : i32, i32, i32
  }
}

module attributes {stable_mosaic.version = 11 : i64} {
  func.func @_heads_kernel(%arg0: i32, %arg1: memref<16x32xbf16, #tpu.memory_space<vmem>>, %arg2: memref<2x32xf32, #tpu.memory_space<vmem>>, %arg3: memref<32x128xbf16, #tpu.memory_space<vmem>>, %arg4: memref<1x128xf32, #tpu.memory_space<vmem>>, %arg5: memref<32x32xbf16, #tpu.memory_space<vmem>>, %arg6: memref<1x32xf32, #tpu.memory_space<vmem>>, %arg7: memref<32x32xbf16, #tpu.memory_space<vmem>>, %arg8: memref<1x32xf32, #tpu.memory_space<vmem>>, %arg9: memref<32x128xbf16, #tpu.memory_space<vmem>>, %arg10: memref<1x128xf32, #tpu.memory_space<vmem>>, %arg11: memref<16x128xf32, #tpu.memory_space<vmem>>, %arg12: memref<16x128xf32, #tpu.memory_space<vmem>>) attributes {dimension_semantics = [#tpu.dimension_semantics<arbitrary>], iteration_bounds = array<i64: 1>, scalar_prefetch = 0 : i64, scratch_operands = 0 : i64, tpu.core_type = #tpu.core_type<tc>, window_params = [{pipeline_mode = #tpu.pipeline_mode<synchronous>, transform_indices = @transform_0, window_bounds = array<i64: 16, 32>}, {pipeline_mode = #tpu.pipeline_mode<synchronous>, transform_indices = @transform_1, window_bounds = array<i64: 2, 32>}, {pipeline_mode = #tpu.pipeline_mode<synchronous>, transform_indices = @transform_2, window_bounds = array<i64: 32, 128>}, {pipeline_mode = #tpu.pipeline_mode<synchronous>, transform_indices = @transform_3, window_bounds = array<i64: 1, 128>}, {pipeline_mode = #tpu.pipeline_mode<synchronous>, transform_indices = @transform_4, window_bounds = array<i64: 32, 32>}, {pipeline_mode = #tpu.pipeline_mode<synchronous>, transform_indices = @transform_5, window_bounds = array<i64: 1, 32>}, {pipeline_mode = #tpu.pipeline_mode<synchronous>, transform_indices = @transform_6, window_bounds = array<i64: 32, 32>}, {pipeline_mode = #tpu.pipeline_mode<synchronous>, transform_indices = @transform_7, window_bounds = array<i64: 1, 32>}, {pipeline_mode = #tpu.pipeline_mode<synchronous>, transform_indices = @transform_8, window_bounds = array<i64: 32, 128>}, {pipeline_mode = #tpu.pipeline_mode<synchronous>, transform_indices = @transform_9, window_bounds = array<i64: 1, 128>}, {pipeline_mode = #tpu.pipeline_mode<synchronous>, transform_indices = @transform_10, window_bounds = array<i64: 16, 128>}, {pipeline_mode = #tpu.pipeline_mode<synchronous>, transform_indices = @transform_11, window_bounds = array<i64: 16, 128>}]} {
    %c0 = arith.constant 0 : index
    %c0_0 = arith.constant 0 : index
    %0 = vector.load %arg1[%c0, %c0_0] : memref<16x32xbf16, #tpu.memory_space<vmem>>, vector<16x32xbf16>
    %1 = arith.extf %0 : vector<16x32xbf16> to vector<16x32xf32>
    %c0_1 = arith.constant 0 : index
    %c0_2 = arith.constant 0 : index
    %2 = vector.load %arg2[%c0_1, %c0_2] : memref<2x32xf32, #tpu.memory_space<vmem>>, vector<2x32xf32>
    %3 = vector.extract_strided_slice %2 {offsets = [0, 0], sizes = [1, 32], strides = [1, 1]} : vector<2x32xf32> to vector<1x32xf32>
    %4 = vector.extract_strided_slice %2 {offsets = [1, 0], sizes = [1, 32], strides = [1, 1]} : vector<2x32xf32> to vector<1x32xf32>
    %cst = arith.constant dense<0.000000e+00> : vector<16xf32>
    %5 = vector.multi_reduction <add>, %1, %cst [1] : vector<16x32xf32> to vector<16xf32>
    %6 = vector.shape_cast %5 : vector<16xf32> to vector<16x1xf32>
    %cst_3 = arith.constant 3.200000e+01 : f32
    %7 = vector.broadcast %cst_3 : f32 to vector<16x1xf32>
    %8 = arith.divf %6, %7 : vector<16x1xf32>
    %9 = vector.broadcast %8 : vector<16x1xf32> to vector<16x32xf32>
    %10 = arith.subf %1, %9 : vector<16x32xf32>
    %11 = arith.mulf %10, %10 : vector<16x32xf32>
    %cst_4 = arith.constant dense<0.000000e+00> : vector<16xf32>
    %12 = vector.multi_reduction <add>, %11, %cst_4 [1] : vector<16x32xf32> to vector<16xf32>
    %13 = vector.shape_cast %12 : vector<16xf32> to vector<16x1xf32>
    %cst_5 = arith.constant 3.200000e+01 : f32
    %14 = vector.broadcast %cst_5 : f32 to vector<16x1xf32>
    %15 = arith.divf %13, %14 : vector<16x1xf32>
    %16 = vector.broadcast %8 : vector<16x1xf32> to vector<16x32xf32>
    %17 = arith.subf %1, %16 : vector<16x32xf32>
    %cst_6 = arith.constant 9.99999974E-6 : f32
    %18 = vector.broadcast %cst_6 : f32 to vector<16x1xf32>
    %19 = arith.addf %15, %18 : vector<16x1xf32>
    %20 = math.rsqrt %19 : vector<16x1xf32>
    %21 = vector.broadcast %20 : vector<16x1xf32> to vector<16x32xf32>
    %22 = arith.mulf %17, %21 : vector<16x32xf32>
    %23 = vector.broadcast %3 : vector<1x32xf32> to vector<16x32xf32>
    %24 = arith.mulf %22, %23 : vector<16x32xf32>
    %25 = vector.broadcast %4 : vector<1x32xf32> to vector<16x32xf32>
    %26 = arith.addf %24, %25 : vector<16x32xf32>
    %27 = arith.truncf %26 : vector<16x32xf32> to vector<16x32xbf16>
    %c0_7 = arith.constant 0 : index
    %c0_8 = arith.constant 0 : index
    %28 = vector.load %arg3[%c0_7, %c0_8] : memref<32x128xbf16, #tpu.memory_space<vmem>>, vector<32x128xbf16>
    %cst_9 = arith.constant dense<0.000000e+00> : vector<16x128xf32>
    %29 = tpu.matmul %27, %28, %cst_9 {dimension_numbers = #tpu.dot_dimension_numbers<[1], [0], [0], [1], [0, 0, 1, 1], [], []>} : vector<16x32xbf16>, vector<32x128xbf16>, vector<16x128xf32> -> vector<16x128xf32>
    %c0_10 = arith.constant 0 : index
    %c0_11 = arith.constant 0 : index
    %30 = vector.load %arg4[%c0_10, %c0_11] : memref<1x128xf32, #tpu.memory_space<vmem>>, vector<1x128xf32>
    %31 = vector.broadcast %30 : vector<1x128xf32> to vector<16x128xf32>
    %32 = arith.addf %29, %31 : vector<16x128xf32>
    %c0_12 = arith.constant 0 : index
    %c0_13 = arith.constant 0 : index
    %33 = vector.load %arg11[%c0_12, %c0_13] : memref<16x128xf32, #tpu.memory_space<vmem>>, vector<16x128xf32>
    tpu.vector_store %arg11[%c0_12, %c0_13], %32 {strides = array<i32>} : memref<16x128xf32, #tpu.memory_space<vmem>>, vector<16x128xf32>,
    %c0_14 = arith.constant 0 : index
    %c0_15 = arith.constant 0 : index
    %34 = vector.load %arg5[%c0_14, %c0_15] : memref<32x32xbf16, #tpu.memory_space<vmem>>, vector<32x32xbf16>
    %cst_16 = arith.constant dense<0.000000e+00> : vector<16x32xf32>
    %35 = tpu.matmul %27, %34, %cst_16 {dimension_numbers = #tpu.dot_dimension_numbers<[1], [0], [0], [1], [0, 0, 1, 1], [], []>} : vector<16x32xbf16>, vector<32x32xbf16>, vector<16x32xf32> -> vector<16x32xf32>
    %c0_17 = arith.constant 0 : index
    %c0_18 = arith.constant 0 : index
    %36 = vector.load %arg6[%c0_17, %c0_18] : memref<1x32xf32, #tpu.memory_space<vmem>>, vector<1x32xf32>
    %37 = vector.broadcast %36 : vector<1x32xf32> to vector<16x32xf32>
    %38 = arith.addf %35, %37 : vector<16x32xf32>
    %cst_19 = arith.constant 0.000000e+00 : f32
    %39 = vector.broadcast %cst_19 : f32 to vector<16x32xf32>
    %40 = arith.maximumf %38, %39 : vector<16x32xf32>
    %41 = arith.truncf %40 : vector<16x32xf32> to vector<16x32xbf16>
    %c0_20 = arith.constant 0 : index
    %c0_21 = arith.constant 0 : index
    %42 = vector.load %arg7[%c0_20, %c0_21] : memref<32x32xbf16, #tpu.memory_space<vmem>>, vector<32x32xbf16>
    %cst_22 = arith.constant dense<0.000000e+00> : vector<16x32xf32>
    %43 = tpu.matmul %41, %42, %cst_22 {dimension_numbers = #tpu.dot_dimension_numbers<[1], [0], [0], [1], [0, 0, 1, 1], [], []>} : vector<16x32xbf16>, vector<32x32xbf16>, vector<16x32xf32> -> vector<16x32xf32>
    %c0_23 = arith.constant 0 : index
    %c0_24 = arith.constant 0 : index
    %44 = vector.load %arg8[%c0_23, %c0_24] : memref<1x32xf32, #tpu.memory_space<vmem>>, vector<1x32xf32>
    %45 = vector.broadcast %44 : vector<1x32xf32> to vector<16x32xf32>
    %46 = arith.addf %43, %45 : vector<16x32xf32>
    %cst_25 = arith.constant 0.000000e+00 : f32
    %47 = vector.broadcast %cst_25 : f32 to vector<16x32xf32>
    %48 = arith.maximumf %46, %47 : vector<16x32xf32>
    %49 = arith.truncf %48 : vector<16x32xf32> to vector<16x32xbf16>
    %c0_26 = arith.constant 0 : index
    %c0_27 = arith.constant 0 : index
    %50 = vector.load %arg9[%c0_26, %c0_27] : memref<32x128xbf16, #tpu.memory_space<vmem>>, vector<32x128xbf16>
    %cst_28 = arith.constant dense<0.000000e+00> : vector<16x128xf32>
    %51 = tpu.matmul %49, %50, %cst_28 {dimension_numbers = #tpu.dot_dimension_numbers<[1], [0], [0], [1], [0, 0, 1, 1], [], []>} : vector<16x32xbf16>, vector<32x128xbf16>, vector<16x128xf32> -> vector<16x128xf32>
    %c0_29 = arith.constant 0 : index
    %c0_30 = arith.constant 0 : index
    %52 = vector.load %arg10[%c0_29, %c0_30] : memref<1x128xf32, #tpu.memory_space<vmem>>, vector<1x128xf32>
    %53 = vector.broadcast %52 : vector<1x128xf32> to vector<16x128xf32>
    %54 = arith.addf %51, %53 : vector<16x128xf32>
    %55 = arith.negf %54 : vector<16x128xf32>
    %56 = math.exp %55 : vector<16x128xf32>
    %cst_31 = arith.constant 1.000000e+00 : f32
    %57 = vector.broadcast %cst_31 : f32 to vector<16x128xf32>
    %58 = arith.addf %57, %56 : vector<16x128xf32>
    %59 = arith.divf %57, %58 : vector<16x128xf32>
    %c0_32 = arith.constant 0 : index
    %c0_33 = arith.constant 0 : index
    %60 = vector.load %arg12[%c0_32, %c0_33] : memref<16x128xf32, #tpu.memory_space<vmem>>, vector<16x128xf32>
    tpu.vector_store %arg12[%c0_32, %c0_33], %59 {strides = array<i32>} : memref<16x128xf32, #tpu.memory_space<vmem>>, vector<16x128xf32>,
    return
  }
  func.func @transform_0(%arg0: i32) -> (i32, i32) {
    %c0_i32 = arith.constant 0 : i32
    %c0_i32_0 = arith.constant 0 : i32
    %c0_i32_1 = arith.constant 0 : i32
    return %c0_i32, %c0_i32_0 : i32, i32
  }
  func.func @transform_1(%arg0: i32) -> (i32, i32) {
    %c0_i32 = arith.constant 0 : i32
    %c0_i32_0 = arith.constant 0 : i32
    %c0_i32_1 = arith.constant 0 : i32
    return %c0_i32, %c0_i32_0 : i32, i32
  }
  func.func @transform_2(%arg0: i32) -> (i32, i32) {
    %c0_i32 = arith.constant 0 : i32
    %c0_i32_0 = arith.constant 0 : i32
    %c0_i32_1 = arith.constant 0 : i32
    return %c0_i32, %c0_i32_0 : i32, i32
  }
  func.func @transform_3(%arg0: i32) -> (i32, i32) {
    %c0_i32 = arith.constant 0 : i32
    %c0_i32_0 = arith.constant 0 : i32
    %c0_i32_1 = arith.constant 0 : i32
    return %c0_i32, %c0_i32_0 : i32, i32
  }
  func.func @transform_4(%arg0: i32) -> (i32, i32) {
    %c0_i32 = arith.constant 0 : i32
    %c0_i32_0 = arith.constant 0 : i32
    %c0_i32_1 = arith.constant 0 : i32
    return %c0_i32, %c0_i32_0 : i32, i32
  }
  func.func @transform_5(%arg0: i32) -> (i32, i32) {
    %c0_i32 = arith.constant 0 : i32
    %c0_i32_0 = arith.constant 0 : i32
    %c0_i32_1 = arith.constant 0 : i32
    return %c0_i32, %c0_i32_0 : i32, i32
  }
  func.func @transform_6(%arg0: i32) -> (i32, i32) {
    %c0_i32 = arith.constant 0 : i32
    %c0_i32_0 = arith.constant 0 : i32
    %c0_i32_1 = arith.constant 0 : i32
    return %c0_i32, %c0_i32_0 : i32, i32
  }
  func.func @transform_7(%arg0: i32) -> (i32, i32) {
    %c0_i32 = arith.constant 0 : i32
    %c0_i32_0 = arith.constant 0 : i32
    %c0_i32_1 = arith.constant 0 : i32
    return %c0_i32, %c0_i32_0 : i32, i32
  }
  func.func @transform_8(%arg0: i32) -> (i32, i32) {
    %c0_i32 = arith.constant 0 : i32
    %c0_i32_0 = arith.constant 0 : i32
    %c0_i32_1 = arith.constant 0 : i32
    return %c0_i32, %c0_i32_0 : i32, i32
  }
  func.func @transform_9(%arg0: i32) -> (i32, i32) {
    %c0_i32 = arith.constant 0 : i32
    %c0_i32_0 = arith.constant 0 : i32
    %c0_i32_1 = arith.constant 0 : i32
    return %c0_i32, %c0_i32_0 : i32, i32
  }
  func.func @transform_10(%arg0: i32) -> (i32, i32) {
    %c0_i32 = arith.constant 0 : i32
    %c0_i32_0 = arith.constant 0 : i32
    %c0_i32_1 = arith.constant 0 : i32
    return %c0_i32, %c0_i32_0 : i32, i32
  }
  func.func @transform_11(%arg0: i32) -> (i32, i32) {
    %c0_i32 = arith.constant 0 : i32
    %c0_i32_0 = arith.constant 0 : i32
    %c0_i32_1 = arith.constant 0 : i32
    return %c0_i32, %c0_i32_0 : i32, i32
  }
}

module attributes {stable_mosaic.version = 11 : i64} {
  func.func @_dec_layer_kernel(%arg0: i32, %arg1: memref<1x8x32xbf16, #tpu.memory_space<vmem>>, %arg2: memref<8x32xbf16, #tpu.memory_space<vmem>>, %arg3: memref<1x16x32xbf16, #tpu.memory_space<vmem>>, %arg4: memref<1x16x32xbf16, #tpu.memory_space<vmem>>, %arg5: memref<32x96xbf16, #tpu.memory_space<vmem>>, %arg6: memref<1x96xf32, #tpu.memory_space<vmem>>, %arg7: memref<32x32xbf16, #tpu.memory_space<vmem>>, %arg8: memref<3x32xf32, #tpu.memory_space<vmem>>, %arg9: memref<32x96xbf16, #tpu.memory_space<vmem>>, %arg10: memref<1x96xf32, #tpu.memory_space<vmem>>, %arg11: memref<32x32xbf16, #tpu.memory_space<vmem>>, %arg12: memref<3x32xf32, #tpu.memory_space<vmem>>, %arg13: memref<32x64xbf16, #tpu.memory_space<vmem>>, %arg14: memref<1x64xf32, #tpu.memory_space<vmem>>, %arg15: memref<64x32xbf16, #tpu.memory_space<vmem>>, %arg16: memref<3x32xf32, #tpu.memory_space<vmem>>, %arg17: memref<1x8x32xbf16, #tpu.memory_space<vmem>>) attributes {dimension_semantics = [#tpu.dimension_semantics<parallel>], iteration_bounds = array<i64: 2>, scalar_prefetch = 0 : i64, scratch_operands = 0 : i64, tpu.core_type = #tpu.core_type<tc>, window_params = [{transform_indices = @transform_0, window_bounds = array<i64: 1, 8, 32>}, {pipeline_mode = #tpu.pipeline_mode<synchronous>, transform_indices = @transform_1, window_bounds = array<i64: 8, 32>}, {transform_indices = @transform_2, window_bounds = array<i64: 1, 16, 32>}, {transform_indices = @transform_3, window_bounds = array<i64: 1, 16, 32>}, {pipeline_mode = #tpu.pipeline_mode<synchronous>, transform_indices = @transform_4, window_bounds = array<i64: 32, 96>}, {pipeline_mode = #tpu.pipeline_mode<synchronous>, transform_indices = @transform_5, window_bounds = array<i64: 1, 96>}, {pipeline_mode = #tpu.pipeline_mode<synchronous>, transform_indices = @transform_6, window_bounds = array<i64: 32, 32>}, {pipeline_mode = #tpu.pipeline_mode<synchronous>, transform_indices = @transform_7, window_bounds = array<i64: 3, 32>}, {pipeline_mode = #tpu.pipeline_mode<synchronous>, transform_indices = @transform_8, window_bounds = array<i64: 32, 96>}, {pipeline_mode = #tpu.pipeline_mode<synchronous>, transform_indices = @transform_9, window_bounds = array<i64: 1, 96>}, {pipeline_mode = #tpu.pipeline_mode<synchronous>, transform_indices = @transform_10, window_bounds = array<i64: 32, 32>}, {pipeline_mode = #tpu.pipeline_mode<synchronous>, transform_indices = @transform_11, window_bounds = array<i64: 3, 32>}, {pipeline_mode = #tpu.pipeline_mode<synchronous>, transform_indices = @transform_12, window_bounds = array<i64: 32, 64>}, {pipeline_mode = #tpu.pipeline_mode<synchronous>, transform_indices = @transform_13, window_bounds = array<i64: 1, 64>}, {pipeline_mode = #tpu.pipeline_mode<synchronous>, transform_indices = @transform_14, window_bounds = array<i64: 64, 32>}, {pipeline_mode = #tpu.pipeline_mode<synchronous>, transform_indices = @transform_15, window_bounds = array<i64: 3, 32>}, {transform_indices = @transform_16, window_bounds = array<i64: 1, 8, 32>}]} {
    %c0 = arith.constant 0 : index
    %c0_0 = arith.constant 0 : index
    %c0_1 = arith.constant 0 : index
    %0 = vector.load %arg1[%c0, %c0_0, %c0_1] : memref<1x8x32xbf16, #tpu.memory_space<vmem>>, vector<1x8x32xbf16>
    %1 = vector.shape_cast %0 : vector<1x8x32xbf16> to vector<8x32xbf16>
    %c0_2 = arith.constant 0 : index
    %c0_3 = arith.constant 0 : index
    %2 = vector.load %arg2[%c0_2, %c0_3] : memref<8x32xbf16, #tpu.memory_space<vmem>>, vector<8x32xbf16>
    %c0_4 = arith.constant 0 : index
    %c0_5 = arith.constant 0 : index
    %c0_6 = arith.constant 0 : index
    %3 = vector.load %arg3[%c0_4, %c0_5, %c0_6] : memref<1x16x32xbf16, #tpu.memory_space<vmem>>, vector<1x16x32xbf16>
    %4 = vector.shape_cast %3 : vector<1x16x32xbf16> to vector<16x32xbf16>
    %c0_7 = arith.constant 0 : index
    %c0_8 = arith.constant 0 : index
    %c0_9 = arith.constant 0 : index
    %5 = vector.load %arg4[%c0_7, %c0_8, %c0_9] : memref<1x16x32xbf16, #tpu.memory_space<vmem>>, vector<1x16x32xbf16>
    %6 = vector.shape_cast %5 : vector<1x16x32xbf16> to vector<16x32xbf16>
    %c0_10 = arith.constant 0 : index
    %c0_11 = arith.constant 0 : index
    %7 = vector.load %arg8[%c0_10, %c0_11] : memref<3x32xf32, #tpu.memory_space<vmem>>, vector<3x32xf32>
    %c0_12 = arith.constant 0 : index
    %c0_13 = arith.constant 0 : index
    %8 = vector.load %arg5[%c0_12, %c0_13] : memref<32x96xbf16, #tpu.memory_space<vmem>>, vector<32x96xbf16>
    %c0_14 = arith.constant 0 : index
    %c0_15 = arith.constant 0 : index
    %9 = vector.load %arg6[%c0_14, %c0_15] : memref<1x96xf32, #tpu.memory_space<vmem>>, vector<1x96xf32>
    %c0_16 = arith.constant 0 : index
    %c0_17 = arith.constant 0 : index
    %10 = vector.load %arg7[%c0_16, %c0_17] : memref<32x32xbf16, #tpu.memory_space<vmem>>, vector<32x32xbf16>
    %11 = vector.extract_strided_slice %7 {offsets = [0, 0], sizes = [1, 32], strides = [1, 1]} : vector<3x32xf32> to vector<1x32xf32>
    %12 = vector.extract_strided_slice %7 {offsets = [1, 0], sizes = [1, 32], strides = [1, 1]} : vector<3x32xf32> to vector<1x32xf32>
    %13 = vector.extract_strided_slice %7 {offsets = [2, 0], sizes = [1, 32], strides = [1, 1]} : vector<3x32xf32> to vector<1x32xf32>
    %14 = arith.addf %1, %2 : vector<8x32xbf16>
    %15 = arith.addf %1, %2 : vector<8x32xbf16>
    %16 = vector.extract_strided_slice %8 {offsets = [0, 0], sizes = [32, 32], strides = [1, 1]} : vector<32x96xbf16> to vector<32x32xbf16>
    %cst = arith.constant dense<0.000000e+00> : vector<8x32xf32>
    %17 = tpu.matmul %14, %16, %cst {dimension_numbers = #tpu.dot_dimension_numbers<[1], [0], [0], [1], [0, 0, 1, 1], [], []>} : vector<8x32xbf16>, vector<32x32xbf16>, vector<8x32xf32> -> vector<8x32xf32>
    %18 = vector.extract_strided_slice %9 {offsets = [0, 0], sizes = [1, 32], strides = [1, 1]} : vector<1x96xf32> to vector<1x32xf32>
    %19 = vector.broadcast %18 : vector<1x32xf32> to vector<8x32xf32>
    %20 = arith.addf %17, %19 : vector<8x32xf32>
    %cst_18 = arith.constant 0.353553385 : f32
    %21 = vector.broadcast %cst_18 : f32 to vector<8x32xf32>
    %22 = arith.mulf %20, %21 : vector<8x32xf32>
    %23 = vector.extract_strided_slice %8 {offsets = [0, 32], sizes = [32, 32], strides = [1, 1]} : vector<32x96xbf16> to vector<32x32xbf16>
    %cst_19 = arith.constant dense<0.000000e+00> : vector<8x32xf32>
    %24 = tpu.matmul %15, %23, %cst_19 {dimension_numbers = #tpu.dot_dimension_numbers<[1], [0], [0], [1], [0, 0, 1, 1], [], []>} : vector<8x32xbf16>, vector<32x32xbf16>, vector<8x32xf32> -> vector<8x32xf32>
    %25 = vector.extract_strided_slice %9 {offsets = [0, 32], sizes = [1, 32], strides = [1, 1]} : vector<1x96xf32> to vector<1x32xf32>
    %26 = vector.broadcast %25 : vector<1x32xf32> to vector<8x32xf32>
    %27 = arith.addf %24, %26 : vector<8x32xf32>
    %28 = vector.extract_strided_slice %8 {offsets = [0, 64], sizes = [32, 32], strides = [1, 1]} : vector<32x96xbf16> to vector<32x32xbf16>
    %cst_20 = arith.constant dense<0.000000e+00> : vector<8x32xf32>
    %29 = tpu.matmul %1, %28, %cst_20 {dimension_numbers = #tpu.dot_dimension_numbers<[1], [0], [0], [1], [0, 0, 1, 1], [], []>} : vector<8x32xbf16>, vector<32x32xbf16>, vector<8x32xf32> -> vector<8x32xf32>
    %30 = vector.extract_strided_slice %9 {offsets = [0, 64], sizes = [1, 32], strides = [1, 1]} : vector<1x96xf32> to vector<1x32xf32>
    %31 = vector.broadcast %30 : vector<1x32xf32> to vector<8x32xf32>
    %32 = arith.addf %29, %31 : vector<8x32xf32>
    %33 = arith.truncf %22 : vector<8x32xf32> to vector<8x32xbf16>
    %34 = arith.truncf %27 : vector<8x32xf32> to vector<8x32xbf16>
    %35 = arith.truncf %32 : vector<8x32xf32> to vector<8x32xbf16>
    %cst_21 = arith.constant 0.000000e+00 : f32
    %36 = vector.broadcast %cst_21 : f32 to vector<8x32xf32>
    %37 = vector.extract_strided_slice %33 {offsets = [0, 0], sizes = [8, 8], strides = [1, 1]} : vector<8x32xbf16> to vector<8x8xbf16>
    %38 = vector.extract_strided_slice %34 {offsets = [0, 0], sizes = [8, 8], strides = [1, 1]} : vector<8x32xbf16> to vector<8x8xbf16>
    %cst_22 = arith.constant dense<0.000000e+00> : vector<8x8xf32>
    %39 = tpu.matmul %37, %38, %cst_22 {dimension_numbers = #tpu.dot_dimension_numbers<[1], [1], [0], [0], [0, 0, 1, 0], [], []>} : vector<8x8xbf16>, vector<8x8xbf16>, vector<8x8xf32> -> vector<8x8xf32>
    %cst_23 = arith.constant dense<0xFF800000> : vector<8xf32>
    %40 = vector.multi_reduction <maximumf>, %39, %cst_23 [1] : vector<8x8xf32> to vector<8xf32>
    %41 = vector.shape_cast %40 : vector<8xf32> to vector<8x1xf32>
    %42 = vector.broadcast %41 : vector<8x1xf32> to vector<8x8xf32>
    %43 = arith.subf %39, %42 : vector<8x8xf32>
    %44 = math.exp %43 : vector<8x8xf32>
    %cst_24 = arith.constant dense<0.000000e+00> : vector<8xf32>
    %45 = vector.multi_reduction <add>, %44, %cst_24 [1] : vector<8x8xf32> to vector<8xf32>
    %46 = vector.shape_cast %45 : vector<8xf32> to vector<8x1xf32>
    %47 = tpu.reciprocal %46 {approx = true} : vector<8x1xf32> -> vector<8x1xf32>
    %48 = vector.broadcast %47 : vector<8x1xf32> to vector<8x8xf32>
    %49 = arith.mulf %44, %48 : vector<8x8xf32>
    %50 = arith.truncf %49 : vector<8x8xf32> to vector<8x8xbf16>
    %51 = vector.extract_strided_slice %35 {offsets = [0, 0], sizes = [8, 8], strides = [1, 1]} : vector<8x32xbf16> to vector<8x8xbf16>
    %cst_25 = arith.constant dense<0.000000e+00> : vector<8x8xf32>
    %52 = tpu.matmul %50, %51, %cst_25 {dimension_numbers = #tpu.dot_dimension_numbers<[1], [0], [0], [1], [0, 0, 1, 1], [], []>} : vector<8x8xbf16>, vector<8x8xbf16>, vector<8x8xf32> -> vector<8x8xf32>
    %53 = arith.truncf %52 : vector<8x8xf32> to vector<8x8xbf16>
    %54 = vector.extract_strided_slice %10 {offsets = [0, 0], sizes = [8, 32], strides = [1, 1]} : vector<32x32xbf16> to vector<8x32xbf16>
    %cst_26 = arith.constant dense<0.000000e+00> : vector<8x32xf32>
    %55 = tpu.matmul %53, %54, %cst_26 {dimension_numbers = #tpu.dot_dimension_numbers<[1], [0], [0], [1], [0, 0, 1, 1], [], []>} : vector<8x8xbf16>, vector<8x32xbf16>, vector<8x32xf32> -> vector<8x32xf32>
    %56 = arith.addf %36, %55 : vector<8x32xf32>
    %57 = vector.extract_strided_slice %33 {offsets = [0, 8], sizes = [8, 8], strides = [1, 1]} : vector<8x32xbf16> to vector<8x8xbf16>
    %58 = vector.extract_strided_slice %34 {offsets = [0, 8], sizes = [8, 8], strides = [1, 1]} : vector<8x32xbf16> to vector<8x8xbf16>
    %cst_27 = arith.constant dense<0.000000e+00> : vector<8x8xf32>
    %59 = tpu.matmul %57, %58, %cst_27 {dimension_numbers = #tpu.dot_dimension_numbers<[1], [1], [0], [0], [0, 0, 1, 0], [], []>} : vector<8x8xbf16>, vector<8x8xbf16>, vector<8x8xf32> -> vector<8x8xf32>
    %cst_28 = arith.constant dense<0xFF800000> : vector<8xf32>
    %60 = vector.multi_reduction <maximumf>, %59, %cst_28 [1] : vector<8x8xf32> to vector<8xf32>
    %61 = vector.shape_cast %60 : vector<8xf32> to vector<8x1xf32>
    %62 = vector.broadcast %61 : vector<8x1xf32> to vector<8x8xf32>
    %63 = arith.subf %59, %62 : vector<8x8xf32>
    %64 = math.exp %63 : vector<8x8xf32>
    %cst_29 = arith.constant dense<0.000000e+00> : vector<8xf32>
    %65 = vector.multi_reduction <add>, %64, %cst_29 [1] : vector<8x8xf32> to vector<8xf32>
    %66 = vector.shape_cast %65 : vector<8xf32> to vector<8x1xf32>
    %67 = tpu.reciprocal %66 {approx = true} : vector<8x1xf32> -> vector<8x1xf32>
    %68 = vector.broadcast %67 : vector<8x1xf32> to vector<8x8xf32>
    %69 = arith.mulf %64, %68 : vector<8x8xf32>
    %70 = arith.truncf %69 : vector<8x8xf32> to vector<8x8xbf16>
    %71 = vector.extract_strided_slice %35 {offsets = [0, 8], sizes = [8, 8], strides = [1, 1]} : vector<8x32xbf16> to vector<8x8xbf16>
    %cst_30 = arith.constant dense<0.000000e+00> : vector<8x8xf32>
    %72 = tpu.matmul %70, %71, %cst_30 {dimension_numbers = #tpu.dot_dimension_numbers<[1], [0], [0], [1], [0, 0, 1, 1], [], []>} : vector<8x8xbf16>, vector<8x8xbf16>, vector<8x8xf32> -> vector<8x8xf32>
    %73 = arith.truncf %72 : vector<8x8xf32> to vector<8x8xbf16>
    %74 = vector.extract_strided_slice %10 {offsets = [8, 0], sizes = [8, 32], strides = [1, 1]} : vector<32x32xbf16> to vector<8x32xbf16>
    %cst_31 = arith.constant dense<0.000000e+00> : vector<8x32xf32>
    %75 = tpu.matmul %73, %74, %cst_31 {dimension_numbers = #tpu.dot_dimension_numbers<[1], [0], [0], [1], [0, 0, 1, 1], [], []>} : vector<8x8xbf16>, vector<8x32xbf16>, vector<8x32xf32> -> vector<8x32xf32>
    %76 = arith.addf %56, %75 : vector<8x32xf32>
    %77 = vector.extract_strided_slice %33 {offsets = [0, 16], sizes = [8, 8], strides = [1, 1]} : vector<8x32xbf16> to vector<8x8xbf16>
    %78 = vector.extract_strided_slice %34 {offsets = [0, 16], sizes = [8, 8], strides = [1, 1]} : vector<8x32xbf16> to vector<8x8xbf16>
    %cst_32 = arith.constant dense<0.000000e+00> : vector<8x8xf32>
    %79 = tpu.matmul %77, %78, %cst_32 {dimension_numbers = #tpu.dot_dimension_numbers<[1], [1], [0], [0], [0, 0, 1, 0], [], []>} : vector<8x8xbf16>, vector<8x8xbf16>, vector<8x8xf32> -> vector<8x8xf32>
    %cst_33 = arith.constant dense<0xFF800000> : vector<8xf32>
    %80 = vector.multi_reduction <maximumf>, %79, %cst_33 [1] : vector<8x8xf32> to vector<8xf32>
    %81 = vector.shape_cast %80 : vector<8xf32> to vector<8x1xf32>
    %82 = vector.broadcast %81 : vector<8x1xf32> to vector<8x8xf32>
    %83 = arith.subf %79, %82 : vector<8x8xf32>
    %84 = math.exp %83 : vector<8x8xf32>
    %cst_34 = arith.constant dense<0.000000e+00> : vector<8xf32>
    %85 = vector.multi_reduction <add>, %84, %cst_34 [1] : vector<8x8xf32> to vector<8xf32>
    %86 = vector.shape_cast %85 : vector<8xf32> to vector<8x1xf32>
    %87 = tpu.reciprocal %86 {approx = true} : vector<8x1xf32> -> vector<8x1xf32>
    %88 = vector.broadcast %87 : vector<8x1xf32> to vector<8x8xf32>
    %89 = arith.mulf %84, %88 : vector<8x8xf32>
    %90 = arith.truncf %89 : vector<8x8xf32> to vector<8x8xbf16>
    %91 = vector.extract_strided_slice %35 {offsets = [0, 16], sizes = [8, 8], strides = [1, 1]} : vector<8x32xbf16> to vector<8x8xbf16>
    %cst_35 = arith.constant dense<0.000000e+00> : vector<8x8xf32>
    %92 = tpu.matmul %90, %91, %cst_35 {dimension_numbers = #tpu.dot_dimension_numbers<[1], [0], [0], [1], [0, 0, 1, 1], [], []>} : vector<8x8xbf16>, vector<8x8xbf16>, vector<8x8xf32> -> vector<8x8xf32>
    %93 = arith.truncf %92 : vector<8x8xf32> to vector<8x8xbf16>
    %94 = vector.extract_strided_slice %10 {offsets = [16, 0], sizes = [8, 32], strides = [1, 1]} : vector<32x32xbf16> to vector<8x32xbf16>
    %cst_36 = arith.constant dense<0.000000e+00> : vector<8x32xf32>
    %95 = tpu.matmul %93, %94, %cst_36 {dimension_numbers = #tpu.dot_dimension_numbers<[1], [0], [0], [1], [0, 0, 1, 1], [], []>} : vector<8x8xbf16>, vector<8x32xbf16>, vector<8x32xf32> -> vector<8x32xf32>
    %96 = arith.addf %76, %95 : vector<8x32xf32>
    %97 = vector.extract_strided_slice %33 {offsets = [0, 24], sizes = [8, 8], strides = [1, 1]} : vector<8x32xbf16> to vector<8x8xbf16>
    %98 = vector.extract_strided_slice %34 {offsets = [0, 24], sizes = [8, 8], strides = [1, 1]} : vector<8x32xbf16> to vector<8x8xbf16>
    %cst_37 = arith.constant dense<0.000000e+00> : vector<8x8xf32>
    %99 = tpu.matmul %97, %98, %cst_37 {dimension_numbers = #tpu.dot_dimension_numbers<[1], [1], [0], [0], [0, 0, 1, 0], [], []>} : vector<8x8xbf16>, vector<8x8xbf16>, vector<8x8xf32> -> vector<8x8xf32>
    %cst_38 = arith.constant dense<0xFF800000> : vector<8xf32>
    %100 = vector.multi_reduction <maximumf>, %99, %cst_38 [1] : vector<8x8xf32> to vector<8xf32>
    %101 = vector.shape_cast %100 : vector<8xf32> to vector<8x1xf32>
    %102 = vector.broadcast %101 : vector<8x1xf32> to vector<8x8xf32>
    %103 = arith.subf %99, %102 : vector<8x8xf32>
    %104 = math.exp %103 : vector<8x8xf32>
    %cst_39 = arith.constant dense<0.000000e+00> : vector<8xf32>
    %105 = vector.multi_reduction <add>, %104, %cst_39 [1] : vector<8x8xf32> to vector<8xf32>
    %106 = vector.shape_cast %105 : vector<8xf32> to vector<8x1xf32>
    %107 = tpu.reciprocal %106 {approx = true} : vector<8x1xf32> -> vector<8x1xf32>
    %108 = vector.broadcast %107 : vector<8x1xf32> to vector<8x8xf32>
    %109 = arith.mulf %104, %108 : vector<8x8xf32>
    %110 = arith.truncf %109 : vector<8x8xf32> to vector<8x8xbf16>
    %111 = vector.extract_strided_slice %35 {offsets = [0, 24], sizes = [8, 8], strides = [1, 1]} : vector<8x32xbf16> to vector<8x8xbf16>
    %cst_40 = arith.constant dense<0.000000e+00> : vector<8x8xf32>
    %112 = tpu.matmul %110, %111, %cst_40 {dimension_numbers = #tpu.dot_dimension_numbers<[1], [0], [0], [1], [0, 0, 1, 1], [], []>} : vector<8x8xbf16>, vector<8x8xbf16>, vector<8x8xf32> -> vector<8x8xf32>
    %113 = arith.truncf %112 : vector<8x8xf32> to vector<8x8xbf16>
    %114 = vector.extract_strided_slice %10 {offsets = [24, 0], sizes = [8, 32], strides = [1, 1]} : vector<32x32xbf16> to vector<8x32xbf16>
    %cst_41 = arith.constant dense<0.000000e+00> : vector<8x32xf32>
    %115 = tpu.matmul %113, %114, %cst_41 {dimension_numbers = #tpu.dot_dimension_numbers<[1], [0], [0], [1], [0, 0, 1, 1], [], []>} : vector<8x8xbf16>, vector<8x32xbf16>, vector<8x32xf32> -> vector<8x32xf32>
    %116 = arith.addf %96, %115 : vector<8x32xf32>
    %117 = vector.broadcast %11 : vector<1x32xf32> to vector<8x32xf32>
    %118 = arith.addf %116, %117 : vector<8x32xf32>
    %119 = arith.extf %1 : vector<8x32xbf16> to vector<8x32xf32>
    %120 = arith.addf %118, %119 : vector<8x32xf32>
    %cst_42 = arith.constant dense<0.000000e+00> : vector<8xf32>
    %121 = vector.multi_reduction <add>, %120, %cst_42 [1] : vector<8x32xf32> to vector<8xf32>
    %122 = vector.shape_cast %121 : vector<8xf32> to vector<8x1xf32>
    %cst_43 = arith.constant 3.200000e+01 : f32
    %123 = vector.broadcast %cst_43 : f32 to vector<8x1xf32>
    %124 = arith.divf %122, %123 : vector<8x1xf32>
    %125 = vector.broadcast %124 : vector<8x1xf32> to vector<8x32xf32>
    %126 = arith.subf %120, %125 : vector<8x32xf32>
    %127 = arith.mulf %126, %126 : vector<8x32xf32>
    %cst_44 = arith.constant dense<0.000000e+00> : vector<8xf32>
    %128 = vector.multi_reduction <add>, %127, %cst_44 [1] : vector<8x32xf32> to vector<8xf32>
    %129 = vector.shape_cast %128 : vector<8xf32> to vector<8x1xf32>
    %cst_45 = arith.constant 3.200000e+01 : f32
    %130 = vector.broadcast %cst_45 : f32 to vector<8x1xf32>
    %131 = arith.divf %129, %130 : vector<8x1xf32>
    %132 = vector.broadcast %124 : vector<8x1xf32> to vector<8x32xf32>
    %133 = arith.subf %120, %132 : vector<8x32xf32>
    %cst_46 = arith.constant 9.99999974E-6 : f32
    %134 = vector.broadcast %cst_46 : f32 to vector<8x1xf32>
    %135 = arith.addf %131, %134 : vector<8x1xf32>
    %136 = math.rsqrt %135 : vector<8x1xf32>
    %137 = vector.broadcast %136 : vector<8x1xf32> to vector<8x32xf32>
    %138 = arith.mulf %133, %137 : vector<8x32xf32>
    %139 = vector.broadcast %12 : vector<1x32xf32> to vector<8x32xf32>
    %140 = arith.mulf %138, %139 : vector<8x32xf32>
    %141 = vector.broadcast %13 : vector<1x32xf32> to vector<8x32xf32>
    %142 = arith.addf %140, %141 : vector<8x32xf32>
    %c0_47 = arith.constant 0 : index
    %c0_48 = arith.constant 0 : index
    %143 = vector.load %arg12[%c0_47, %c0_48] : memref<3x32xf32, #tpu.memory_space<vmem>>, vector<3x32xf32>
    %c0_49 = arith.constant 0 : index
    %c0_50 = arith.constant 0 : index
    %144 = vector.load %arg9[%c0_49, %c0_50] : memref<32x96xbf16, #tpu.memory_space<vmem>>, vector<32x96xbf16>
    %c0_51 = arith.constant 0 : index
    %c0_52 = arith.constant 0 : index
    %145 = vector.load %arg10[%c0_51, %c0_52] : memref<1x96xf32, #tpu.memory_space<vmem>>, vector<1x96xf32>
    %c0_53 = arith.constant 0 : index
    %c0_54 = arith.constant 0 : index
    %146 = vector.load %arg11[%c0_53, %c0_54] : memref<32x32xbf16, #tpu.memory_space<vmem>>, vector<32x32xbf16>
    %147 = vector.extract_strided_slice %143 {offsets = [0, 0], sizes = [1, 32], strides = [1, 1]} : vector<3x32xf32> to vector<1x32xf32>
    %148 = vector.extract_strided_slice %143 {offsets = [1, 0], sizes = [1, 32], strides = [1, 1]} : vector<3x32xf32> to vector<1x32xf32>
    %149 = vector.extract_strided_slice %143 {offsets = [2, 0], sizes = [1, 32], strides = [1, 1]} : vector<3x32xf32> to vector<1x32xf32>
    %150 = arith.truncf %142 : vector<8x32xf32> to vector<8x32xbf16>
    %151 = arith.addf %150, %2 : vector<8x32xbf16>
    %152 = arith.addf %4, %6 : vector<16x32xbf16>
    %153 = vector.extract_strided_slice %144 {offsets = [0, 0], sizes = [32, 32], strides = [1, 1]} : vector<32x96xbf16> to vector<32x32xbf16>
    %cst_55 = arith.constant dense<0.000000e+00> : vector<8x32xf32>
    %154 = tpu.matmul %151, %153, %cst_55 {dimension_numbers = #tpu.dot_dimension_numbers<[1], [0], [0], [1], [0, 0, 1, 1], [], []>} : vector<8x32xbf16>, vector<32x32xbf16>, vector<8x32xf32> -> vector<8x32xf32>
    %155 = vector.extract_strided_slice %145 {offsets = [0, 0], sizes = [1, 32], strides = [1, 1]} : vector<1x96xf32> to vector<1x32xf32>
    %156 = vector.broadcast %155 : vector<1x32xf32> to vector<8x32xf32>
    %157 = arith.addf %154, %156 : vector<8x32xf32>
    %cst_56 = arith.constant 0.353553385 : f32
    %158 = vector.broadcast %cst_56 : f32 to vector<8x32xf32>
    %159 = arith.mulf %157, %158 : vector<8x32xf32>
    %160 = vector.extract_strided_slice %144 {offsets = [0, 32], sizes = [32, 32], strides = [1, 1]} : vector<32x96xbf16> to vector<32x32xbf16>
    %cst_57 = arith.constant dense<0.000000e+00> : vector<16x32xf32>
    %161 = tpu.matmul %152, %160, %cst_57 {dimension_numbers = #tpu.dot_dimension_numbers<[1], [0], [0], [1], [0, 0, 1, 1], [], []>} : vector<16x32xbf16>, vector<32x32xbf16>, vector<16x32xf32> -> vector<16x32xf32>
    %162 = vector.extract_strided_slice %145 {offsets = [0, 32], sizes = [1, 32], strides = [1, 1]} : vector<1x96xf32> to vector<1x32xf32>
    %163 = vector.broadcast %162 : vector<1x32xf32> to vector<16x32xf32>
    %164 = arith.addf %161, %163 : vector<16x32xf32>
    %165 = vector.extract_strided_slice %144 {offsets = [0, 64], sizes = [32, 32], strides = [1, 1]} : vector<32x96xbf16> to vector<32x32xbf16>
    %cst_58 = arith.constant dense<0.000000e+00> : vector<16x32xf32>
    %166 = tpu.matmul %4, %165, %cst_58 {dimension_numbers = #tpu.dot_dimension_numbers<[1], [0], [0], [1], [0, 0, 1, 1], [], []>} : vector<16x32xbf16>, vector<32x32xbf16>, vector<16x32xf32> -> vector<16x32xf32>
    %167 = vector.extract_strided_slice %145 {offsets = [0, 64], sizes = [1, 32], strides = [1, 1]} : vector<1x96xf32> to vector<1x32xf32>
    %168 = vector.broadcast %167 : vector<1x32xf32> to vector<16x32xf32>
    %169 = arith.addf %166, %168 : vector<16x32xf32>
    %170 = arith.truncf %159 : vector<8x32xf32> to vector<8x32xbf16>
    %171 = arith.truncf %164 : vector<16x32xf32> to vector<16x32xbf16>
    %172 = arith.truncf %169 : vector<16x32xf32> to vector<16x32xbf16>
    %cst_59 = arith.constant 0.000000e+00 : f32
    %173 = vector.broadcast %cst_59 : f32 to vector<8x32xf32>
    %174 = vector.extract_strided_slice %170 {offsets = [0, 0], sizes = [8, 8], strides = [1, 1]} : vector<8x32xbf16> to vector<8x8xbf16>
    %175 = vector.extract_strided_slice %171 {offsets = [0, 0], sizes = [16, 8], strides = [1, 1]} : vector<16x32xbf16> to vector<16x8xbf16>
    %cst_60 = arith.constant dense<0.000000e+00> : vector<8x16xf32>
    %176 = tpu.matmul %174, %175, %cst_60 {dimension_numbers = #tpu.dot_dimension_numbers<[1], [1], [0], [0], [0, 0, 1, 0], [], []>} : vector<8x8xbf16>, vector<16x8xbf16>, vector<8x16xf32> -> vector<8x16xf32>
    %cst_61 = arith.constant dense<0xFF800000> : vector<8xf32>
    %177 = vector.multi_reduction <maximumf>, %176, %cst_61 [1] : vector<8x16xf32> to vector<8xf32>
    %178 = vector.shape_cast %177 : vector<8xf32> to vector<8x1xf32>
    %179 = vector.broadcast %178 : vector<8x1xf32> to vector<8x16xf32>
    %180 = arith.subf %176, %179 : vector<8x16xf32>
    %181 = math.exp %180 : vector<8x16xf32>
    %cst_62 = arith.constant dense<0.000000e+00> : vector<8xf32>
    %182 = vector.multi_reduction <add>, %181, %cst_62 [1] : vector<8x16xf32> to vector<8xf32>
    %183 = vector.shape_cast %182 : vector<8xf32> to vector<8x1xf32>
    %184 = tpu.reciprocal %183 {approx = true} : vector<8x1xf32> -> vector<8x1xf32>
    %185 = vector.broadcast %184 : vector<8x1xf32> to vector<8x16xf32>
    %186 = arith.mulf %181, %185 : vector<8x16xf32>
    %187 = arith.truncf %186 : vector<8x16xf32> to vector<8x16xbf16>
    %188 = vector.extract_strided_slice %172 {offsets = [0, 0], sizes = [16, 8], strides = [1, 1]} : vector<16x32xbf16> to vector<16x8xbf16>
    %cst_63 = arith.constant dense<0.000000e+00> : vector<8x8xf32>
    %189 = tpu.matmul %187, %188, %cst_63 {dimension_numbers = #tpu.dot_dimension_numbers<[1], [0], [0], [1], [0, 0, 1, 1], [], []>} : vector<8x16xbf16>, vector<16x8xbf16>, vector<8x8xf32> -> vector<8x8xf32>
    %190 = arith.truncf %189 : vector<8x8xf32> to vector<8x8xbf16>
    %191 = vector.extract_strided_slice %146 {offsets = [0, 0], sizes = [8, 32], strides = [1, 1]} : vector<32x32xbf16> to vector<8x32xbf16>
    %cst_64 = arith.constant dense<0.000000e+00> : vector<8x32xf32>
    %192 = tpu.matmul %190, %191, %cst_64 {dimension_numbers = #tpu.dot_dimension_numbers<[1], [0], [0], [1], [0, 0, 1, 1], [], []>} : vector<8x8xbf16>, vector<8x32xbf16>, vector<8x32xf32> -> vector<8x32xf32>
    %193 = arith.addf %173, %192 : vector<8x32xf32>
    %194 = vector.extract_strided_slice %170 {offsets = [0, 8], sizes = [8, 8], strides = [1, 1]} : vector<8x32xbf16> to vector<8x8xbf16>
    %195 = vector.extract_strided_slice %171 {offsets = [0, 8], sizes = [16, 8], strides = [1, 1]} : vector<16x32xbf16> to vector<16x8xbf16>
    %cst_65 = arith.constant dense<0.000000e+00> : vector<8x16xf32>
    %196 = tpu.matmul %194, %195, %cst_65 {dimension_numbers = #tpu.dot_dimension_numbers<[1], [1], [0], [0], [0, 0, 1, 0], [], []>} : vector<8x8xbf16>, vector<16x8xbf16>, vector<8x16xf32> -> vector<8x16xf32>
    %cst_66 = arith.constant dense<0xFF800000> : vector<8xf32>
    %197 = vector.multi_reduction <maximumf>, %196, %cst_66 [1] : vector<8x16xf32> to vector<8xf32>
    %198 = vector.shape_cast %197 : vector<8xf32> to vector<8x1xf32>
    %199 = vector.broadcast %198 : vector<8x1xf32> to vector<8x16xf32>
    %200 = arith.subf %196, %199 : vector<8x16xf32>
    %201 = math.exp %200 : vector<8x16xf32>
    %cst_67 = arith.constant dense<0.000000e+00> : vector<8xf32>
    %202 = vector.multi_reduction <add>, %201, %cst_67 [1] : vector<8x16xf32> to vector<8xf32>
    %203 = vector.shape_cast %202 : vector<8xf32> to vector<8x1xf32>
    %204 = tpu.reciprocal %203 {approx = true} : vector<8x1xf32> -> vector<8x1xf32>
    %205 = vector.broadcast %204 : vector<8x1xf32> to vector<8x16xf32>
    %206 = arith.mulf %201, %205 : vector<8x16xf32>
    %207 = arith.truncf %206 : vector<8x16xf32> to vector<8x16xbf16>
    %208 = vector.extract_strided_slice %172 {offsets = [0, 8], sizes = [16, 8], strides = [1, 1]} : vector<16x32xbf16> to vector<16x8xbf16>
    %cst_68 = arith.constant dense<0.000000e+00> : vector<8x8xf32>
    %209 = tpu.matmul %207, %208, %cst_68 {dimension_numbers = #tpu.dot_dimension_numbers<[1], [0], [0], [1], [0, 0, 1, 1], [], []>} : vector<8x16xbf16>, vector<16x8xbf16>, vector<8x8xf32> -> vector<8x8xf32>
    %210 = arith.truncf %209 : vector<8x8xf32> to vector<8x8xbf16>
    %211 = vector.extract_strided_slice %146 {offsets = [8, 0], sizes = [8, 32], strides = [1, 1]} : vector<32x32xbf16> to vector<8x32xbf16>
    %cst_69 = arith.constant dense<0.000000e+00> : vector<8x32xf32>
    %212 = tpu.matmul %210, %211, %cst_69 {dimension_numbers = #tpu.dot_dimension_numbers<[1], [0], [0], [1], [0, 0, 1, 1], [], []>} : vector<8x8xbf16>, vector<8x32xbf16>, vector<8x32xf32> -> vector<8x32xf32>
    %213 = arith.addf %193, %212 : vector<8x32xf32>
    %214 = vector.extract_strided_slice %170 {offsets = [0, 16], sizes = [8, 8], strides = [1, 1]} : vector<8x32xbf16> to vector<8x8xbf16>
    %215 = vector.extract_strided_slice %171 {offsets = [0, 16], sizes = [16, 8], strides = [1, 1]} : vector<16x32xbf16> to vector<16x8xbf16>
    %cst_70 = arith.constant dense<0.000000e+00> : vector<8x16xf32>
    %216 = tpu.matmul %214, %215, %cst_70 {dimension_numbers = #tpu.dot_dimension_numbers<[1], [1], [0], [0], [0, 0, 1, 0], [], []>} : vector<8x8xbf16>, vector<16x8xbf16>, vector<8x16xf32> -> vector<8x16xf32>
    %cst_71 = arith.constant dense<0xFF800000> : vector<8xf32>
    %217 = vector.multi_reduction <maximumf>, %216, %cst_71 [1] : vector<8x16xf32> to vector<8xf32>
    %218 = vector.shape_cast %217 : vector<8xf32> to vector<8x1xf32>
    %219 = vector.broadcast %218 : vector<8x1xf32> to vector<8x16xf32>
    %220 = arith.subf %216, %219 : vector<8x16xf32>
    %221 = math.exp %220 : vector<8x16xf32>
    %cst_72 = arith.constant dense<0.000000e+00> : vector<8xf32>
    %222 = vector.multi_reduction <add>, %221, %cst_72 [1] : vector<8x16xf32> to vector<8xf32>
    %223 = vector.shape_cast %222 : vector<8xf32> to vector<8x1xf32>
    %224 = tpu.reciprocal %223 {approx = true} : vector<8x1xf32> -> vector<8x1xf32>
    %225 = vector.broadcast %224 : vector<8x1xf32> to vector<8x16xf32>
    %226 = arith.mulf %221, %225 : vector<8x16xf32>
    %227 = arith.truncf %226 : vector<8x16xf32> to vector<8x16xbf16>
    %228 = vector.extract_strided_slice %172 {offsets = [0, 16], sizes = [16, 8], strides = [1, 1]} : vector<16x32xbf16> to vector<16x8xbf16>
    %cst_73 = arith.constant dense<0.000000e+00> : vector<8x8xf32>
    %229 = tpu.matmul %227, %228, %cst_73 {dimension_numbers = #tpu.dot_dimension_numbers<[1], [0], [0], [1], [0, 0, 1, 1], [], []>} : vector<8x16xbf16>, vector<16x8xbf16>, vector<8x8xf32> -> vector<8x8xf32>
    %230 = arith.truncf %229 : vector<8x8xf32> to vector<8x8xbf16>
    %231 = vector.extract_strided_slice %146 {offsets = [16, 0], sizes = [8, 32], strides = [1, 1]} : vector<32x32xbf16> to vector<8x32xbf16>
    %cst_74 = arith.constant dense<0.000000e+00> : vector<8x32xf32>
    %232 = tpu.matmul %230, %231, %cst_74 {dimension_numbers = #tpu.dot_dimension_numbers<[1], [0], [0], [1], [0, 0, 1, 1], [], []>} : vector<8x8xbf16>, vector<8x32xbf16>, vector<8x32xf32> -> vector<8x32xf32>
    %233 = arith.addf %213, %232 : vector<8x32xf32>
    %234 = vector.extract_strided_slice %170 {offsets = [0, 24], sizes = [8, 8], strides = [1, 1]} : vector<8x32xbf16> to vector<8x8xbf16>
    %235 = vector.extract_strided_slice %171 {offsets = [0, 24], sizes = [16, 8], strides = [1, 1]} : vector<16x32xbf16> to vector<16x8xbf16>
    %cst_75 = arith.constant dense<0.000000e+00> : vector<8x16xf32>
    %236 = tpu.matmul %234, %235, %cst_75 {dimension_numbers = #tpu.dot_dimension_numbers<[1], [1], [0], [0], [0, 0, 1, 0], [], []>} : vector<8x8xbf16>, vector<16x8xbf16>, vector<8x16xf32> -> vector<8x16xf32>
    %cst_76 = arith.constant dense<0xFF800000> : vector<8xf32>
    %237 = vector.multi_reduction <maximumf>, %236, %cst_76 [1] : vector<8x16xf32> to vector<8xf32>
    %238 = vector.shape_cast %237 : vector<8xf32> to vector<8x1xf32>
    %239 = vector.broadcast %238 : vector<8x1xf32> to vector<8x16xf32>
    %240 = arith.subf %236, %239 : vector<8x16xf32>
    %241 = math.exp %240 : vector<8x16xf32>
    %cst_77 = arith.constant dense<0.000000e+00> : vector<8xf32>
    %242 = vector.multi_reduction <add>, %241, %cst_77 [1] : vector<8x16xf32> to vector<8xf32>
    %243 = vector.shape_cast %242 : vector<8xf32> to vector<8x1xf32>
    %244 = tpu.reciprocal %243 {approx = true} : vector<8x1xf32> -> vector<8x1xf32>
    %245 = vector.broadcast %244 : vector<8x1xf32> to vector<8x16xf32>
    %246 = arith.mulf %241, %245 : vector<8x16xf32>
    %247 = arith.truncf %246 : vector<8x16xf32> to vector<8x16xbf16>
    %248 = vector.extract_strided_slice %172 {offsets = [0, 24], sizes = [16, 8], strides = [1, 1]} : vector<16x32xbf16> to vector<16x8xbf16>
    %cst_78 = arith.constant dense<0.000000e+00> : vector<8x8xf32>
    %249 = tpu.matmul %247, %248, %cst_78 {dimension_numbers = #tpu.dot_dimension_numbers<[1], [0], [0], [1], [0, 0, 1, 1], [], []>} : vector<8x16xbf16>, vector<16x8xbf16>, vector<8x8xf32> -> vector<8x8xf32>
    %250 = arith.truncf %249 : vector<8x8xf32> to vector<8x8xbf16>
    %251 = vector.extract_strided_slice %146 {offsets = [24, 0], sizes = [8, 32], strides = [1, 1]} : vector<32x32xbf16> to vector<8x32xbf16>
    %cst_79 = arith.constant dense<0.000000e+00> : vector<8x32xf32>
    %252 = tpu.matmul %250, %251, %cst_79 {dimension_numbers = #tpu.dot_dimension_numbers<[1], [0], [0], [1], [0, 0, 1, 1], [], []>} : vector<8x8xbf16>, vector<8x32xbf16>, vector<8x32xf32> -> vector<8x32xf32>
    %253 = arith.addf %233, %252 : vector<8x32xf32>
    %254 = vector.broadcast %147 : vector<1x32xf32> to vector<8x32xf32>
    %255 = arith.addf %253, %254 : vector<8x32xf32>
    %256 = arith.addf %255, %142 : vector<8x32xf32>
    %cst_80 = arith.constant dense<0.000000e+00> : vector<8xf32>
    %257 = vector.multi_reduction <add>, %256, %cst_80 [1] : vector<8x32xf32> to vector<8xf32>
    %258 = vector.shape_cast %257 : vector<8xf32> to vector<8x1xf32>
    %cst_81 = arith.constant 3.200000e+01 : f32
    %259 = vector.broadcast %cst_81 : f32 to vector<8x1xf32>
    %260 = arith.divf %258, %259 : vector<8x1xf32>
    %261 = vector.broadcast %260 : vector<8x1xf32> to vector<8x32xf32>
    %262 = arith.subf %256, %261 : vector<8x32xf32>
    %263 = arith.mulf %262, %262 : vector<8x32xf32>
    %cst_82 = arith.constant dense<0.000000e+00> : vector<8xf32>
    %264 = vector.multi_reduction <add>, %263, %cst_82 [1] : vector<8x32xf32> to vector<8xf32>
    %265 = vector.shape_cast %264 : vector<8xf32> to vector<8x1xf32>
    %cst_83 = arith.constant 3.200000e+01 : f32
    %266 = vector.broadcast %cst_83 : f32 to vector<8x1xf32>
    %267 = arith.divf %265, %266 : vector<8x1xf32>
    %268 = vector.broadcast %260 : vector<8x1xf32> to vector<8x32xf32>
    %269 = arith.subf %256, %268 : vector<8x32xf32>
    %cst_84 = arith.constant 9.99999974E-6 : f32
    %270 = vector.broadcast %cst_84 : f32 to vector<8x1xf32>
    %271 = arith.addf %267, %270 : vector<8x1xf32>
    %272 = math.rsqrt %271 : vector<8x1xf32>
    %273 = vector.broadcast %272 : vector<8x1xf32> to vector<8x32xf32>
    %274 = arith.mulf %269, %273 : vector<8x32xf32>
    %275 = vector.broadcast %148 : vector<1x32xf32> to vector<8x32xf32>
    %276 = arith.mulf %274, %275 : vector<8x32xf32>
    %277 = vector.broadcast %149 : vector<1x32xf32> to vector<8x32xf32>
    %278 = arith.addf %276, %277 : vector<8x32xf32>
    %c0_85 = arith.constant 0 : index
    %c0_86 = arith.constant 0 : index
    %279 = vector.load %arg16[%c0_85, %c0_86] : memref<3x32xf32, #tpu.memory_space<vmem>>, vector<3x32xf32>
    %c0_87 = arith.constant 0 : index
    %c0_88 = arith.constant 0 : index
    %280 = vector.load %arg13[%c0_87, %c0_88] : memref<32x64xbf16, #tpu.memory_space<vmem>>, vector<32x64xbf16>
    %c0_89 = arith.constant 0 : index
    %c0_90 = arith.constant 0 : index
    %281 = vector.load %arg14[%c0_89, %c0_90] : memref<1x64xf32, #tpu.memory_space<vmem>>, vector<1x64xf32>
    %c0_91 = arith.constant 0 : index
    %c0_92 = arith.constant 0 : index
    %282 = vector.load %arg15[%c0_91, %c0_92] : memref<64x32xbf16, #tpu.memory_space<vmem>>, vector<64x32xbf16>
    %283 = vector.extract_strided_slice %279 {offsets = [0, 0], sizes = [1, 32], strides = [1, 1]} : vector<3x32xf32> to vector<1x32xf32>
    %284 = vector.extract_strided_slice %279 {offsets = [1, 0], sizes = [1, 32], strides = [1, 1]} : vector<3x32xf32> to vector<1x32xf32>
    %285 = vector.extract_strided_slice %279 {offsets = [2, 0], sizes = [1, 32], strides = [1, 1]} : vector<3x32xf32> to vector<1x32xf32>
    %286 = arith.truncf %278 : vector<8x32xf32> to vector<8x32xbf16>
    %cst_93 = arith.constant dense<0.000000e+00> : vector<8x64xf32>
    %287 = tpu.matmul %286, %280, %cst_93 {dimension_numbers = #tpu.dot_dimension_numbers<[1], [0], [0], [1], [0, 0, 1, 1], [], []>} : vector<8x32xbf16>, vector<32x64xbf16>, vector<8x64xf32> -> vector<8x64xf32>
    %288 = vector.broadcast %281 : vector<1x64xf32> to vector<8x64xf32>
    %289 = arith.addf %287, %288 : vector<8x64xf32>
    %cst_94 = arith.constant 0.000000e+00 : f32
    %290 = vector.broadcast %cst_94 : f32 to vector<8x64xf32>
    %291 = arith.maximumf %289, %290 : vector<8x64xf32>
    %292 = arith.truncf %291 : vector<8x64xf32> to vector<8x64xbf16>
    %cst_95 = arith.constant dense<0.000000e+00> : vector<8x32xf32>
    %293 = tpu.matmul %292, %282, %cst_95 {dimension_numbers = #tpu.dot_dimension_numbers<[1], [0], [0], [1], [0, 0, 1, 1], [], []>} : vector<8x64xbf16>, vector<64x32xbf16>, vector<8x32xf32> -> vector<8x32xf32>
    %294 = vector.broadcast %283 : vector<1x32xf32> to vector<8x32xf32>
    %295 = arith.addf %293, %294 : vector<8x32xf32>
    %296 = arith.addf %295, %278 : vector<8x32xf32>
    %cst_96 = arith.constant dense<0.000000e+00> : vector<8xf32>
    %297 = vector.multi_reduction <add>, %296, %cst_96 [1] : vector<8x32xf32> to vector<8xf32>
    %298 = vector.shape_cast %297 : vector<8xf32> to vector<8x1xf32>
    %cst_97 = arith.constant 3.200000e+01 : f32
    %299 = vector.broadcast %cst_97 : f32 to vector<8x1xf32>
    %300 = arith.divf %298, %299 : vector<8x1xf32>
    %301 = vector.broadcast %300 : vector<8x1xf32> to vector<8x32xf32>
    %302 = arith.subf %296, %301 : vector<8x32xf32>
    %303 = arith.mulf %302, %302 : vector<8x32xf32>
    %cst_98 = arith.constant dense<0.000000e+00> : vector<8xf32>
    %304 = vector.multi_reduction <add>, %303, %cst_98 [1] : vector<8x32xf32> to vector<8xf32>
    %305 = vector.shape_cast %304 : vector<8xf32> to vector<8x1xf32>
    %cst_99 = arith.constant 3.200000e+01 : f32
    %306 = vector.broadcast %cst_99 : f32 to vector<8x1xf32>
    %307 = arith.divf %305, %306 : vector<8x1xf32>
    %308 = vector.broadcast %300 : vector<8x1xf32> to vector<8x32xf32>
    %309 = arith.subf %296, %308 : vector<8x32xf32>
    %cst_100 = arith.constant 9.99999974E-6 : f32
    %310 = vector.broadcast %cst_100 : f32 to vector<8x1xf32>
    %311 = arith.addf %307, %310 : vector<8x1xf32>
    %312 = math.rsqrt %311 : vector<8x1xf32>
    %313 = vector.broadcast %312 : vector<8x1xf32> to vector<8x32xf32>
    %314 = arith.mulf %309, %313 : vector<8x32xf32>
    %315 = vector.broadcast %284 : vector<1x32xf32> to vector<8x32xf32>
    %316 = arith.mulf %314, %315 : vector<8x32xf32>
    %317 = vector.broadcast %285 : vector<1x32xf32> to vector<8x32xf32>
    %318 = arith.addf %316, %317 : vector<8x32xf32>
    %319 = arith.truncf %318 : vector<8x32xf32> to vector<8x32xbf16>
    %c0_101 = arith.constant 0 : index
    %c0_102 = arith.constant 0 : index
    %c0_103 = arith.constant 0 : index
    %320 = vector.load %arg17[%c0_101, %c0_102, %c0_103] : memref<1x8x32xbf16, #tpu.memory_space<vmem>>, vector<1x8x32xbf16>
    %321 = vector.shape_cast %320 : vector<1x8x32xbf16> to vector<8x32xbf16>
    %322 = vector.shape_cast %319 : vector<8x32xbf16> to vector<1x8x32xbf16>
    tpu.vector_store %arg17[%c0_101, %c0_102, %c0_103], %322 {strides = array<i32>} : memref<1x8x32xbf16, #tpu.memory_space<vmem>>, vector<1x8x32xbf16>,
    return
  }
  func.func @transform_0(%arg0: i32) -> (i32, i32, i32) {
    %c0_i32 = arith.constant 0 : i32
    %c0_i32_0 = arith.constant 0 : i32
    %c0_i32_1 = arith.constant 0 : i32
    return %arg0, %c0_i32, %c0_i32_0 : i32, i32, i32
  }
  func.func @transform_1(%arg0: i32) -> (i32, i32) {
    %c0_i32 = arith.constant 0 : i32
    %c0_i32_0 = arith.constant 0 : i32
    %c0_i32_1 = arith.constant 0 : i32
    return %c0_i32, %c0_i32_0 : i32, i32
  }
  func.func @transform_2(%arg0: i32) -> (i32, i32, i32) {
    %c0_i32 = arith.constant 0 : i32
    %c0_i32_0 = arith.constant 0 : i32
    %c0_i32_1 = arith.constant 0 : i32
    return %arg0, %c0_i32, %c0_i32_0 : i32, i32, i32
  }
  func.func @transform_3(%arg0: i32) -> (i32, i32, i32) {
    %c0_i32 = arith.constant 0 : i32
    %c0_i32_0 = arith.constant 0 : i32
    %c0_i32_1 = arith.constant 0 : i32
    return %arg0, %c0_i32, %c0_i32_0 : i32, i32, i32
  }
  func.func @transform_4(%arg0: i32) -> (i32, i32) {
    %c0_i32 = arith.constant 0 : i32
    %c0_i32_0 = arith.constant 0 : i32
    %c0_i32_1 = arith.constant 0 : i32
    return %c0_i32, %c0_i32_0 : i32, i32
  }
  func.func @transform_5(%arg0: i32) -> (i32, i32) {
    %c0_i32 = arith.constant 0 : i32
    %c0_i32_0 = arith.constant 0 : i32
    %c0_i32_1 = arith.constant 0 : i32
    return %c0_i32, %c0_i32_0 : i32, i32
  }
  func.func @transform_6(%arg0: i32) -> (i32, i32) {
    %c0_i32 = arith.constant 0 : i32
    %c0_i32_0 = arith.constant 0 : i32
    %c0_i32_1 = arith.constant 0 : i32
    return %c0_i32, %c0_i32_0 : i32, i32
  }
  func.func @transform_7(%arg0: i32) -> (i32, i32) {
    %c0_i32 = arith.constant 0 : i32
    %c0_i32_0 = arith.constant 0 : i32
    %c0_i32_1 = arith.constant 0 : i32
    return %c0_i32, %c0_i32_0 : i32, i32
  }
  func.func @transform_8(%arg0: i32) -> (i32, i32) {
    %c0_i32 = arith.constant 0 : i32
    %c0_i32_0 = arith.constant 0 : i32
    %c0_i32_1 = arith.constant 0 : i32
    return %c0_i32, %c0_i32_0 : i32, i32
  }
  func.func @transform_9(%arg0: i32) -> (i32, i32) {
    %c0_i32 = arith.constant 0 : i32
    %c0_i32_0 = arith.constant 0 : i32
    %c0_i32_1 = arith.constant 0 : i32
    return %c0_i32, %c0_i32_0 : i32, i32
  }
  func.func @transform_10(%arg0: i32) -> (i32, i32) {
    %c0_i32 = arith.constant 0 : i32
    %c0_i32_0 = arith.constant 0 : i32
    %c0_i32_1 = arith.constant 0 : i32
    return %c0_i32, %c0_i32_0 : i32, i32
  }
  func.func @transform_11(%arg0: i32) -> (i32, i32) {
    %c0_i32 = arith.constant 0 : i32
    %c0_i32_0 = arith.constant 0 : i32
    %c0_i32_1 = arith.constant 0 : i32
    return %c0_i32, %c0_i32_0 : i32, i32
  }
  func.func @transform_12(%arg0: i32) -> (i32, i32) {
    %c0_i32 = arith.constant 0 : i32
    %c0_i32_0 = arith.constant 0 : i32
    %c0_i32_1 = arith.constant 0 : i32
    return %c0_i32, %c0_i32_0 : i32, i32
  }
  func.func @transform_13(%arg0: i32) -> (i32, i32) {
    %c0_i32 = arith.constant 0 : i32
    %c0_i32_0 = arith.constant 0 : i32
    %c0_i32_1 = arith.constant 0 : i32
    return %c0_i32, %c0_i32_0 : i32, i32
  }
  func.func @transform_14(%arg0: i32) -> (i32, i32) {
    %c0_i32 = arith.constant 0 : i32
    %c0_i32_0 = arith.constant 0 : i32
    %c0_i32_1 = arith.constant 0 : i32
    return %c0_i32, %c0_i32_0 : i32, i32
  }
  func.func @transform_15(%arg0: i32) -> (i32, i32) {
    %c0_i32 = arith.constant 0 : i32
    %c0_i32_0 = arith.constant 0 : i32
    %c0_i32_1 = arith.constant 0 : i32
    return %c0_i32, %c0_i32_0 : i32, i32
  }
  func.func @transform_16(%arg0: i32) -> (i32, i32, i32) {
    %c0_i32 = arith.constant 0 : i32
    %c0_i32_0 = arith.constant 0 : i32
    %c0_i32_1 = arith.constant 0 : i32
    return %arg0, %c0_i32, %c0_i32_0 : i32, i32, i32
  }
}

module attributes {stable_mosaic.version = 11 : i64} {
  func.func @_dec_layer_kernel(%arg0: i32, %arg1: memref<1x8x32xbf16, #tpu.memory_space<vmem>>, %arg2: memref<8x32xbf16, #tpu.memory_space<vmem>>, %arg3: memref<1x16x32xbf16, #tpu.memory_space<vmem>>, %arg4: memref<1x16x32xbf16, #tpu.memory_space<vmem>>, %arg5: memref<32x96xbf16, #tpu.memory_space<vmem>>, %arg6: memref<1x96xf32, #tpu.memory_space<vmem>>, %arg7: memref<32x32xbf16, #tpu.memory_space<vmem>>, %arg8: memref<3x32xf32, #tpu.memory_space<vmem>>, %arg9: memref<32x96xbf16, #tpu.memory_space<vmem>>, %arg10: memref<1x96xf32, #tpu.memory_space<vmem>>, %arg11: memref<32x32xbf16, #tpu.memory_space<vmem>>, %arg12: memref<3x32xf32, #tpu.memory_space<vmem>>, %arg13: memref<32x64xbf16, #tpu.memory_space<vmem>>, %arg14: memref<1x64xf32, #tpu.memory_space<vmem>>, %arg15: memref<64x32xbf16, #tpu.memory_space<vmem>>, %arg16: memref<3x32xf32, #tpu.memory_space<vmem>>, %arg17: memref<1x8x32xbf16, #tpu.memory_space<vmem>>) attributes {dimension_semantics = [#tpu.dimension_semantics<parallel>], iteration_bounds = array<i64: 2>, scalar_prefetch = 0 : i64, scratch_operands = 0 : i64, tpu.core_type = #tpu.core_type<tc>, window_params = [{transform_indices = @transform_0, window_bounds = array<i64: 1, 8, 32>}, {pipeline_mode = #tpu.pipeline_mode<synchronous>, transform_indices = @transform_1, window_bounds = array<i64: 8, 32>}, {transform_indices = @transform_2, window_bounds = array<i64: 1, 16, 32>}, {transform_indices = @transform_3, window_bounds = array<i64: 1, 16, 32>}, {pipeline_mode = #tpu.pipeline_mode<synchronous>, transform_indices = @transform_4, window_bounds = array<i64: 32, 96>}, {pipeline_mode = #tpu.pipeline_mode<synchronous>, transform_indices = @transform_5, window_bounds = array<i64: 1, 96>}, {pipeline_mode = #tpu.pipeline_mode<synchronous>, transform_indices = @transform_6, window_bounds = array<i64: 32, 32>}, {pipeline_mode = #tpu.pipeline_mode<synchronous>, transform_indices = @transform_7, window_bounds = array<i64: 3, 32>}, {pipeline_mode = #tpu.pipeline_mode<synchronous>, transform_indices = @transform_8, window_bounds = array<i64: 32, 96>}, {pipeline_mode = #tpu.pipeline_mode<synchronous>, transform_indices = @transform_9, window_bounds = array<i64: 1, 96>}, {pipeline_mode = #tpu.pipeline_mode<synchronous>, transform_indices = @transform_10, window_bounds = array<i64: 32, 32>}, {pipeline_mode = #tpu.pipeline_mode<synchronous>, transform_indices = @transform_11, window_bounds = array<i64: 3, 32>}, {pipeline_mode = #tpu.pipeline_mode<synchronous>, transform_indices = @transform_12, window_bounds = array<i64: 32, 64>}, {pipeline_mode = #tpu.pipeline_mode<synchronous>, transform_indices = @transform_13, window_bounds = array<i64: 1, 64>}, {pipeline_mode = #tpu.pipeline_mode<synchronous>, transform_indices = @transform_14, window_bounds = array<i64: 64, 32>}, {pipeline_mode = #tpu.pipeline_mode<synchronous>, transform_indices = @transform_15, window_bounds = array<i64: 3, 32>}, {transform_indices = @transform_16, window_bounds = array<i64: 1, 8, 32>}]} {
    %c0 = arith.constant 0 : index
    %c0_0 = arith.constant 0 : index
    %c0_1 = arith.constant 0 : index
    %0 = vector.load %arg1[%c0, %c0_0, %c0_1] : memref<1x8x32xbf16, #tpu.memory_space<vmem>>, vector<1x8x32xbf16>
    %1 = vector.shape_cast %0 : vector<1x8x32xbf16> to vector<8x32xbf16>
    %c0_2 = arith.constant 0 : index
    %c0_3 = arith.constant 0 : index
    %2 = vector.load %arg2[%c0_2, %c0_3] : memref<8x32xbf16, #tpu.memory_space<vmem>>, vector<8x32xbf16>
    %c0_4 = arith.constant 0 : index
    %c0_5 = arith.constant 0 : index
    %c0_6 = arith.constant 0 : index
    %3 = vector.load %arg3[%c0_4, %c0_5, %c0_6] : memref<1x16x32xbf16, #tpu.memory_space<vmem>>, vector<1x16x32xbf16>
    %4 = vector.shape_cast %3 : vector<1x16x32xbf16> to vector<16x32xbf16>
    %c0_7 = arith.constant 0 : index
    %c0_8 = arith.constant 0 : index
    %c0_9 = arith.constant 0 : index
    %5 = vector.load %arg4[%c0_7, %c0_8, %c0_9] : memref<1x16x32xbf16, #tpu.memory_space<vmem>>, vector<1x16x32xbf16>
    %6 = vector.shape_cast %5 : vector<1x16x32xbf16> to vector<16x32xbf16>
    %c0_10 = arith.constant 0 : index
    %c0_11 = arith.constant 0 : index
    %7 = vector.load %arg8[%c0_10, %c0_11] : memref<3x32xf32, #tpu.memory_space<vmem>>, vector<3x32xf32>
    %c0_12 = arith.constant 0 : index
    %c0_13 = arith.constant 0 : index
    %8 = vector.load %arg5[%c0_12, %c0_13] : memref<32x96xbf16, #tpu.memory_space<vmem>>, vector<32x96xbf16>
    %c0_14 = arith.constant 0 : index
    %c0_15 = arith.constant 0 : index
    %9 = vector.load %arg6[%c0_14, %c0_15] : memref<1x96xf32, #tpu.memory_space<vmem>>, vector<1x96xf32>
    %c0_16 = arith.constant 0 : index
    %c0_17 = arith.constant 0 : index
    %10 = vector.load %arg7[%c0_16, %c0_17] : memref<32x32xbf16, #tpu.memory_space<vmem>>, vector<32x32xbf16>
    %11 = vector.extract_strided_slice %7 {offsets = [0, 0], sizes = [1, 32], strides = [1, 1]} : vector<3x32xf32> to vector<1x32xf32>
    %12 = vector.extract_strided_slice %7 {offsets = [1, 0], sizes = [1, 32], strides = [1, 1]} : vector<3x32xf32> to vector<1x32xf32>
    %13 = vector.extract_strided_slice %7 {offsets = [2, 0], sizes = [1, 32], strides = [1, 1]} : vector<3x32xf32> to vector<1x32xf32>
    %14 = arith.addf %1, %2 : vector<8x32xbf16>
    %15 = arith.addf %1, %2 : vector<8x32xbf16>
    %16 = vector.extract_strided_slice %8 {offsets = [0, 0], sizes = [32, 32], strides = [1, 1]} : vector<32x96xbf16> to vector<32x32xbf16>
    %cst = arith.constant dense<0.000000e+00> : vector<8x32xf32>
    %17 = tpu.matmul %14, %16, %cst {dimension_numbers = #tpu.dot_dimension_numbers<[1], [0], [0], [1], [0, 0, 1, 1], [], []>} : vector<8x32xbf16>, vector<32x32xbf16>, vector<8x32xf32> -> vector<8x32xf32>
    %18 = vector.extract_strided_slice %9 {offsets = [0, 0], sizes = [1, 32], strides = [1, 1]} : vector<1x96xf32> to vector<1x32xf32>
    %19 = vector.broadcast %18 : vector<1x32xf32> to vector<8x32xf32>
    %20 = arith.addf %17, %19 : vector<8x32xf32>
    %cst_18 = arith.constant 0.353553385 : f32
    %21 = vector.broadcast %cst_18 : f32 to vector<8x32xf32>
    %22 = arith.mulf %20, %21 : vector<8x32xf32>
    %23 = vector.extract_strided_slice %8 {offsets = [0, 32], sizes = [32, 32], strides = [1, 1]} : vector<32x96xbf16> to vector<32x32xbf16>
    %cst_19 = arith.constant dense<0.000000e+00> : vector<8x32xf32>
    %24 = tpu.matmul %15, %23, %cst_19 {dimension_numbers = #tpu.dot_dimension_numbers<[1], [0], [0], [1], [0, 0, 1, 1], [], []>} : vector<8x32xbf16>, vector<32x32xbf16>, vector<8x32xf32> -> vector<8x32xf32>
    %25 = vector.extract_strided_slice %9 {offsets = [0, 32], sizes = [1, 32], strides = [1, 1]} : vector<1x96xf32> to vector<1x32xf32>
    %26 = vector.broadcast %25 : vector<1x32xf32> to vector<8x32xf32>
    %27 = arith.addf %24, %26 : vector<8x32xf32>
    %28 = vector.extract_strided_slice %8 {offsets = [0, 64], sizes = [32, 32], strides = [1, 1]} : vector<32x96xbf16> to vector<32x32xbf16>
    %cst_20 = arith.constant dense<0.000000e+00> : vector<8x32xf32>
    %29 = tpu.matmul %1, %28, %cst_20 {dimension_numbers = #tpu.dot_dimension_numbers<[1], [0], [0], [1], [0, 0, 1, 1], [], []>} : vector<8x32xbf16>, vector<32x32xbf16>, vector<8x32xf32> -> vector<8x32xf32>
    %30 = vector.extract_strided_slice %9 {offsets = [0, 64], sizes = [1, 32], strides = [1, 1]} : vector<1x96xf32> to vector<1x32xf32>
    %31 = vector.broadcast %30 : vector<1x32xf32> to vector<8x32xf32>
    %32 = arith.addf %29, %31 : vector<8x32xf32>
    %33 = arith.truncf %22 : vector<8x32xf32> to vector<8x32xbf16>
    %34 = arith.truncf %27 : vector<8x32xf32> to vector<8x32xbf16>
    %35 = arith.truncf %32 : vector<8x32xf32> to vector<8x32xbf16>
    %cst_21 = arith.constant 0.000000e+00 : f32
    %36 = vector.broadcast %cst_21 : f32 to vector<8x32xf32>
    %37 = vector.extract_strided_slice %33 {offsets = [0, 0], sizes = [8, 8], strides = [1, 1]} : vector<8x32xbf16> to vector<8x8xbf16>
    %38 = vector.extract_strided_slice %34 {offsets = [0, 0], sizes = [8, 8], strides = [1, 1]} : vector<8x32xbf16> to vector<8x8xbf16>
    %cst_22 = arith.constant dense<0.000000e+00> : vector<8x8xf32>
    %39 = tpu.matmul %37, %38, %cst_22 {dimension_numbers = #tpu.dot_dimension_numbers<[1], [1], [0], [0], [0, 0, 1, 0], [], []>} : vector<8x8xbf16>, vector<8x8xbf16>, vector<8x8xf32> -> vector<8x8xf32>
    %cst_23 = arith.constant dense<0xFF800000> : vector<8xf32>
    %40 = vector.multi_reduction <maximumf>, %39, %cst_23 [1] : vector<8x8xf32> to vector<8xf32>
    %41 = vector.shape_cast %40 : vector<8xf32> to vector<8x1xf32>
    %42 = vector.broadcast %41 : vector<8x1xf32> to vector<8x8xf32>
    %43 = arith.subf %39, %42 : vector<8x8xf32>
    %44 = math.exp %43 : vector<8x8xf32>
    %cst_24 = arith.constant dense<0.000000e+00> : vector<8xf32>
    %45 = vector.multi_reduction <add>, %44, %cst_24 [1] : vector<8x8xf32> to vector<8xf32>
    %46 = vector.shape_cast %45 : vector<8xf32> to vector<8x1xf32>
    %47 = tpu.reciprocal %46 {approx = true} : vector<8x1xf32> -> vector<8x1xf32>
    %48 = vector.broadcast %47 : vector<8x1xf32> to vector<8x8xf32>
    %49 = arith.mulf %44, %48 : vector<8x8xf32>
    %50 = arith.truncf %49 : vector<8x8xf32> to vector<8x8xbf16>
    %51 = vector.extract_strided_slice %35 {offsets = [0, 0], sizes = [8, 8], strides = [1, 1]} : vector<8x32xbf16> to vector<8x8xbf16>
    %cst_25 = arith.constant dense<0.000000e+00> : vector<8x8xf32>
    %52 = tpu.matmul %50, %51, %cst_25 {dimension_numbers = #tpu.dot_dimension_numbers<[1], [0], [0], [1], [0, 0, 1, 1], [], []>} : vector<8x8xbf16>, vector<8x8xbf16>, vector<8x8xf32> -> vector<8x8xf32>
    %53 = arith.truncf %52 : vector<8x8xf32> to vector<8x8xbf16>
    %54 = vector.extract_strided_slice %10 {offsets = [0, 0], sizes = [8, 32], strides = [1, 1]} : vector<32x32xbf16> to vector<8x32xbf16>
    %cst_26 = arith.constant dense<0.000000e+00> : vector<8x32xf32>
    %55 = tpu.matmul %53, %54, %cst_26 {dimension_numbers = #tpu.dot_dimension_numbers<[1], [0], [0], [1], [0, 0, 1, 1], [], []>} : vector<8x8xbf16>, vector<8x32xbf16>, vector<8x32xf32> -> vector<8x32xf32>
    %56 = arith.addf %36, %55 : vector<8x32xf32>
    %57 = vector.extract_strided_slice %33 {offsets = [0, 8], sizes = [8, 8], strides = [1, 1]} : vector<8x32xbf16> to vector<8x8xbf16>
    %58 = vector.extract_strided_slice %34 {offsets = [0, 8], sizes = [8, 8], strides = [1, 1]} : vector<8x32xbf16> to vector<8x8xbf16>
    %cst_27 = arith.constant dense<0.000000e+00> : vector<8x8xf32>
    %59 = tpu.matmul %57, %58, %cst_27 {dimension_numbers = #tpu.dot_dimension_numbers<[1], [1], [0], [0], [0, 0, 1, 0], [], []>} : vector<8x8xbf16>, vector<8x8xbf16>, vector<8x8xf32> -> vector<8x8xf32>
    %cst_28 = arith.constant dense<0xFF800000> : vector<8xf32>
    %60 = vector.multi_reduction <maximumf>, %59, %cst_28 [1] : vector<8x8xf32> to vector<8xf32>
    %61 = vector.shape_cast %60 : vector<8xf32> to vector<8x1xf32>
    %62 = vector.broadcast %61 : vector<8x1xf32> to vector<8x8xf32>
    %63 = arith.subf %59, %62 : vector<8x8xf32>
    %64 = math.exp %63 : vector<8x8xf32>
    %cst_29 = arith.constant dense<0.000000e+00> : vector<8xf32>
    %65 = vector.multi_reduction <add>, %64, %cst_29 [1] : vector<8x8xf32> to vector<8xf32>
    %66 = vector.shape_cast %65 : vector<8xf32> to vector<8x1xf32>
    %67 = tpu.reciprocal %66 {approx = true} : vector<8x1xf32> -> vector<8x1xf32>
    %68 = vector.broadcast %67 : vector<8x1xf32> to vector<8x8xf32>
    %69 = arith.mulf %64, %68 : vector<8x8xf32>
    %70 = arith.truncf %69 : vector<8x8xf32> to vector<8x8xbf16>
    %71 = vector.extract_strided_slice %35 {offsets = [0, 8], sizes = [8, 8], strides = [1, 1]} : vector<8x32xbf16> to vector<8x8xbf16>
    %cst_30 = arith.constant dense<0.000000e+00> : vector<8x8xf32>
    %72 = tpu.matmul %70, %71, %cst_30 {dimension_numbers = #tpu.dot_dimension_numbers<[1], [0], [0], [1], [0, 0, 1, 1], [], []>} : vector<8x8xbf16>, vector<8x8xbf16>, vector<8x8xf32> -> vector<8x8xf32>
    %73 = arith.truncf %72 : vector<8x8xf32> to vector<8x8xbf16>
    %74 = vector.extract_strided_slice %10 {offsets = [8, 0], sizes = [8, 32], strides = [1, 1]} : vector<32x32xbf16> to vector<8x32xbf16>
    %cst_31 = arith.constant dense<0.000000e+00> : vector<8x32xf32>
    %75 = tpu.matmul %73, %74, %cst_31 {dimension_numbers = #tpu.dot_dimension_numbers<[1], [0], [0], [1], [0, 0, 1, 1], [], []>} : vector<8x8xbf16>, vector<8x32xbf16>, vector<8x32xf32> -> vector<8x32xf32>
    %76 = arith.addf %56, %75 : vector<8x32xf32>
    %77 = vector.extract_strided_slice %33 {offsets = [0, 16], sizes = [8, 8], strides = [1, 1]} : vector<8x32xbf16> to vector<8x8xbf16>
    %78 = vector.extract_strided_slice %34 {offsets = [0, 16], sizes = [8, 8], strides = [1, 1]} : vector<8x32xbf16> to vector<8x8xbf16>
    %cst_32 = arith.constant dense<0.000000e+00> : vector<8x8xf32>
    %79 = tpu.matmul %77, %78, %cst_32 {dimension_numbers = #tpu.dot_dimension_numbers<[1], [1], [0], [0], [0, 0, 1, 0], [], []>} : vector<8x8xbf16>, vector<8x8xbf16>, vector<8x8xf32> -> vector<8x8xf32>
    %cst_33 = arith.constant dense<0xFF800000> : vector<8xf32>
    %80 = vector.multi_reduction <maximumf>, %79, %cst_33 [1] : vector<8x8xf32> to vector<8xf32>
    %81 = vector.shape_cast %80 : vector<8xf32> to vector<8x1xf32>
    %82 = vector.broadcast %81 : vector<8x1xf32> to vector<8x8xf32>
    %83 = arith.subf %79, %82 : vector<8x8xf32>
    %84 = math.exp %83 : vector<8x8xf32>
    %cst_34 = arith.constant dense<0.000000e+00> : vector<8xf32>
    %85 = vector.multi_reduction <add>, %84, %cst_34 [1] : vector<8x8xf32> to vector<8xf32>
    %86 = vector.shape_cast %85 : vector<8xf32> to vector<8x1xf32>
    %87 = tpu.reciprocal %86 {approx = true} : vector<8x1xf32> -> vector<8x1xf32>
    %88 = vector.broadcast %87 : vector<8x1xf32> to vector<8x8xf32>
    %89 = arith.mulf %84, %88 : vector<8x8xf32>
    %90 = arith.truncf %89 : vector<8x8xf32> to vector<8x8xbf16>
    %91 = vector.extract_strided_slice %35 {offsets = [0, 16], sizes = [8, 8], strides = [1, 1]} : vector<8x32xbf16> to vector<8x8xbf16>
    %cst_35 = arith.constant dense<0.000000e+00> : vector<8x8xf32>
    %92 = tpu.matmul %90, %91, %cst_35 {dimension_numbers = #tpu.dot_dimension_numbers<[1], [0], [0], [1], [0, 0, 1, 1], [], []>} : vector<8x8xbf16>, vector<8x8xbf16>, vector<8x8xf32> -> vector<8x8xf32>
    %93 = arith.truncf %92 : vector<8x8xf32> to vector<8x8xbf16>
    %94 = vector.extract_strided_slice %10 {offsets = [16, 0], sizes = [8, 32], strides = [1, 1]} : vector<32x32xbf16> to vector<8x32xbf16>
    %cst_36 = arith.constant dense<0.000000e+00> : vector<8x32xf32>
    %95 = tpu.matmul %93, %94, %cst_36 {dimension_numbers = #tpu.dot_dimension_numbers<[1], [0], [0], [1], [0, 0, 1, 1], [], []>} : vector<8x8xbf16>, vector<8x32xbf16>, vector<8x32xf32> -> vector<8x32xf32>
    %96 = arith.addf %76, %95 : vector<8x32xf32>
    %97 = vector.extract_strided_slice %33 {offsets = [0, 24], sizes = [8, 8], strides = [1, 1]} : vector<8x32xbf16> to vector<8x8xbf16>
    %98 = vector.extract_strided_slice %34 {offsets = [0, 24], sizes = [8, 8], strides = [1, 1]} : vector<8x32xbf16> to vector<8x8xbf16>
    %cst_37 = arith.constant dense<0.000000e+00> : vector<8x8xf32>
    %99 = tpu.matmul %97, %98, %cst_37 {dimension_numbers = #tpu.dot_dimension_numbers<[1], [1], [0], [0], [0, 0, 1, 0], [], []>} : vector<8x8xbf16>, vector<8x8xbf16>, vector<8x8xf32> -> vector<8x8xf32>
    %cst_38 = arith.constant dense<0xFF800000> : vector<8xf32>
    %100 = vector.multi_reduction <maximumf>, %99, %cst_38 [1] : vector<8x8xf32> to vector<8xf32>
    %101 = vector.shape_cast %100 : vector<8xf32> to vector<8x1xf32>
    %102 = vector.broadcast %101 : vector<8x1xf32> to vector<8x8xf32>
    %103 = arith.subf %99, %102 : vector<8x8xf32>
    %104 = math.exp %103 : vector<8x8xf32>
    %cst_39 = arith.constant dense<0.000000e+00> : vector<8xf32>
    %105 = vector.multi_reduction <add>, %104, %cst_39 [1] : vector<8x8xf32> to vector<8xf32>
    %106 = vector.shape_cast %105 : vector<8xf32> to vector<8x1xf32>
    %107 = tpu.reciprocal %106 {approx = true} : vector<8x1xf32> -> vector<8x1xf32>
    %108 = vector.broadcast %107 : vector<8x1xf32> to vector<8x8xf32>
    %109 = arith.mulf %104, %108 : vector<8x8xf32>
    %110 = arith.truncf %109 : vector<8x8xf32> to vector<8x8xbf16>
    %111 = vector.extract_strided_slice %35 {offsets = [0, 24], sizes = [8, 8], strides = [1, 1]} : vector<8x32xbf16> to vector<8x8xbf16>
    %cst_40 = arith.constant dense<0.000000e+00> : vector<8x8xf32>
    %112 = tpu.matmul %110, %111, %cst_40 {dimension_numbers = #tpu.dot_dimension_numbers<[1], [0], [0], [1], [0, 0, 1, 1], [], []>} : vector<8x8xbf16>, vector<8x8xbf16>, vector<8x8xf32> -> vector<8x8xf32>
    %113 = arith.truncf %112 : vector<8x8xf32> to vector<8x8xbf16>
    %114 = vector.extract_strided_slice %10 {offsets = [24, 0], sizes = [8, 32], strides = [1, 1]} : vector<32x32xbf16> to vector<8x32xbf16>
    %cst_41 = arith.constant dense<0.000000e+00> : vector<8x32xf32>
    %115 = tpu.matmul %113, %114, %cst_41 {dimension_numbers = #tpu.dot_dimension_numbers<[1], [0], [0], [1], [0, 0, 1, 1], [], []>} : vector<8x8xbf16>, vector<8x32xbf16>, vector<8x32xf32> -> vector<8x32xf32>
    %116 = arith.addf %96, %115 : vector<8x32xf32>
    %117 = vector.broadcast %11 : vector<1x32xf32> to vector<8x32xf32>
    %118 = arith.addf %116, %117 : vector<8x32xf32>
    %119 = arith.extf %1 : vector<8x32xbf16> to vector<8x32xf32>
    %120 = arith.addf %118, %119 : vector<8x32xf32>
    %cst_42 = arith.constant dense<0.000000e+00> : vector<8xf32>
    %121 = vector.multi_reduction <add>, %120, %cst_42 [1] : vector<8x32xf32> to vector<8xf32>
    %122 = vector.shape_cast %121 : vector<8xf32> to vector<8x1xf32>
    %cst_43 = arith.constant 3.200000e+01 : f32
    %123 = vector.broadcast %cst_43 : f32 to vector<8x1xf32>
    %124 = arith.divf %122, %123 : vector<8x1xf32>
    %125 = vector.broadcast %124 : vector<8x1xf32> to vector<8x32xf32>
    %126 = arith.subf %120, %125 : vector<8x32xf32>
    %127 = arith.mulf %126, %126 : vector<8x32xf32>
    %cst_44 = arith.constant dense<0.000000e+00> : vector<8xf32>
    %128 = vector.multi_reduction <add>, %127, %cst_44 [1] : vector<8x32xf32> to vector<8xf32>
    %129 = vector.shape_cast %128 : vector<8xf32> to vector<8x1xf32>
    %cst_45 = arith.constant 3.200000e+01 : f32
    %130 = vector.broadcast %cst_45 : f32 to vector<8x1xf32>
    %131 = arith.divf %129, %130 : vector<8x1xf32>
    %132 = vector.broadcast %124 : vector<8x1xf32> to vector<8x32xf32>
    %133 = arith.subf %120, %132 : vector<8x32xf32>
    %cst_46 = arith.constant 9.99999974E-6 : f32
    %134 = vector.broadcast %cst_46 : f32 to vector<8x1xf32>
    %135 = arith.addf %131, %134 : vector<8x1xf32>
    %136 = math.rsqrt %135 : vector<8x1xf32>
    %137 = vector.broadcast %136 : vector<8x1xf32> to vector<8x32xf32>
    %138 = arith.mulf %133, %137 : vector<8x32xf32>
    %139 = vector.broadcast %12 : vector<1x32xf32> to vector<8x32xf32>
    %140 = arith.mulf %138, %139 : vector<8x32xf32>
    %141 = vector.broadcast %13 : vector<1x32xf32> to vector<8x32xf32>
    %142 = arith.addf %140, %141 : vector<8x32xf32>
    %c0_47 = arith.constant 0 : index
    %c0_48 = arith.constant 0 : index
    %143 = vector.load %arg12[%c0_47, %c0_48] : memref<3x32xf32, #tpu.memory_space<vmem>>, vector<3x32xf32>
    %c0_49 = arith.constant 0 : index
    %c0_50 = arith.constant 0 : index
    %144 = vector.load %arg9[%c0_49, %c0_50] : memref<32x96xbf16, #tpu.memory_space<vmem>>, vector<32x96xbf16>
    %c0_51 = arith.constant 0 : index
    %c0_52 = arith.constant 0 : index
    %145 = vector.load %arg10[%c0_51, %c0_52] : memref<1x96xf32, #tpu.memory_space<vmem>>, vector<1x96xf32>
    %c0_53 = arith.constant 0 : index
    %c0_54 = arith.constant 0 : index
    %146 = vector.load %arg11[%c0_53, %c0_54] : memref<32x32xbf16, #tpu.memory_space<vmem>>, vector<32x32xbf16>
    %147 = vector.extract_strided_slice %143 {offsets = [0, 0], sizes = [1, 32], strides = [1, 1]} : vector<3x32xf32> to vector<1x32xf32>
    %148 = vector.extract_strided_slice %143 {offsets = [1, 0], sizes = [1, 32], strides = [1, 1]} : vector<3x32xf32> to vector<1x32xf32>
    %149 = vector.extract_strided_slice %143 {offsets = [2, 0], sizes = [1, 32], strides = [1, 1]} : vector<3x32xf32> to vector<1x32xf32>
    %150 = arith.truncf %142 : vector<8x32xf32> to vector<8x32xbf16>
    %151 = arith.addf %150, %2 : vector<8x32xbf16>
    %152 = arith.addf %4, %6 : vector<16x32xbf16>
    %153 = vector.extract_strided_slice %144 {offsets = [0, 0], sizes = [32, 32], strides = [1, 1]} : vector<32x96xbf16> to vector<32x32xbf16>
    %cst_55 = arith.constant dense<0.000000e+00> : vector<8x32xf32>
    %154 = tpu.matmul %151, %153, %cst_55 {dimension_numbers = #tpu.dot_dimension_numbers<[1], [0], [0], [1], [0, 0, 1, 1], [], []>} : vector<8x32xbf16>, vector<32x32xbf16>, vector<8x32xf32> -> vector<8x32xf32>
    %155 = vector.extract_strided_slice %145 {offsets = [0, 0], sizes = [1, 32], strides = [1, 1]} : vector<1x96xf32> to vector<1x32xf32>
    %156 = vector.broadcast %155 : vector<1x32xf32> to vector<8x32xf32>
    %157 = arith.addf %154, %156 : vector<8x32xf32>
    %cst_56 = arith.constant 0.353553385 : f32
    %158 = vector.broadcast %cst_56 : f32 to vector<8x32xf32>
    %159 = arith.mulf %157, %158 : vector<8x32xf32>
    %160 = vector.extract_strided_slice %144 {offsets = [0, 32], sizes = [32, 32], strides = [1, 1]} : vector<32x96xbf16> to vector<32x32xbf16>
    %cst_57 = arith.constant dense<0.000000e+00> : vector<16x32xf32>
    %161 = tpu.matmul %152, %160, %cst_57 {dimension_numbers = #tpu.dot_dimension_numbers<[1], [0], [0], [1], [0, 0, 1, 1], [], []>} : vector<16x32xbf16>, vector<32x32xbf16>, vector<16x32xf32> -> vector<16x32xf32>
    %162 = vector.extract_strided_slice %145 {offsets = [0, 32], sizes = [1, 32], strides = [1, 1]} : vector<1x96xf32> to vector<1x32xf32>
    %163 = vector.broadcast %162 : vector<1x32xf32> to vector<16x32xf32>
    %164 = arith.addf %161, %163 : vector<16x32xf32>
    %165 = vector.extract_strided_slice %144 {offsets = [0, 64], sizes = [32, 32], strides = [1, 1]} : vector<32x96xbf16> to vector<32x32xbf16>
    %cst_58 = arith.constant dense<0.000000e+00> : vector<16x32xf32>
    %166 = tpu.matmul %4, %165, %cst_58 {dimension_numbers = #tpu.dot_dimension_numbers<[1], [0], [0], [1], [0, 0, 1, 1], [], []>} : vector<16x32xbf16>, vector<32x32xbf16>, vector<16x32xf32> -> vector<16x32xf32>
    %167 = vector.extract_strided_slice %145 {offsets = [0, 64], sizes = [1, 32], strides = [1, 1]} : vector<1x96xf32> to vector<1x32xf32>
    %168 = vector.broadcast %167 : vector<1x32xf32> to vector<16x32xf32>
    %169 = arith.addf %166, %168 : vector<16x32xf32>
    %170 = arith.truncf %159 : vector<8x32xf32> to vector<8x32xbf16>
    %171 = arith.truncf %164 : vector<16x32xf32> to vector<16x32xbf16>
    %172 = arith.truncf %169 : vector<16x32xf32> to vector<16x32xbf16>
    %cst_59 = arith.constant 0.000000e+00 : f32
    %173 = vector.broadcast %cst_59 : f32 to vector<8x32xf32>
    %174 = vector.extract_strided_slice %170 {offsets = [0, 0], sizes = [8, 8], strides = [1, 1]} : vector<8x32xbf16> to vector<8x8xbf16>
    %175 = vector.extract_strided_slice %171 {offsets = [0, 0], sizes = [16, 8], strides = [1, 1]} : vector<16x32xbf16> to vector<16x8xbf16>
    %cst_60 = arith.constant dense<0.000000e+00> : vector<8x16xf32>
    %176 = tpu.matmul %174, %175, %cst_60 {dimension_numbers = #tpu.dot_dimension_numbers<[1], [1], [0], [0], [0, 0, 1, 0], [], []>} : vector<8x8xbf16>, vector<16x8xbf16>, vector<8x16xf32> -> vector<8x16xf32>
    %cst_61 = arith.constant dense<0xFF800000> : vector<8xf32>
    %177 = vector.multi_reduction <maximumf>, %176, %cst_61 [1] : vector<8x16xf32> to vector<8xf32>
    %178 = vector.shape_cast %177 : vector<8xf32> to vector<8x1xf32>
    %179 = vector.broadcast %178 : vector<8x1xf32> to vector<8x16xf32>
    %180 = arith.subf %176, %179 : vector<8x16xf32>
    %181 = math.exp %180 : vector<8x16xf32>
    %cst_62 = arith.constant dense<0.000000e+00> : vector<8xf32>
    %182 = vector.multi_reduction <add>, %181, %cst_62 [1] : vector<8x16xf32> to vector<8xf32>
    %183 = vector.shape_cast %182 : vector<8xf32> to vector<8x1xf32>
    %184 = tpu.reciprocal %183 {approx = true} : vector<8x1xf32> -> vector<8x1xf32>
    %185 = vector.broadcast %184 : vector<8x1xf32> to vector<8x16xf32>
    %186 = arith.mulf %181, %185 : vector<8x16xf32>
    %187 = arith.truncf %186 : vector<8x16xf32> to vector<8x16xbf16>
    %188 = vector.extract_strided_slice %172 {offsets = [0, 0], sizes = [16, 8], strides = [1, 1]} : vector<16x32xbf16> to vector<16x8xbf16>
    %cst_63 = arith.constant dense<0.000000e+00> : vector<8x8xf32>
    %189 = tpu.matmul %187, %188, %cst_63 {dimension_numbers = #tpu.dot_dimension_numbers<[1], [0], [0], [1], [0, 0, 1, 1], [], []>} : vector<8x16xbf16>, vector<16x8xbf16>, vector<8x8xf32> -> vector<8x8xf32>
    %190 = arith.truncf %189 : vector<8x8xf32> to vector<8x8xbf16>
    %191 = vector.extract_strided_slice %146 {offsets = [0, 0], sizes = [8, 32], strides = [1, 1]} : vector<32x32xbf16> to vector<8x32xbf16>
    %cst_64 = arith.constant dense<0.000000e+00> : vector<8x32xf32>
    %192 = tpu.matmul %190, %191, %cst_64 {dimension_numbers = #tpu.dot_dimension_numbers<[1], [0], [0], [1], [0, 0, 1, 1], [], []>} : vector<8x8xbf16>, vector<8x32xbf16>, vector<8x32xf32> -> vector<8x32xf32>
    %193 = arith.addf %173, %192 : vector<8x32xf32>
    %194 = vector.extract_strided_slice %170 {offsets = [0, 8], sizes = [8, 8], strides = [1, 1]} : vector<8x32xbf16> to vector<8x8xbf16>
    %195 = vector.extract_strided_slice %171 {offsets = [0, 8], sizes = [16, 8], strides = [1, 1]} : vector<16x32xbf16> to vector<16x8xbf16>
    %cst_65 = arith.constant dense<0.000000e+00> : vector<8x16xf32>
    %196 = tpu.matmul %194, %195, %cst_65 {dimension_numbers = #tpu.dot_dimension_numbers<[1], [1], [0], [0], [0, 0, 1, 0], [], []>} : vector<8x8xbf16>, vector<16x8xbf16>, vector<8x16xf32> -> vector<8x16xf32>
    %cst_66 = arith.constant dense<0xFF800000> : vector<8xf32>
    %197 = vector.multi_reduction <maximumf>, %196, %cst_66 [1] : vector<8x16xf32> to vector<8xf32>
    %198 = vector.shape_cast %197 : vector<8xf32> to vector<8x1xf32>
    %199 = vector.broadcast %198 : vector<8x1xf32> to vector<8x16xf32>
    %200 = arith.subf %196, %199 : vector<8x16xf32>
    %201 = math.exp %200 : vector<8x16xf32>
    %cst_67 = arith.constant dense<0.000000e+00> : vector<8xf32>
    %202 = vector.multi_reduction <add>, %201, %cst_67 [1] : vector<8x16xf32> to vector<8xf32>
    %203 = vector.shape_cast %202 : vector<8xf32> to vector<8x1xf32>
    %204 = tpu.reciprocal %203 {approx = true} : vector<8x1xf32> -> vector<8x1xf32>
    %205 = vector.broadcast %204 : vector<8x1xf32> to vector<8x16xf32>
    %206 = arith.mulf %201, %205 : vector<8x16xf32>
    %207 = arith.truncf %206 : vector<8x16xf32> to vector<8x16xbf16>
    %208 = vector.extract_strided_slice %172 {offsets = [0, 8], sizes = [16, 8], strides = [1, 1]} : vector<16x32xbf16> to vector<16x8xbf16>
    %cst_68 = arith.constant dense<0.000000e+00> : vector<8x8xf32>
    %209 = tpu.matmul %207, %208, %cst_68 {dimension_numbers = #tpu.dot_dimension_numbers<[1], [0], [0], [1], [0, 0, 1, 1], [], []>} : vector<8x16xbf16>, vector<16x8xbf16>, vector<8x8xf32> -> vector<8x8xf32>
    %210 = arith.truncf %209 : vector<8x8xf32> to vector<8x8xbf16>
    %211 = vector.extract_strided_slice %146 {offsets = [8, 0], sizes = [8, 32], strides = [1, 1]} : vector<32x32xbf16> to vector<8x32xbf16>
    %cst_69 = arith.constant dense<0.000000e+00> : vector<8x32xf32>
    %212 = tpu.matmul %210, %211, %cst_69 {dimension_numbers = #tpu.dot_dimension_numbers<[1], [0], [0], [1], [0, 0, 1, 1], [], []>} : vector<8x8xbf16>, vector<8x32xbf16>, vector<8x32xf32> -> vector<8x32xf32>
    %213 = arith.addf %193, %212 : vector<8x32xf32>
    %214 = vector.extract_strided_slice %170 {offsets = [0, 16], sizes = [8, 8], strides = [1, 1]} : vector<8x32xbf16> to vector<8x8xbf16>
    %215 = vector.extract_strided_slice %171 {offsets = [0, 16], sizes = [16, 8], strides = [1, 1]} : vector<16x32xbf16> to vector<16x8xbf16>
    %cst_70 = arith.constant dense<0.000000e+00> : vector<8x16xf32>
    %216 = tpu.matmul %214, %215, %cst_70 {dimension_numbers = #tpu.dot_dimension_numbers<[1], [1], [0], [0], [0, 0, 1, 0], [], []>} : vector<8x8xbf16>, vector<16x8xbf16>, vector<8x16xf32> -> vector<8x16xf32>
    %cst_71 = arith.constant dense<0xFF800000> : vector<8xf32>
    %217 = vector.multi_reduction <maximumf>, %216, %cst_71 [1] : vector<8x16xf32> to vector<8xf32>
    %218 = vector.shape_cast %217 : vector<8xf32> to vector<8x1xf32>
    %219 = vector.broadcast %218 : vector<8x1xf32> to vector<8x16xf32>
    %220 = arith.subf %216, %219 : vector<8x16xf32>
    %221 = math.exp %220 : vector<8x16xf32>
    %cst_72 = arith.constant dense<0.000000e+00> : vector<8xf32>
    %222 = vector.multi_reduction <add>, %221, %cst_72 [1] : vector<8x16xf32> to vector<8xf32>
    %223 = vector.shape_cast %222 : vector<8xf32> to vector<8x1xf32>
    %224 = tpu.reciprocal %223 {approx = true} : vector<8x1xf32> -> vector<8x1xf32>
    %225 = vector.broadcast %224 : vector<8x1xf32> to vector<8x16xf32>
    %226 = arith.mulf %221, %225 : vector<8x16xf32>
    %227 = arith.truncf %226 : vector<8x16xf32> to vector<8x16xbf16>
    %228 = vector.extract_strided_slice %172 {offsets = [0, 16], sizes = [16, 8], strides = [1, 1]} : vector<16x32xbf16> to vector<16x8xbf16>
    %cst_73 = arith.constant dense<0.000000e+00> : vector<8x8xf32>
    %229 = tpu.matmul %227, %228, %cst_73 {dimension_numbers = #tpu.dot_dimension_numbers<[1], [0], [0], [1], [0, 0, 1, 1], [], []>} : vector<8x16xbf16>, vector<16x8xbf16>, vector<8x8xf32> -> vector<8x8xf32>
    %230 = arith.truncf %229 : vector<8x8xf32> to vector<8x8xbf16>
    %231 = vector.extract_strided_slice %146 {offsets = [16, 0], sizes = [8, 32], strides = [1, 1]} : vector<32x32xbf16> to vector<8x32xbf16>
    %cst_74 = arith.constant dense<0.000000e+00> : vector<8x32xf32>
    %232 = tpu.matmul %230, %231, %cst_74 {dimension_numbers = #tpu.dot_dimension_numbers<[1], [0], [0], [1], [0, 0, 1, 1], [], []>} : vector<8x8xbf16>, vector<8x32xbf16>, vector<8x32xf32> -> vector<8x32xf32>
    %233 = arith.addf %213, %232 : vector<8x32xf32>
    %234 = vector.extract_strided_slice %170 {offsets = [0, 24], sizes = [8, 8], strides = [1, 1]} : vector<8x32xbf16> to vector<8x8xbf16>
    %235 = vector.extract_strided_slice %171 {offsets = [0, 24], sizes = [16, 8], strides = [1, 1]} : vector<16x32xbf16> to vector<16x8xbf16>
    %cst_75 = arith.constant dense<0.000000e+00> : vector<8x16xf32>
    %236 = tpu.matmul %234, %235, %cst_75 {dimension_numbers = #tpu.dot_dimension_numbers<[1], [1], [0], [0], [0, 0, 1, 0], [], []>} : vector<8x8xbf16>, vector<16x8xbf16>, vector<8x16xf32> -> vector<8x16xf32>
    %cst_76 = arith.constant dense<0xFF800000> : vector<8xf32>
    %237 = vector.multi_reduction <maximumf>, %236, %cst_76 [1] : vector<8x16xf32> to vector<8xf32>
    %238 = vector.shape_cast %237 : vector<8xf32> to vector<8x1xf32>
    %239 = vector.broadcast %238 : vector<8x1xf32> to vector<8x16xf32>
    %240 = arith.subf %236, %239 : vector<8x16xf32>
    %241 = math.exp %240 : vector<8x16xf32>
    %cst_77 = arith.constant dense<0.000000e+00> : vector<8xf32>
    %242 = vector.multi_reduction <add>, %241, %cst_77 [1] : vector<8x16xf32> to vector<8xf32>
    %243 = vector.shape_cast %242 : vector<8xf32> to vector<8x1xf32>
    %244 = tpu.reciprocal %243 {approx = true} : vector<8x1xf32> -> vector<8x1xf32>
    %245 = vector.broadcast %244 : vector<8x1xf32> to vector<8x16xf32>
    %246 = arith.mulf %241, %245 : vector<8x16xf32>
    %247 = arith.truncf %246 : vector<8x16xf32> to vector<8x16xbf16>
    %248 = vector.extract_strided_slice %172 {offsets = [0, 24], sizes = [16, 8], strides = [1, 1]} : vector<16x32xbf16> to vector<16x8xbf16>
    %cst_78 = arith.constant dense<0.000000e+00> : vector<8x8xf32>
    %249 = tpu.matmul %247, %248, %cst_78 {dimension_numbers = #tpu.dot_dimension_numbers<[1], [0], [0], [1], [0, 0, 1, 1], [], []>} : vector<8x16xbf16>, vector<16x8xbf16>, vector<8x8xf32> -> vector<8x8xf32>
    %250 = arith.truncf %249 : vector<8x8xf32> to vector<8x8xbf16>
    %251 = vector.extract_strided_slice %146 {offsets = [24, 0], sizes = [8, 32], strides = [1, 1]} : vector<32x32xbf16> to vector<8x32xbf16>
    %cst_79 = arith.constant dense<0.000000e+00> : vector<8x32xf32>
    %252 = tpu.matmul %250, %251, %cst_79 {dimension_numbers = #tpu.dot_dimension_numbers<[1], [0], [0], [1], [0, 0, 1, 1], [], []>} : vector<8x8xbf16>, vector<8x32xbf16>, vector<8x32xf32> -> vector<8x32xf32>
    %253 = arith.addf %233, %252 : vector<8x32xf32>
    %254 = vector.broadcast %147 : vector<1x32xf32> to vector<8x32xf32>
    %255 = arith.addf %253, %254 : vector<8x32xf32>
    %256 = arith.addf %255, %142 : vector<8x32xf32>
    %cst_80 = arith.constant dense<0.000000e+00> : vector<8xf32>
    %257 = vector.multi_reduction <add>, %256, %cst_80 [1] : vector<8x32xf32> to vector<8xf32>
    %258 = vector.shape_cast %257 : vector<8xf32> to vector<8x1xf32>
    %cst_81 = arith.constant 3.200000e+01 : f32
    %259 = vector.broadcast %cst_81 : f32 to vector<8x1xf32>
    %260 = arith.divf %258, %259 : vector<8x1xf32>
    %261 = vector.broadcast %260 : vector<8x1xf32> to vector<8x32xf32>
    %262 = arith.subf %256, %261 : vector<8x32xf32>
    %263 = arith.mulf %262, %262 : vector<8x32xf32>
    %cst_82 = arith.constant dense<0.000000e+00> : vector<8xf32>
    %264 = vector.multi_reduction <add>, %263, %cst_82 [1] : vector<8x32xf32> to vector<8xf32>
    %265 = vector.shape_cast %264 : vector<8xf32> to vector<8x1xf32>
    %cst_83 = arith.constant 3.200000e+01 : f32
    %266 = vector.broadcast %cst_83 : f32 to vector<8x1xf32>
    %267 = arith.divf %265, %266 : vector<8x1xf32>
    %268 = vector.broadcast %260 : vector<8x1xf32> to vector<8x32xf32>
    %269 = arith.subf %256, %268 : vector<8x32xf32>
    %cst_84 = arith.constant 9.99999974E-6 : f32
    %270 = vector.broadcast %cst_84 : f32 to vector<8x1xf32>
    %271 = arith.addf %267, %270 : vector<8x1xf32>
    %272 = math.rsqrt %271 : vector<8x1xf32>
    %273 = vector.broadcast %272 : vector<8x1xf32> to vector<8x32xf32>
    %274 = arith.mulf %269, %273 : vector<8x32xf32>
    %275 = vector.broadcast %148 : vector<1x32xf32> to vector<8x32xf32>
    %276 = arith.mulf %274, %275 : vector<8x32xf32>
    %277 = vector.broadcast %149 : vector<1x32xf32> to vector<8x32xf32>
    %278 = arith.addf %276, %277 : vector<8x32xf32>
    %c0_85 = arith.constant 0 : index
    %c0_86 = arith.constant 0 : index
    %279 = vector.load %arg16[%c0_85, %c0_86] : memref<3x32xf32, #tpu.memory_space<vmem>>, vector<3x32xf32>
    %c0_87 = arith.constant 0 : index
    %c0_88 = arith.constant 0 : index
    %280 = vector.load %arg13[%c0_87, %c0_88] : memref<32x64xbf16, #tpu.memory_space<vmem>>, vector<32x64xbf16>
    %c0_89 = arith.constant 0 : index
    %c0_90 = arith.constant 0 : index
    %281 = vector.load %arg14[%c0_89, %c0_90] : memref<1x64xf32, #tpu.memory_space<vmem>>, vector<1x64xf32>
    %c0_91 = arith.constant 0 : index
    %c0_92 = arith.constant 0 : index
    %282 = vector.load %arg15[%c0_91, %c0_92] : memref<64x32xbf16, #tpu.memory_space<vmem>>, vector<64x32xbf16>
    %283 = vector.extract_strided_slice %279 {offsets = [0, 0], sizes = [1, 32], strides = [1, 1]} : vector<3x32xf32> to vector<1x32xf32>
    %284 = vector.extract_strided_slice %279 {offsets = [1, 0], sizes = [1, 32], strides = [1, 1]} : vector<3x32xf32> to vector<1x32xf32>
    %285 = vector.extract_strided_slice %279 {offsets = [2, 0], sizes = [1, 32], strides = [1, 1]} : vector<3x32xf32> to vector<1x32xf32>
    %286 = arith.truncf %278 : vector<8x32xf32> to vector<8x32xbf16>
    %cst_93 = arith.constant dense<0.000000e+00> : vector<8x64xf32>
    %287 = tpu.matmul %286, %280, %cst_93 {dimension_numbers = #tpu.dot_dimension_numbers<[1], [0], [0], [1], [0, 0, 1, 1], [], []>} : vector<8x32xbf16>, vector<32x64xbf16>, vector<8x64xf32> -> vector<8x64xf32>
    %288 = vector.broadcast %281 : vector<1x64xf32> to vector<8x64xf32>
    %289 = arith.addf %287, %288 : vector<8x64xf32>
    %cst_94 = arith.constant 0.000000e+00 : f32
    %290 = vector.broadcast %cst_94 : f32 to vector<8x64xf32>
    %291 = arith.maximumf %289, %290 : vector<8x64xf32>
    %292 = arith.truncf %291 : vector<8x64xf32> to vector<8x64xbf16>
    %cst_95 = arith.constant dense<0.000000e+00> : vector<8x32xf32>
    %293 = tpu.matmul %292, %282, %cst_95 {dimension_numbers = #tpu.dot_dimension_numbers<[1], [0], [0], [1], [0, 0, 1, 1], [], []>} : vector<8x64xbf16>, vector<64x32xbf16>, vector<8x32xf32> -> vector<8x32xf32>
    %294 = vector.broadcast %283 : vector<1x32xf32> to vector<8x32xf32>
    %295 = arith.addf %293, %294 : vector<8x32xf32>
    %296 = arith.addf %295, %278 : vector<8x32xf32>
    %cst_96 = arith.constant dense<0.000000e+00> : vector<8xf32>
    %297 = vector.multi_reduction <add>, %296, %cst_96 [1] : vector<8x32xf32> to vector<8xf32>
    %298 = vector.shape_cast %297 : vector<8xf32> to vector<8x1xf32>
    %cst_97 = arith.constant 3.200000e+01 : f32
    %299 = vector.broadcast %cst_97 : f32 to vector<8x1xf32>
    %300 = arith.divf %298, %299 : vector<8x1xf32>
    %301 = vector.broadcast %300 : vector<8x1xf32> to vector<8x32xf32>
    %302 = arith.subf %296, %301 : vector<8x32xf32>
    %303 = arith.mulf %302, %302 : vector<8x32xf32>
    %cst_98 = arith.constant dense<0.000000e+00> : vector<8xf32>
    %304 = vector.multi_reduction <add>, %303, %cst_98 [1] : vector<8x32xf32> to vector<8xf32>
    %305 = vector.shape_cast %304 : vector<8xf32> to vector<8x1xf32>
    %cst_99 = arith.constant 3.200000e+01 : f32
    %306 = vector.broadcast %cst_99 : f32 to vector<8x1xf32>
    %307 = arith.divf %305, %306 : vector<8x1xf32>
    %308 = vector.broadcast %300 : vector<8x1xf32> to vector<8x32xf32>
    %309 = arith.subf %296, %308 : vector<8x32xf32>
    %cst_100 = arith.constant 9.99999974E-6 : f32
    %310 = vector.broadcast %cst_100 : f32 to vector<8x1xf32>
    %311 = arith.addf %307, %310 : vector<8x1xf32>
    %312 = math.rsqrt %311 : vector<8x1xf32>
    %313 = vector.broadcast %312 : vector<8x1xf32> to vector<8x32xf32>
    %314 = arith.mulf %309, %313 : vector<8x32xf32>
    %315 = vector.broadcast %284 : vector<1x32xf32> to vector<8x32xf32>
    %316 = arith.mulf %314, %315 : vector<8x32xf32>
    %317 = vector.broadcast %285 : vector<1x32xf32> to vector<8x32xf32>
    %318 = arith.addf %316, %317 : vector<8x32xf32>
    %319 = arith.truncf %318 : vector<8x32xf32> to vector<8x32xbf16>
    %c0_101 = arith.constant 0 : index
    %c0_102 = arith.constant 0 : index
    %c0_103 = arith.constant 0 : index
    %320 = vector.load %arg17[%c0_101, %c0_102, %c0_103] : memref<1x8x32xbf16, #tpu.memory_space<vmem>>, vector<1x8x32xbf16>
    %321 = vector.shape_cast %320 : vector<1x8x32xbf16> to vector<8x32xbf16>
    %322 = vector.shape_cast %319 : vector<8x32xbf16> to vector<1x8x32xbf16>
    tpu.vector_store %arg17[%c0_101, %c0_102, %c0_103], %322 {strides = array<i32>} : memref<1x8x32xbf16, #tpu.memory_space<vmem>>, vector<1x8x32xbf16>,
    return
  }
  func.func @transform_0(%arg0: i32) -> (i32, i32, i32) {
    %c0_i32 = arith.constant 0 : i32
    %c0_i32_0 = arith.constant 0 : i32
    %c0_i32_1 = arith.constant 0 : i32
    return %arg0, %c0_i32, %c0_i32_0 : i32, i32, i32
  }
  func.func @transform_1(%arg0: i32) -> (i32, i32) {
    %c0_i32 = arith.constant 0 : i32
    %c0_i32_0 = arith.constant 0 : i32
    %c0_i32_1 = arith.constant 0 : i32
    return %c0_i32, %c0_i32_0 : i32, i32
  }
  func.func @transform_2(%arg0: i32) -> (i32, i32, i32) {
    %c0_i32 = arith.constant 0 : i32
    %c0_i32_0 = arith.constant 0 : i32
    %c0_i32_1 = arith.constant 0 : i32
    return %arg0, %c0_i32, %c0_i32_0 : i32, i32, i32
  }
  func.func @transform_3(%arg0: i32) -> (i32, i32, i32) {
    %c0_i32 = arith.constant 0 : i32
    %c0_i32_0 = arith.constant 0 : i32
    %c0_i32_1 = arith.constant 0 : i32
    return %arg0, %c0_i32, %c0_i32_0 : i32, i32, i32
  }
  func.func @transform_4(%arg0: i32) -> (i32, i32) {
    %c0_i32 = arith.constant 0 : i32
    %c0_i32_0 = arith.constant 0 : i32
    %c0_i32_1 = arith.constant 0 : i32
    return %c0_i32, %c0_i32_0 : i32, i32
  }
  func.func @transform_5(%arg0: i32) -> (i32, i32) {
    %c0_i32 = arith.constant 0 : i32
    %c0_i32_0 = arith.constant 0 : i32
    %c0_i32_1 = arith.constant 0 : i32
    return %c0_i32, %c0_i32_0 : i32, i32
  }
  func.func @transform_6(%arg0: i32) -> (i32, i32) {
    %c0_i32 = arith.constant 0 : i32
    %c0_i32_0 = arith.constant 0 : i32
    %c0_i32_1 = arith.constant 0 : i32
    return %c0_i32, %c0_i32_0 : i32, i32
  }
  func.func @transform_7(%arg0: i32) -> (i32, i32) {
    %c0_i32 = arith.constant 0 : i32
    %c0_i32_0 = arith.constant 0 : i32
    %c0_i32_1 = arith.constant 0 : i32
    return %c0_i32, %c0_i32_0 : i32, i32
  }
  func.func @transform_8(%arg0: i32) -> (i32, i32) {
    %c0_i32 = arith.constant 0 : i32
    %c0_i32_0 = arith.constant 0 : i32
    %c0_i32_1 = arith.constant 0 : i32
    return %c0_i32, %c0_i32_0 : i32, i32
  }
  func.func @transform_9(%arg0: i32) -> (i32, i32) {
    %c0_i32 = arith.constant 0 : i32
    %c0_i32_0 = arith.constant 0 : i32
    %c0_i32_1 = arith.constant 0 : i32
    return %c0_i32, %c0_i32_0 : i32, i32
  }
  func.func @transform_10(%arg0: i32) -> (i32, i32) {
    %c0_i32 = arith.constant 0 : i32
    %c0_i32_0 = arith.constant 0 : i32
    %c0_i32_1 = arith.constant 0 : i32
    return %c0_i32, %c0_i32_0 : i32, i32
  }
  func.func @transform_11(%arg0: i32) -> (i32, i32) {
    %c0_i32 = arith.constant 0 : i32
    %c0_i32_0 = arith.constant 0 : i32
    %c0_i32_1 = arith.constant 0 : i32
    return %c0_i32, %c0_i32_0 : i32, i32
  }
  func.func @transform_12(%arg0: i32) -> (i32, i32) {
    %c0_i32 = arith.constant 0 : i32
    %c0_i32_0 = arith.constant 0 : i32
    %c0_i32_1 = arith.constant 0 : i32
    return %c0_i32, %c0_i32_0 : i32, i32
  }
  func.func @transform_13(%arg0: i32) -> (i32, i32) {
    %c0_i32 = arith.constant 0 : i32
    %c0_i32_0 = arith.constant 0 : i32
    %c0_i32_1 = arith.constant 0 : i32
    return %c0_i32, %c0_i32_0 : i32, i32
  }
  func.func @transform_14(%arg0: i32) -> (i32, i32) {
    %c0_i32 = arith.constant 0 : i32
    %c0_i32_0 = arith.constant 0 : i32
    %c0_i32_1 = arith.constant 0 : i32
    return %c0_i32, %c0_i32_0 : i32, i32
  }
  func.func @transform_15(%arg0: i32) -> (i32, i32) {
    %c0_i32 = arith.constant 0 : i32
    %c0_i32_0 = arith.constant 0 : i32
    %c0_i32_1 = arith.constant 0 : i32
    return %c0_i32, %c0_i32_0 : i32, i32
  }
  func.func @transform_16(%arg0: i32) -> (i32, i32, i32) {
    %c0_i32 = arith.constant 0 : i32
    %c0_i32_0 = arith.constant 0 : i32
    %c0_i32_1 = arith.constant 0 : i32
    return %arg0, %c0_i32, %c0_i32_0 : i32, i32, i32
  }
}

</mosaic_0001>

<bundles_post_ra>
// kernel: detr_forward.6
= control target key start
LH: loop header
LB: loop body
LE: loop exit
PB: predicated region body
PF: predicated region fallthrough
CT: control target
= control target key end

     0   :  { %vm143_vm0 = vcmask 523264   ;;  %vm259_vm1 = vcmask 257024   ;;  %s506_s1 = inlined_call_operand.vmem [shape: bf16[192,64], index: 1, kind: input, shape index: {}]   ;;  %s507_s0 = inlined_call_operand.vmem [shape: bf16[32,192], index: 0, kind: input, shape index: {}]   ;;  %s508_s2 = inlined_call_operand.vmem [shape: f32[1,64], index: 2, kind: input, shape index: {}]   ;;  %s509_s4 = inlined_call_operand.vmem [shape: f32[1,32], index: 4, kind: input, shape index: {}]   ;;  %s510_s3 = inlined_call_operand.vmem [shape: bf16[64,32], index: 3, kind: input, shape index: {}]   ;;  %s511_s5 = inlined_call_operand.vmem [shape: bf16[32,32], index: 5, kind: output, shape index: {}]  }
   0x1   :  { %v363_v0 = vld [vmem:[%s506_s1 + $0x38] sm:$0xff]  ;;  %v362_v2 = vld [vmem:[%s506_s1 + $0x30] sm:$0xff]  ;;  %v361_v4 = vld [vmem:[%s506_s1 + $0x28] sm:$0xff] }
   0x2   :  { %v367_v1 = vld [vmem:[%s506_s1 + $0x58] sm:$0xff]  ;;  %150 = vmatpush.bf16.msra.mxu0 %v363_v0  ;;  %372 = vmatpush.bf16.msra.mxu3 %v363_v0  ;;  %v366_v3 = vld [vmem:[%s506_s1 + $0x50] sm:$0xff]  ;;  %v365_v5 = vld [vmem:[%s506_s1 + $0x48] sm:$0xff] }
   0x3   :  { %173 = vmatpush.bf16.msra.mxu1 %v367_v1  ;;  %v360_v6 = vld [vmem:[%s506_s1 + $0x20] sm:$0xff]  ;;  %v272_v9 = vld [vmem:[%s507_s0 + $0x8] sm:$0xf0]  ;;  %v359_v10 = vld [vmem:[%s506_s1 + $0x18] sm:$0xff] }
   0x4   :  { %v364_v7 = vld [vmem:[%s506_s1 + $0x40] sm:$0xff]  ;;  %v358_v12 = vld [vmem:[%s506_s1 + $0x10] sm:$0xff]  ;;  %v357_v13 = vld [vmem:[%s506_s1 + $0x8] sm:$0xff] }
   0x5   :  { %v352_v8 = vld [vmem:[%s507_s0 + $0x4] sm:$0xf]  ;;  %v270_v15 = vld [vmem:[%s507_s0] sm:$0xf]  ;;  %v353_v16 = vld [vmem:[%s507_s0 + $0x4] sm:$0xf0] }
   0x6   :  { %151 = vmatpush.bf16.msra.mxu0 %v362_v2  ;;  %373 = vmatpush.bf16.msra.mxu3 %v362_v2  ;;  %v275_v11 = vor.u32 %v352_v8, %v272_v9  ;;  %v356_v14 = vld [vmem:[%s506_s1] sm:$0xff]  ;;  %v278_v17 = vld [vmem:[%s507_s0 + $0x10] sm:$0xf]  ;;  %v355_v18 = vld [vmem:[%s507_s0 + $0x14] sm:$0xf0]  ;;  %v271_v21 = vor.u32 %v353_v16, %v270_v15 }
   0x7   :  { %174 = vmatpush.bf16.msra.mxu1 %v366_v3  ;;  %v354_v19 = vld [vmem:[%s507_s0 + $0x14] sm:$0xf]  ;;  %v280_v20 = vld [vmem:[%s507_s0 + $0x18] sm:$0xf0]  ;;  %v279_v22 = vor.u32 %v355_v18, %v278_v17  ;;  %v369_v26 = vld [vmem:[%s510_s3 + $0x8] sm:$0xff] }
   0x8   :  { %v283_v23 = vor.u32 %v354_v19, %v280_v20  ;;  %v371_v24 = vld [vmem:[%s510_s3 + $0x18] sm:$0xff]  ;;  %v370_v25 = vld [vmem:[%s510_s3 + $0x10] sm:$0xff]  ;;  %v368_v27 = vld [vmem:[%s510_s3] sm:$0xff] }
   0x9   :  { %240 = vmatpush.bf16.msra.mxu2 %v371_v24  ;;  %v380_v31 = vld [vmem:[%s508_s2] ss:$0 sm:$0xff] }
   0xa   :  { %152 = vmatpush.bf16.msra.mxu0 %v361_v4  ;;  %374 = vmatpush.bf16.msra.mxu3 %v361_v4  ;;  %v381_v51 = vld [vmem:[%s509_s4] ss:$0 sm:$0xff] }
   0xb   :  { %175 = vmatpush.bf16.msra.mxu1 %v365_v5 }
   0xd   :  { %241 = vmatpush.bf16.msra.mxu2 %v370_v25 }
   0xe   :  { %153 = vmatpush.bf16.msra.mxu0 %v360_v6  ;;  %375 = vmatpush.bf16.msra.mxu3 %v360_v6 }
   0xf   :  { %176 = vmatpush.bf16.msra.mxu1 %v364_v7 }
  0x11   :  { %242 = vmatpush.bf16.msra.mxu2 %v369_v26 }
  0x12   :  { %154 = vmatpush.bf16.msra.mxu0 %v359_v10  ;;  %376 = vmatpush.bf16.msra.mxu3 %v359_v10 }
  0x13   :  { %332 = vmatmul.msk.bf16.vlgmr.msra.gmra.mxu1 %vm143_vm0, %v275_v11 }
  0x15   :  { %243 = vmatpush.bf16.msra.mxu2 %v368_v27 }
  0x16   :  { %155 = vmatpush.bf16.msra.mxu0 %v358_v12  ;;  %377 = vmatpush.bf16.msra.mxu3 %v358_v12 }
  0x1a   :  { %156 = vmatpush.bf16.msra.mxu0 %v357_v13  ;;  %378 = vmatpush.bf16.msra.mxu3 %v357_v13 }
  0x1e   :  { %157 = vmatpush.bf16.msra.mxu0 %v356_v14  ;;  %379 = vmatpush.bf16.msra.mxu3 %v356_v14 }
  0x21   :  { %158 = vmatmul.bf16.vlgmr.msra.gmra.mxu0 %v271_v21  ;;  %163 = vmatmul.bf16.vlgmr.msra.gmra.mxu3 %v279_v22 }
  0x23   :  { %333 = vmatmul.msk.bf16.gmra.mxu1 %vm143_vm0, %v283_v23 }
  0x90   :  { %v178_v28 = vpop.f32.mrf.mxu1 }
  0x98   :  { %v180_v30 = vpop.f32.mrf.mxu1 }
  0x9e   :  { %v159_v29 = vpop.f32.mrf.mxu0 }
  0x9f   :  { %v160_v32 = vadd.f32 %v380_v31, %v159_v29 }
  0xa0   :  { %v183_v37 = vpop.f32.mrf.mxu1 }
  0xa1   :  { %v179_v35 = vadd.f32 %v178_v28, %v160_v32 }
  0xa3   :  { %v188_v39 = vmax.f32 %v179_v35, 0.0 }
  0xa4   :  { %v164_v33 = vpop.f32.mrf.mxu3 }
  0xa5   :  { %v165_v43 = vadd.f32 %v380_v31, %v164_v33 }
  0xa6   :  { %v161_v34 = vpop.f32.mrf.mxu0 }
  0xa7   :  { %v162_v36 = vadd.f32 %v380_v31, %v161_v34  ;;  %v184_v46 = vadd.f32 %v183_v37, %v165_v43 }
  0xa8   :  { %v185_v45 = vpop.f32.mrf.mxu1 }
  0xa9   :  { %v181_v38 = vadd.f32 %v180_v30, %v162_v36  ;;  %v190_v48 = vmax.f32 %v184_v46, 0.0 }
  0xab   :  { %v189_v40 = vmax.f32 %v181_v38, 0.0 }
  0xac   :  { %v166_v42 = vpop.f32.mrf.mxu3 }
  0xad   :  { %v192_v41 = vpack.c.bf16 %v189_v40, %v188_v39  ;;  %v167_v44 = vadd.f32 %v380_v31, %v166_v42 }
  0xaf   :  { %350 = vmatmul.msk.bf16.vlgmr.msra.gmra.mxu2 %vm143_vm0, %v192_v41  ;;  %v186_v47 = vadd.f32 %v185_v45, %v167_v44 }
  0xb1   :  { %v191_v49 = vmax.f32 %v186_v47, 0.0 }
  0xb3   :  { %v193_v50 = vpack.c.bf16 %v191_v49, %v190_v48 }
  0xbf   :  { %351 = vmatmul.msk.bf16.gmra.mxu2 %vm143_vm0, %v193_v50 }
 0x132   :  { %v245_v52 = vpop.f32.mrf.mxu2 }
 0x133   :  { %v246_v53 = vadd.f32 %v381_v51, %v245_v52 }
 0x135   :  { %v255_v54 = vpack.c.bf16 %v246_v53, %v246_v53 }
 0x137   :  { %260 = vst.msk [vmem:[%s511_s5] sm:$0xf] %vm259_vm1, %v255_v54 }
 0x13a   :  { %v247_v55 = vpop.f32.mrf.mxu2 }
 0x13b   :  { %v248_v56 = vadd.f32 %v381_v51, %v247_v55 }
 0x13d   :  { %v256_v57 = vpack.c.bf16 %v248_v56, %v248_v56 }
 0x13f   :  { %261 = vst.msk [vmem:[%s511_s5 + $0x4] sm:$0xf] %vm259_vm1, %v256_v57 }
 0x142   :  { %v250_v58 = vpop.f32.mrf.mxu2 }
 0x143   :  { %v251_v59 = vadd.f32 %v381_v51, %v250_v58 }
 0x145   :  { %v257_v60 = vpack.c.bf16 %v251_v59, %v251_v59 }
 0x147   :  { %262 = vst.msk [vmem:[%s511_s5 + $0x8] sm:$0xf] %vm259_vm1, %v257_v60 }
 0x14a   :  { %v252_v61 = vpop.f32.mrf.mxu2 }
 0x14b   :  { %v253_v62 = vadd.f32 %v381_v51, %v252_v61 }
 0x14d   :  { %v258_v63 = vpack.c.bf16 %v253_v62, %v253_v62 }
 0x14f   :  { %263 = vst.msk [vmem:[%s511_s5 + $0xc] sm:$0xf] %vm259_vm1, %v258_v63 }

// kernel: detr_forward.11
= control target key start
LH: loop header
LB: loop body
LE: loop exit
PB: predicated region body
PF: predicated region fallthrough
CT: control target
= control target key end

     0   :  { %17 = vsyncpa [#allocation3], 0  ;;  %s620_s0 = inlined_call_operand.vmem [shape: bf16[16,32], index: 0, kind: input, shape index: {}]   ;;  %s621_s1 = inlined_call_operand.vmem [shape: f32[2,32], index: 1, kind: input, shape index: {}]   ;;  %s622_s2 = inlined_call_operand.vmem [shape: bf16[32,128], index: 2, kind: input, shape index: {}]   ;;  %s623_s3 = inlined_call_operand.vmem [shape: f32[1,128], index: 3, kind: input, shape index: {}]   ;;  %s624_s4 = inlined_call_operand.vmem [shape: bf16[32,32], index: 4, kind: input, shape index: {}]   ;;  %s625_s5 = inlined_call_operand.hbm [shape: f32[1,32], index: 5, kind: input, shape index: {}]   ;;  %s626_s6 = inlined_call_operand.vmem [shape: bf16[32,32], index: 6, kind: input, shape index: {}]   ;;  %s627_s7 = inlined_call_operand.hbm [shape: f32[1,32], index: 7, kind: input, shape index: {}]   ;;  %s628_s8 = inlined_call_operand.vmem [shape: bf16[32,128], index: 8, kind: input, shape index: {}]   ;;  %s629_s9 = inlined_call_operand.hbm [shape: f32[1,128], index: 9, kind: input, shape index: {}]   ;;  %s630_s10 = inlined_call_operand.vmem [shape: f32[16,128], index: 10, kind: output, shape index: {0}]   ;;  %s631_s11 = inlined_call_operand.vmem [shape: f32[16,128], index: 11, kind: output, shape index: {1}]  }
   0x1   :  { %18 = vsyncpa [#allocation5], 0  ;;  %s47_s19 = sshll.u32 %s627_s7, 4  ;;  %s494_s20 = smov [#allocation4]   ;;  %s48_s19 = int_to_ptr.hbm [resolvable:$true] %s47_s19 }
   0x2   :  { %s49_s21 = sshll.u32 %s494_s20, 4  ;;  %s34_s24 = sshll.u32 %s625_s5, 4  ;;  %s50_s21 = int_to_ptr.vmem [resolvable:$true] %s49_s21  ;;  %s35_s24 = int_to_ptr.hbm [resolvable:$true] %s34_s24 }
   0x3   :  { %52 = dma.hbm_to_vmem [thread:$0]  %s48_s19, 16, %s50_s21, [#allocation5]  }
   0x4   :  { %s495_s25 = smov [#allocation2]   ;;  %s60_s29 = sshll.u32 %s629_s9, 4  ;;  %s61_s29 = int_to_ptr.hbm [resolvable:$true] %s60_s29 }
   0x5   :  { %s36_s26 = sshll.u32 %s495_s25, 4  ;;  %s496_s7 = smov [#allocation6]   ;;  %s37_s26 = int_to_ptr.vmem [resolvable:$true] %s36_s26 }
   0x6   :  { %39 = dma.hbm_to_vmem [thread:$0]  %s35_s24, 16, %s37_s26, [#allocation3]  }
   0x7   :  { %s62_s30 = sshll.u32 %s496_s7, 4  ;;  %s63_s30 = int_to_ptr.vmem [resolvable:$true] %s62_s30 }
   0x8   :  { %65 = dma.hbm_to_vmem [thread:$0]  %s61_s29, 16, %s63_s30, [#allocation5]  }
   0x9   :  { %490 = dma.done.wait [#allocation3], 16  }
   0xa   :  { %491 = vsyncadd [#allocation3], 4294967280 }
   0xb   :  { %492 = dma.done.wait [#allocation5], 32  }
   0xc   :  { %493 = vsyncadd [#allocation5], 4294967264  ;;  %v393_v0 = vld [vmem:[%s620_s0] sm:$0xff]   ;;  %vm84_vm0 = vcmask 261120   ;;  %v497_v5 = vmov 32.0   ;;  %v385_v22 = vld [vmem:[%s622_s2 + $0x8] sm:$0xff] }
   0xd   :  { %v394_v1 = vunpack.c.l.bf16 %v393_v0  ;;  %v395_v3 = vunpack.c.h.bf16 %v393_v0  ;;  %404 = vrcp.f32 %v497_v5  ;;  %v387_v23 = vld [vmem:[%s624_s4 + $0x8] sm:$0xff]  ;;  %172 = vmatpush.bf16.msra.mxu0 %v385_v22  ;;  %v384_v25 = vld [vmem:[%s622_s2] sm:$0xff] }
   0xe   :  { %208 = vmatpush.bf16.msra.mxu1 %v387_v23  ;;  %v386_v26 = vld [vmem:[%s624_s4] sm:$0xff]  ;;  %v389_v56 = vld [vmem:[%s626_s6 + $0x8] sm:$0xff] }
   0xf   :  { %v85_v2 = vsel %vm84_vm0, %v394_v1, 0.0  ;;  %v88_v4 = vsel %vm84_vm0, %v395_v3, 0.0  ;;  %v83_v43 = vld [vmem:[%s621_s1] sm:$0x3]  ;;  %248 = vmatpush.bf16.msra.mxu2 %v389_v56 }
  0x10   :  { %86 = vadd.xlane.f32.xlu0 %v85_v2  ;;  %v136_v46 = vperm.slane %v83_v43, 0  ;;  %v139_v51 = vperm.slane %v83_v43, 1  ;;  %v388_v57 = vld [vmem:[%s626_s6] sm:$0xff] }
  0x11   :  { %173 = vmatpush.bf16.msra.mxu0 %v384_v25  ;;  %v400_v58 = vld [vmem:[%s623_s3] ss:$0 sm:$0xff] }
  0x12   :  { %209 = vmatpush.bf16.msra.mxu1 %v386_v26  ;;  %v401_v62 = vld [vmem:[#allocation2] ss:$0 sm:$0xff] }
  0x13   :  { %v405_v6 = vpop.eup %404  ;;  %249 = vmatpush.bf16.msra.mxu2 %v388_v57 }
  0x14   :  { %v92_v7 = vmul.f32 32.0, %v405_v6  ;;  %vm96_vm1 = vweird.f32 %v405_v6 }
  0x16   :  { %v93_v8 = vsub.f32 1.0, %v92_v7  ;;  %v391_v7 = vld [vmem:[%s628_s8 + $0x8] sm:$0xff] }
  0x17   :  { %288 = vmatpush.bf16.msra.mxu3 %v391_v7 }
  0x18   :  { %89 = vadd.xlane.f32.xlu0 %v88_v4  ;;  %v94_v9 = vmul.f32 %v405_v6, %v93_v8  ;;  %v390_v8 = vld [vmem:[%s628_s8] sm:$0xff] }
  0x1a   :  { %v95_v10 = vadd.f32 %v405_v6, %v94_v9 }
  0x1b   :  { %289 = vmatpush.bf16.msra.mxu3 %v390_v8 }
  0x1c   :  { %v97_v11 = vsel %vm96_vm1, %v405_v6, %v95_v10  ;;  %v402_v10 = vld [vmem:[#allocation4] ss:$0 sm:$0xff] }
  0x83   :  { %v87_v12 = vpop.xlane.xlu0 %86 }
  0x84   :  { %v98_v13 = vmul.f32 %v97_v11, %v87_v12 }
  0x86   :  { %v100_v14 = vsub.f32 %v394_v1, %v98_v13 }
  0x88   :  { %v102_v15 = vmul.f32 %v100_v14, %v100_v14 }
  0x8a   :  { %v104_v16 = vsel %vm84_vm0, %v102_v15, 0.0 }
  0x8b   :  { %105 = vadd.xlane.f32.xlu1 %v104_v16  ;;  %v90_v17 = vpop.xlane.xlu0 %89 }
  0x8c   :  { %v99_v18 = vmul.f32 %v97_v11, %v90_v17  ;;  %v403_v17 = vld [vmem:[#allocation6] ss:$0 sm:$0xff] }
  0x8e   :  { %v101_v19 = vsub.f32 %v395_v3, %v99_v18 }
  0x90   :  { %v103_v20 = vmul.f32 %v101_v19, %v101_v19 }
  0x92   :  { %v107_v21 = vsel %vm84_vm0, %v103_v20, 0.0 }
  0x93   :  { %108 = vadd.xlane.f32.xlu1 %v107_v21 }
  0xfe   :  { %v106_v24 = vpop.xlane.xlu1 %105 }
  0xff   :  { %v110_v27 = vmul.f32 %v106_v24, %v97_v11 }
 0x101   :  { %v112_v28 = vadd.f32 1e-05, %v110_v27 }
 0x103   :  { %406 = vrsqrt.f32 %v112_v28  ;;  %vm120_vm3 = vweird.f32 %v112_v28 }
 0x106   :  { %v109_v29 = vpop.xlane.xlu1 %108 }
 0x107   :  { %v111_v30 = vmul.f32 %v109_v29, %v97_v11 }
 0x109   :  { %v407_v31 = vpop.eup %406  ;;  %v113_v32 = vadd.f32 1e-05, %v111_v30 }
 0x10a   :  { %v115_v33 = vmul.f32 %v407_v31, %v112_v28  ;;  %vm121_vm2 = vweird.f32 %v407_v31 }
 0x10b   :  { %408 = vrsqrt.f32 %v113_v32  ;;  %vm122_vm4 = vmor %vm120_vm3, %vm121_vm2  ;;  %vm130_vm6 = vweird.f32 %v113_v32 }
 0x10c   :  { %v116_v34 = vmul.f32 %v407_v31, %v115_v33 }
 0x10e   :  { %v117_v35 = vmul.f32 0.5, %v116_v34 }
 0x110   :  { %v118_v36 = vsub.f32 1.5, %v117_v35 }
 0x111   :  { %v409_v37 = vpop.eup %408 }
 0x112   :  { %v119_v38 = vmul.f32 %v407_v31, %v118_v36  ;;  %v125_v39 = vmul.f32 %v409_v37, %v113_v32  ;;  %vm131_vm5 = vweird.f32 %v409_v37 }
 0x113   :  { %vm132_vm7 = vmor %vm130_vm6, %vm131_vm5 }
 0x114   :  { %v126_v40 = vmul.f32 %v409_v37, %v125_v39  ;;  %v123_v41 = vsel %vm122_vm4, %v407_v31, %v119_v38 }
 0x115   :  { %v134_v45 = vmul.f32 %v123_v41, %v100_v14 }
 0x116   :  { %v127_v42 = vmul.f32 0.5, %v126_v40 }
 0x117   :  { %v137_v50 = vmul.f32 %v136_v46, %v134_v45 }
 0x118   :  { %v128_v44 = vsub.f32 1.5, %v127_v42 }
 0x119   :  { %v140_v53 = vadd.f32 %v139_v51, %v137_v50 }
 0x11a   :  { %v129_v47 = vmul.f32 %v409_v37, %v128_v44 }
 0x11c   :  { %v133_v48 = vsel %vm132_vm7, %v409_v37, %v129_v47 }
 0x11d   :  { %v135_v49 = vmul.f32 %v133_v48, %v101_v19 }
 0x11f   :  { %v138_v52 = vmul.f32 %v136_v46, %v135_v49 }
 0x121   :  { %v141_v54 = vadd.f32 %v139_v51, %v138_v52 }
 0x123   :  { %v142_v55 = vpack.c.bf16 %v141_v54, %v140_v53 }
 0x125   :  { %354 = vmatmul.msk.bf16.vlgmr.msra.gmra.mxu0 %vm84_vm0, %v142_v55  ;;  %363 = vmatmul.msk.bf16.vlgmr.msra.gmra.mxu1 %vm84_vm0, %v142_v55 }
 0x1a2   :  { %v175_v59 = vpop.f32.mrf.mxu0  ;;  %v211_v60 = vpop.f32.mrf.mxu1 }
 0x1a3   :  { %v176_v61 = vadd.f32 %v400_v58, %v175_v59  ;;  %v212_v63 = vadd.f32 %v401_v62, %v211_v60 }
 0x1a5   :  { %180 = vst [vmem:[%s630_s10] sm:$0xff] %v176_v61  ;;  %v216_v4 = vmax.f32 %v212_v63, 0.0 }
 0x1aa   :  { %v177_v0 = vpop.f32.mrf.mxu0  ;;  %v213_v1 = vpop.f32.mrf.mxu1 }
 0x1ab   :  { %v178_v2 = vadd.f32 %v400_v58, %v177_v0  ;;  %v214_v3 = vadd.f32 %v401_v62, %v213_v1 }
 0x1ad   :  { %181 = vst [vmem:[%s630_s10 + $0x8] sm:$0xff] %v178_v2  ;;  %v217_v5 = vmax.f32 %v214_v3, 0.0 }
 0x1af   :  { %v218_v6 = vpack.c.bf16 %v217_v5, %v216_v4 }
 0x1b1   :  { %372 = vmatmul.msk.bf16.vlgmr.msra.gmra.mxu2 %vm84_vm0, %v218_v6 }
 0x234   :  { %v251_v9 = vpop.f32.mrf.mxu2 }
 0x235   :  { %v252_v11 = vadd.f32 %v402_v10, %v251_v9 }
 0x237   :  { %v256_v14 = vmax.f32 %v252_v11, 0.0 }
 0x23c   :  { %v253_v12 = vpop.f32.mrf.mxu2 }
 0x23d   :  { %v254_v13 = vadd.f32 %v402_v10, %v253_v12 }
 0x23f   :  { %v257_v15 = vmax.f32 %v254_v13, 0.0 }
 0x241   :  { %v258_v16 = vpack.c.bf16 %v257_v15, %v256_v14 }
 0x243   :  { %381 = vmatmul.msk.bf16.vlgmr.msra.gmra.mxu3 %vm84_vm0, %v258_v16 }
 0x2c6   :  { %v291_v18 = vpop.f32.mrf.mxu3 }
 0x2c7   :  { %v292_v19 = vadd.f32 %v403_v17, %v291_v18 }
 0x2c9   :  { %v382_v20 = vmul.f32 -1.442695, %v292_v19 }
 0x2cb   :  { %410 = vpow2.f32 %v382_v20 }
 0x2ce   :  { %v293_v21 = vpop.f32.mrf.mxu3 }
 0x2cf   :  { %v294_v22 = vadd.f32 %v403_v17, %v293_v21 }
 0x2d1   :  { %v411_v23 = vpop.eup %410  ;;  %v383_v24 = vmul.f32 -1.442695, %v294_v22 }
 0x2d2   :  { %v302_v25 = vadd.f32 1.0, %v411_v23 }
 0x2d3   :  { %412 = vpow2.f32 %v383_v24 }
 0x2d4   :  { %414 = vrcp.f32 %v302_v25  ;;  %v315_v31 = vand.u32 2147483648, %v302_v25  ;;  %v313_v33 = vand.u32 2147483647, %v302_v25  ;;  %vm309_vm9 = vweird.f32 %v302_v25 }
 0x2d6   :  { %v316_v36 = vor.u32 1.1754944e-38, %v315_v31  ;;  %vm314_vm11 = vcmp.eq.f32.partialorder %v313_v33, 8.507059e+37 }
 0x2d9   :  { %v413_v26 = vpop.eup %412 }
 0x2da   :  { %v415_v27 = vpop.eup %414  ;;  %v303_v28 = vadd.f32 1.0, %v413_v26 }
 0x2db   :  { %v305_v29 = vmul.f32 %v415_v27, %v302_v25  ;;  %vm310_vm8 = vweird.f32 %v415_v27 }
 0x2dc   :  { %416 = vrcp.f32 %v303_v28  ;;  %vm311_vm10 = vmor %vm309_vm9, %vm310_vm8  ;;  %v330_v41 = vand.u32 2147483648, %v303_v28  ;;  %v328_v43 = vand.u32 2147483647, %v303_v28  ;;  %vm324_vm13 = vweird.f32 %v303_v28 }
 0x2dd   :  { %v306_v30 = vsub.f32 1.0, %v305_v29 }
 0x2de   :  { %v331_v45 = vor.u32 1.1754944e-38, %v330_v41  ;;  %vm329_vm15 = vcmp.eq.f32.partialorder %v328_v43, 8.507059e+37 }
 0x2df   :  { %v307_v32 = vmul.f32 %v415_v27, %v306_v30 }
 0x2e1   :  { %v308_v34 = vadd.f32 %v415_v27, %v307_v32 }
 0x2e2   :  { %v417_v35 = vpop.eup %416 }
 0x2e3   :  { %v312_v37 = vsel %vm311_vm10, %v415_v27, %v308_v34  ;;  %v320_v38 = vmul.f32 %v417_v35, %v303_v28  ;;  %vm325_vm12 = vweird.f32 %v417_v35 }
 0x2e4   :  { %v317_v39 = vsel %vm314_vm11, %v316_v36, %v312_v37  ;;  %vm326_vm14 = vmor %vm324_vm13, %vm325_vm12 }
 0x2e5   :  { %334 = vst [vmem:[%s631_s11] sm:$0xff] %v317_v39  ;;  %v321_v40 = vsub.f32 1.0, %v320_v38 }
 0x2e7   :  { %v322_v42 = vmul.f32 %v417_v35, %v321_v40 }
 0x2e9   :  { %v323_v44 = vadd.f32 %v417_v35, %v322_v42 }
 0x2eb   :  { %v327_v46 = vsel %vm326_vm14, %v417_v35, %v323_v44 }
 0x2ec   :  { %v332_v47 = vsel %vm329_vm15, %v331_v45, %v327_v46 }
 0x2ed   :  { %335 = vst [vmem:[%s631_s11 + $0x8] sm:$0xff] %v332_v47 }
 0x2ee   :  { %344 = vsyncpa [#allocation3], 1 }
 0x2ef   :  { %345 = vsyncpa [#allocation5], 1 }

// kernel: detr_forward.7
= control target key start
LH: loop header
LB: loop body
LE: loop exit
PB: predicated region body
PF: predicated region fallthrough
CT: control target
= control target key end

     0   :  { %s1353_s13 = smov 0   ;;  %s1544_s0 = inlined_call_operand.vmem [shape: bf16[2,16,32], index: 0, kind: input, shape index: {}]   ;;  %s1545_s1 = inlined_call_operand.vmem [shape: bf16[2,16,32], index: 1, kind: input, shape index: {}]   ;;  %s1546_s2 = inlined_call_operand.vmem [shape: bf16[32,96], index: 2, kind: input, shape index: {}]   ;;  %s1547_s3 = inlined_call_operand.vmem [shape: f32[1,96], index: 3, kind: input, shape index: {}]   ;;  %s1548_s4 = inlined_call_operand.vmem [shape: bf16[32,32], index: 4, kind: input, shape index: {}]   ;;  %s1549_s5 = inlined_call_operand.vmem [shape: f32[3,32], index: 5, kind: input, shape index: {}]   ;;  %s1550_s6 = inlined_call_operand.vmem [shape: bf16[32,64], index: 6, kind: input, shape index: {}]   ;;  %s1551_s7 = inlined_call_operand.vmem [shape: f32[1,64], index: 7, kind: input, shape index: {}]   ;;  %s1552_s8 = inlined_call_operand.vmem [shape: bf16[64,32], index: 8, kind: input, shape index: {}]   ;;  %s1553_s9 = inlined_call_operand.vmem [shape: f32[3,32], index: 9, kind: input, shape index: {}]   ;;  %s1554_s10 = inlined_call_operand.vmem [shape: bf16[2,16,32], index: 10, kind: output, shape index: {}]  }
   0x1 LB: > { %s1144_s14 = sadd.s32 4294967295, %s1290_s13   ;;  %p1148_p0 = scmp.ge.s32.totalorder %s1290_s13, 1  ;;  %s1290_s13 = sphi %s1353_s13, %s20_s13  }
   0x2   : > { %p322_p1 = scmp.lt.s32.totalorder %s1290_s13, 3 }
   0x4   : > { %p323_p2 = pnand %p1148_p0, %p322_p1 }
   0x5   : > { %s1292_s17 = smov (!%p323_p2), 96   ;;  %p365_p3 = scmp.lt.s32.totalorder (!%p323_p2), %s1144_s14, 1 }
   0x6   : > { %326 = sbr.rel (%p323_p2) target bundleno = 2341 (0x925), region = 60  ;;  %s1293_s29 = smov (!%p323_p2), 64  }
   0x7   : > { %s1294_s30 = smov (!%p323_p2), 120   ;;  %s1295_s11 = smov (!%p323_p2), 112  }
   0x8   : > { %s1296_s12 = smov (!%p323_p2), 104  }
   0xb   : > { %v1215_v0 = vld [vmem:[%s1546_s2 + $0x8] sm:$0xff]  ;;  %v1214_v1 = vld [vmem:[%s1546_s2] sm:$0xff]  ;;  %s1556_s14 = smov (!%p365_p3, %s1144_s14), 1  ;;  %vm417_vm0 = vcmask 261120   ;;  %vm507_vm1 = vcmask 64512   ;;  %vm528_vm2 = vcmask 130048  }
   0xc   : > { %439 = vrot.lane.b32.xlu0 %v1215_v0, %s1292_s17  ;;  %427 = vmatpush.bf16.msra.mxu0 %v1215_v0  ;;  %s1367_s20 = sshll.u32 %s1556_s14, 3  ;;  %v1392_v11 = vld [vmem:[%s1547_s3] ss:$0 sm:$0xff]  ;;  %vm647_vm3 = vcmask 1043456   ;;  %vm1002_vm11 = vcmask 523264  }
   0xd   : > { %s1373_s23 = scalar_lea.vmem %s1544_s0, %s1367_s20  ;;  %s374_s26 = scalar_lea.vmem %s1545_s1, %s1367_s20  ;;  %443 = vrot.lane.b32.xlu1 %v1392_v11, %s1292_s17  ;;  %465 = vrot.lane.b32.xlu2 %v1214_v1, %s1293_s29 }
   0xe   : > { %v1380_v2 = vld [vmem:[%s1373_s23] sm:$0xff]   ;;  %s379_s25 = scalar_lea.vmem %s1554_s10, %s1367_s20 }
   0xf   : > { %v1223_v3 = vld [vmem:[%s374_s26] sm:$0xff]   ;;  %v395_v6 = vunpack.c.l.bf16 %v1380_v2  ;;  %v396_v7 = vunpack.c.h.bf16 %v1380_v2 }
  0x10   : > { %428 = vmatpush.bf16.msra.mxu0 %v1214_v1  ;;  %v1224_v4 = vunpack.c.l.bf16 %v1223_v3  ;;  %v1225_v5 = vunpack.c.h.bf16 %v1223_v3  ;;  %v1213_v42 = vld [vmem:[%s1373_s23] sm:$0xff] }
  0x12   : > { %v399_v8 = vadd.f32 %v1224_v4, %v395_v6  ;;  %v400_v9 = vadd.f32 %v1225_v5, %v396_v7  ;;  %v391_v4 = vld [vmem:[%s1548_s4] sm:$0xf] }
  0x14   : > { %437 = vrot.lane.b32.xlu0 %v1214_v1, %s1292_s17  ;;  %v401_v10 = vpack.c.bf16 %v400_v9, %v399_v8 }
  0x15   : > { %467 = vrot.lane.b32.xlu1 %v1215_v0, %s1293_s29 }
  0x16   : > { %1163 = vmatmul.msk.bf16.vlgmr.msra.gmra.mxu0 %vm417_vm0, %v401_v10 }
  0x67   : > { %v466_v41 = vpop.permute.xlu2 %465 }
  0x7e   : > { %v440_v12 = vpop.permute.xlu0 %439 }
  0x7f   : > { %452 = vmatpush.bf16.msra.mxu1 %v440_v12  ;;  %v444_v16 = vpop.permute.xlu1 %443  ;;  %v669_v12 = vsel %vm647_vm3, %v391_v4, 0 }
  0x86   : > { %v438_v13 = vpop.permute.xlu0 %437 }
  0x87   : > { %453 = vmatpush.bf16.msra.mxu1 %v438_v13  ;;  %v468_v40 = vpop.permute.xlu1 %467 }
  0x88   : > { %483 = vmatpush.bf16.msra.mxu2 %v468_v40 }
  0x8a   : > { %1164 = vmatmul.msk.bf16.vlgmr.msra.gmra.mxu1 %vm417_vm0, %v401_v10 }
  0x8c   : > { %484 = vmatpush.bf16.msra.mxu2 %v466_v41 }
  0x8f   : > { %1169 = vmatmul.msk.bf16.vlgmr.msra.gmra.mxu2 %vm417_vm0, %v1213_v42 }
  0x93   : > { %v430_v14 = vpop.f32.mrf.mxu0 }
  0x94   : > { %v431_v19 = vadd.f32 %v1392_v11, %v430_v14 }
  0x96   : > { %v435_v24 = vmul.f32 0.35355338, %v431_v19 }
  0x98   : > { %v491_v29 = vpack.c.bf16 %v435_v24, %v435_v24 }
  0x9a   : > { %v499_v33 = vunpack.c.l.b16 %v491_v29 }
  0x9b   : > { %v432_v17 = vpop.f32.mrf.mxu0 }
  0x9c   : > { %v433_v20 = vadd.f32 %v1392_v11, %v432_v17 }
  0x9e   : > { %v436_v25 = vmul.f32 0.35355338, %v433_v20 }
  0xa0   : > { %v492_v30 = vpack.c.bf16 %v436_v25, %v436_v25 }
  0xa2   : > { %v500_v34 = vunpack.c.l.b16 %v492_v30 }
  0xa4   : > { %v501_v35 = vpack.c.b16 %v500_v34, %v499_v33 }
 0x107   : > { %v455_v15 = vpop.f32.mrf.mxu1 }
 0x108   : > { %v456_v18 = vadd.f32 %v455_v15, %v444_v16 }
 0x10a   : > { %v493_v22 = vpack.c.bf16 %v456_v18, %v456_v18 }
 0x10c   : > { %v504_v27 = vunpack.c.l.b16 %v493_v22 }
 0x10f   : > { %v457_v21 = vpop.f32.mrf.mxu1 }
 0x110   : > { %v458_v23 = vadd.f32 %v457_v21, %v444_v16 }
 0x112   : > { %v494_v26 = vpack.c.bf16 %v458_v23, %v458_v23  ;;  %v486_v57 = vpop.f32.mrf.mxu2 }
 0x114   : > { %v505_v28 = vunpack.c.l.b16 %v494_v26 }
 0x116   : > { %v506_v31 = vpack.c.b16 %v505_v28, %v504_v27 }
 0x118   : > { %v512_v32 = vsel %vm507_vm1, %v506_v31, 0 }
 0x119   : > { %521 = vmatpush.bf16.xpose.msra.mxu3 %v512_v32 }
 0x11a   : > { %v488_v60 = vpop.f32.mrf.mxu2 }
 0x120   : > { %1170 = vmatmul.msk.bf16.vlgmr.msra.gmra.mxu3 %vm507_vm1, %v501_v35 }
 0x1a3   : > { %v523_v36 = vpop.f32.mrf.mxu3 }
 0x1a4   : > { %v529_v37 = vsel %vm528_vm2, %v523_v36, -inf }
 0x1a5   : > { %530 = vmax.xlane.f32.xlu2 %v529_v37 }
 0x1ab   : > { %v525_v38 = vpop.f32.mrf.mxu3 }
 0x1ac   : > { %v532_v39 = vsel %vm528_vm2, %v525_v38, -inf }
 0x1ad   : > { %533 = vmax.xlane.f32.xlu0 %v532_v39 }
 0x1c1   : > { %578 = vrot.lane.b32.xlu0 %v506_v31, %s1294_s30 }
 0x1c9   : > { %687 = vrot.lane.b32.xlu0 %v506_v31, %s1295_s11 }
 0x1d1   : > { %775 = vrot.lane.b32.xlu0 %v501_v35, %s1296_s12 }
 0x218   : > { %v531_v43 = vpop.xlane.xlu2 %530 }
 0x219   : > { %v535_v44 = vsub.f32 %v523_v36, %v531_v43 }
 0x21b   : > { %v537_v45 = vmul.f32 1.442695, %v535_v44 }
 0x21d   : > { %1242 = vpow2.f32 %v537_v45 }
 0x220   : > { %v534_v46 = vpop.xlane.xlu0 %533 }
 0x221   : > { %v536_v47 = vsub.f32 %v525_v38, %v534_v46 }
 0x223   : > { %v1243_v48 = vpop.eup %1242  ;;  %v539_v49 = vmul.f32 1.442695, %v536_v47 }
 0x224   : > { %v541_v50 = vsel %vm528_vm2, %v1243_v48, 0.0 }
 0x225   : > { %1244 = vpow2.f32 %v539_v49  ;;  %542 = vadd.xlane.f32.xlu1 %v541_v50 }
 0x22b   : > { %v1245_v51 = vpop.eup %1244 }
 0x22c   : > { %v544_v52 = vsel %vm528_vm2, %v1245_v51, 0.0 }
 0x22d   : > { %545 = vadd.xlane.f32.xlu2 %v544_v52 }
 0x233   : > { %v579_v53 = vpop.permute.xlu0 %578 }
 0x234   : > { %v584_v54 = vsel %vm507_vm1, %v579_v53, 0 }
 0x235   : > { %593 = vmatpush.bf16.xpose.msrb.mxu1 %v584_v54 }
 0x23b   : > { %v688_v55 = vpop.permute.xlu0 %687 }
 0x23c   : > { %v693_v56 = vsel %vm507_vm1, %v688_v55, 0 }
 0x23d   : > { %702 = vmatpush.bf16.xpose.msra.mxu1 %v693_v56 }
 0x23e   : > { %576 = vrot.lane.b32.xlu1 %v501_v35, %s1294_s30 }
 0x243   : > { %v776_v30 = vpop.permute.xlu0 %775 }
 0x245   : > { %471 = vrot.lane.b32.xlu2 %v1392_v11, %s1293_s29 }
 0x246   : > { %777 = vrot.lane.b32.xlu1 %v506_v31, %s1296_s12 }
 0x24d   : > { %685 = vrot.lane.b32.xlu2 %v501_v35, %s1295_s11 }
 0x298   : > { %v543_v59 = vpop.xlane.xlu1 %542 }
 0x2a0   : > { %v546_v58 = vpop.xlane.xlu2 %545 }
 0x2a1   : > { %1246 = vrcp.f32 %v546_v58 }
 0x2a2   : > { %1248 = vrcp.f32 %v543_v59 }
 0x2a7   : > { %v1247_v0 = vpop.eup %1246 }
 0x2a8   : > { %v472_v61 = vpop.permute.xlu2 %471  ;;  %v1249_v5 = vpop.eup %1248  ;;  %v550_v10 = vmul.f32 %v1247_v0, %v1245_v51 }
 0x2a9   : > { %v487_v62 = vadd.f32 %v486_v57, %v472_v61  ;;  %v489_v63 = vadd.f32 %v488_v60, %v472_v61  ;;  %v549_v13 = vmul.f32 %v1249_v5, %v1243_v48 }
 0x2ab   : > { %v495_v1 = vpack.c.bf16 %v487_v62, %v487_v62  ;;  %v496_v3 = vpack.c.bf16 %v489_v63, %v489_v63  ;;  %v551_v15 = vpack.c.bf16 %v550_v10, %v549_v13 }
 0x2ad   : > { %v554_v8 = vunpack.c.l.b16 %v495_v1  ;;  %v555_v9 = vunpack.c.l.b16 %v496_v3 }
 0x2af   : > { %v1421_v11 = vpack.c.b16 %v555_v9, %v554_v8 }
 0x2b0   : > { %v577_v14 = vpop.permute.xlu1 %576  ;;  %v686_v18 = vpop.permute.xlu2 %685 }
 0x2b1   : > { %568 = vmatpush.bf16.msrb.mxu0 %v1421_v11  ;;  %1172 = vmatmul.msk.bf16.vlgmr.msrb.gmra.mxu1 %vm507_vm1, %v577_v14 }
 0x2b4   : > { %1171 = vmatmul.msk.bf16.vlgmr.msrb.gmra.mxu0 %vm528_vm2, %v551_v15 }
 0x2b5   : > { %678 = vmatpush.bf16.msra.mxu0 %v669_v12 }
 0x2b8   : > { %v778_v16 = vpop.permute.xlu1 %777 }
 0x2b9   : > { %v783_v17 = vsel %vm507_vm1, %v778_v16, 0 }
 0x2ba   : > { %792 = vmatpush.bf16.xpose.msrb.mxu0 %v783_v17 }
 0x2c1   : > { %1176 = vmatmul.msk.bf16.vlgmr.msra.gmra.mxu1 %vm507_vm1, %v686_v18 }
 0x32e   : > { %v595_v19 = vpop.f32.mrf.mxu1 }
 0x32f   : > { %v600_v20 = vsel %vm528_vm2, %v595_v19, -inf }
 0x330   : > { %601 = vmax.xlane.f32.xlu2 %v600_v20 }
 0x331   : > { %v570_v21 = vpop.f32.mrf.mxu0 }
 0x336   : > { %v597_v22 = vpop.f32.mrf.mxu1 }
 0x337   : > { %v603_v23 = vsel %vm528_vm2, %v597_v22, -inf }
 0x338   : > { %604 = vmax.xlane.f32.xlu1 %v603_v23 }
 0x339   : > { %v572_v24 = vpop.f32.mrf.mxu0 }
 0x33a   : > { %v575_v25 = vpack.c.bf16 %v572_v24, %v570_v21 }
 0x33c   : > { %1175 = vmatmul.msk.bf16.vlgmr.msra.gmra.mxu0 %vm507_vm1, %v575_v25  ;;  %v392_v25 = vld [vmem:[%s1548_s4 + $0x4] sm:$0xf] }
 0x33e   : > { %v704_v26 = vpop.f32.mrf.mxu1 }
 0x33f   : > { %v709_v27 = vsel %vm528_vm2, %v704_v26, -inf }
 0x340   : > { %710 = vmax.xlane.f32.xlu0 %v709_v27 }
 0x346   : > { %v706_v28 = vpop.f32.mrf.mxu1 }
 0x347   : > { %v712_v29 = vsel %vm528_vm2, %v706_v28, -inf }
 0x348   : > { %713 = vmax.xlane.f32.xlu2 %v712_v29 }
 0x34c   : > { %1179 = vmatmul.msk.bf16.vlgmr.msrb.gmra.mxu0 %vm507_vm1, %v776_v30 }
 0x3a3   : > { %v602_v31 = vpop.xlane.xlu2 %601 }
 0x3a4   : > { %v606_v32 = vsub.f32 %v595_v19, %v602_v31 }
 0x3a6   : > { %v608_v33 = vmul.f32 1.442695, %v606_v32 }
 0x3a8   : > { %1250 = vpow2.f32 %v608_v33 }
 0x3ab   : > { %v605_v41 = vpop.xlane.xlu1 %604 }
 0x3ac   : > { %v607_v43 = vsub.f32 %v597_v22, %v605_v41 }
 0x3ae   : > { %v1251_v34 = vpop.eup %1250  ;;  %v610_v45 = vmul.f32 1.442695, %v607_v43 }
 0x3af   : > { %v612_v35 = vsel %vm528_vm2, %v1251_v34, 0.0 }
 0x3b0   : > { %613 = vadd.xlane.f32.xlu2 %v612_v35  ;;  %v393_v35 = vld [vmem:[%s1548_s4 + $0x8] sm:$0xf] }
 0x3b3   : > { %v711_v36 = vpop.xlane.xlu0 %710 }
 0x3b4   : > { %v715_v37 = vsub.f32 %v704_v26, %v711_v36  ;;  %v757_v36 = vsel %vm647_vm3, %v393_v35, 0 }
 0x3b6   : > { %v717_v38 = vmul.f32 1.442695, %v715_v37  ;;  %v394_v37 = vld [vmem:[%s1548_s4 + $0xc] sm:$0xf] }
 0x3b8   : > { %1252 = vpow2.f32 %v717_v38  ;;  %v847_v38 = vsel %vm647_vm3, %v394_v37, 0 }
 0x3b9   : > { %v1436_v39 = vpop.f32.mrf.mxu0  ;;  %1254 = vpow2.f32 %v610_v45 }
 0x3bb   : > { %v714_v46 = vpop.xlane.xlu2 %713 }
 0x3bc   : > { %v716_v47 = vsub.f32 %v706_v28, %v714_v46 }
 0x3be   : > { %v1438_v40 = vpop.eup %1252  ;;  %v719_v50 = vmul.f32 1.442695, %v716_v47 }
 0x3bf   : > { %v721_v42 = vsel %vm528_vm2, %v1438_v40, 0.0  ;;  %v1255_v51 = vpop.eup %1254 }
 0x3c0   : > { %722 = vadd.xlane.f32.xlu2 %v721_v42  ;;  %1256 = vpow2.f32 %v719_v50  ;;  %v615_v53 = vsel %vm528_vm2, %v1255_v51, 0.0 }
 0x3c1   : > { %v1442_v44 = vpop.f32.mrf.mxu0 }
 0x3c6   : > { %v1257_v55 = vpop.eup %1256 }
 0x3c7   : > { %v724_v56 = vsel %vm528_vm2, %v1257_v55, 0.0 }
 0x3c9   : > { %v794_v48 = vpop.f32.mrf.mxu0 }
 0x3ca   : > { %v799_v49 = vsel %vm528_vm2, %v794_v48, -inf }
 0x3cb   : > { %800 = vmax.xlane.f32.xlu1 %v799_v49  ;;  %v1478_v49 = vld [vmem:[%s1549_s5] sm:$0x7] }
 0x3d1   : > { %v796_v52 = vpop.f32.mrf.mxu0 }
 0x3d2   : > { %v802_v54 = vsel %vm528_vm2, %v796_v52, -inf }
 0x3d3   : > { %616 = vadd.xlane.f32.xlu1 %v615_v53  ;;  %803 = vmax.xlane.f32.xlu0 %v802_v54  ;;  %v865_v53 = vperm.slane %v1478_v49, 0 }
 0x3db   : > { %725 = vadd.xlane.f32.xlu1 %v724_v56 }
 0x3e7   : > { %623 = vrot.lane.b32.xlu0 %v1421_v11, %s1294_s30 }
 0x3ef   : > { %822 = vrot.lane.b32.xlu0 %v1421_v11, %s1296_s12 }
 0x423   : > { %v614_v3 = vpop.xlane.xlu2 %613 }
 0x433   : > { %v723_v16 = vpop.xlane.xlu2 %722 }
 0x43e   : > { %v801_v57 = vpop.xlane.xlu1 %800 }
 0x43f   : > { %v805_v58 = vsub.f32 %v794_v48, %v801_v57 }
 0x441   : > { %v807_v59 = vmul.f32 1.442695, %v805_v58 }
 0x443   : > { %1258 = vpow2.f32 %v807_v59 }
 0x446   : > { %v804_v60 = vpop.xlane.xlu0 %803  ;;  %v617_v1 = vpop.xlane.xlu1 %616 }
 0x447   : > { %v806_v61 = vsub.f32 %v796_v52, %v804_v60 }
 0x449   : > { %v1259_v62 = vpop.eup %1258  ;;  %v809_v63 = vmul.f32 1.442695, %v806_v61 }
 0x44a   : > { %v811_v0 = vsel %vm528_vm2, %v1259_v62, 0.0 }
 0x44b   : > { %1260 = vpow2.f32 %v809_v63  ;;  %812 = vadd.xlane.f32.xlu2 %v811_v0 }
 0x44c   : > { %1262 = vrcp.f32 %v617_v1 }
 0x44d   : > { %1264 = vrcp.f32 %v614_v3  ;;  %v1297_v3 = vmov 32.0  }
 0x44e   : > { %v726_v17 = vpop.xlane.xlu1 %725 }
 0x44f   : > { %1266 = vrcp.f32 %v726_v17 }
 0x450   : > { %1268 = vrcp.f32 %v723_v16 }
 0x451   : > { %v1261_v4 = vpop.eup %1260 }
 0x452   : > { %v814_v5 = vsel %vm528_vm2, %v1261_v4, 0.0  ;;  %v1263_v8 = vpop.eup %1262 }
 0x453   : > { %815 = vadd.xlane.f32.xlu1 %v814_v5  ;;  %v1265_v9 = vpop.eup %1264  ;;  %v621_v10 = vmul.f32 %v1263_v8, %v1255_v51 }
 0x454   : > { %v620_v12 = vmul.f32 %v1265_v9, %v1251_v34 }
 0x455   : > { %v1267_v19 = vpop.eup %1266 }
 0x456   : > { %v622_v14 = vpack.c.bf16 %v621_v10, %v620_v12  ;;  %v1269_v20 = vpop.eup %1268  ;;  %v730_v21 = vmul.f32 %v1267_v19, %v1257_v55  ;;  %v1217_v19 = vld [vmem:[%s1550_s6 + $0x8] sm:$0xff] }
 0x457   : > { %v729_v22 = vmul.f32 %v1269_v20, %v1438_v40 }
 0x459   : > { %v624_v13 = vpop.permute.xlu0 %623  ;;  %v731_v26 = vpack.c.bf16 %v730_v21, %v729_v22  ;;  %v1216_v22 = vld [vmem:[%s1550_s6] sm:$0xff] }
 0x45a   : > { %636 = vmatpush.bf16.msrb.mxu2 %v624_v13 }
 0x45d   : > { %1173 = vmatmul.msk.bf16.vlgmr.msrb.gmra.mxu2 %vm528_vm2, %v622_v14 }
 0x461   : > { %v823_v15 = vpop.permute.xlu0 %822 }
 0x462   : > { %835 = vmatpush.bf16.msrb.mxu1 %v823_v15 }
 0x463   : > { %732 = vrot.lane.b32.xlu2 %v1421_v11, %s1295_s11  ;;  %v649_v11 = vsel %vm647_vm3, %v392_v25, 0 }
 0x464   : > { %658 = vmatpush.bf16.msrb.mxu3 %v649_v11 }
 0x468   : > { %766 = vmatpush.bf16.msra.mxu3 %v757_v36 }
 0x4be   : > { %v813_v18 = vpop.xlane.xlu2 %812 }
 0x4bf   : > { %1270 = vrcp.f32 %v813_v18 }
 0x4c5   : > { %v1271_v27 = vpop.eup %1270 }
 0x4c6   : > { %v733_v23 = vpop.permute.xlu2 %732  ;;  %v816_v24 = vpop.xlane.xlu1 %815  ;;  %v819_v29 = vmul.f32 %v1271_v27, %v1259_v62 }
 0x4c7   : > { %1272 = vrcp.f32 %v816_v24  ;;  %745 = vmatpush.bf16.msra.mxu2 %v733_v23 }
 0x4c8   : > { %1274 = vrcp.f32 %v1297_v3 }
 0x4ca   : > { %1177 = vmatmul.msk.bf16.vlgmr.msra.gmra.mxu2 %vm528_vm2, %v731_v26 }
 0x4cb   : > { %856 = vmatpush.bf16.msrb.mxu2 %v847_v38  ;;  %v921_v38 = vperm.slane %v1478_v49, 1 }
 0x4cd   : > { %v1273_v28 = vpop.eup %1272 }
 0x4ce   : > { %v820_v30 = vmul.f32 %v1273_v28, %v1261_v4 }
 0x4d0   : > { %v821_v31 = vpack.c.bf16 %v820_v30, %v819_v29 }
 0x4d2   : > { %1180 = vmatmul.msk.bf16.vlgmr.msrb.gmra.mxu1 %vm528_vm2, %v821_v31 }
 0x4e0   : > { %v638_v32 = vpop.f32.mrf.mxu2 }
 0x4e8   : > { %v640_v33 = vpop.f32.mrf.mxu2 }
 0x4e9   : > { %v643_v34 = vpack.c.bf16 %v640_v33, %v638_v32 }
 0x4eb   : > { %1174 = vmatmul.msk.bf16.vlgmr.msrb.gmra.mxu3 %vm507_vm1, %v643_v34 }
 0x4ec   : > { %966 = vmatpush.bf16.msrb.mxu3 %v1217_v19 }
 0x4f0   : > { %967 = vmatpush.bf16.msrb.mxu3 %v1216_v22 }
 0x54d   : > { %v747_v40 = vpop.f32.mrf.mxu2 }
 0x54f   : > { %v837_v41 = vpop.f32.mrf.mxu1 }
 0x555   : > { %v749_v42 = vpop.f32.mrf.mxu2 }
 0x556   : > { %v752_v43 = vpack.c.bf16 %v749_v42, %v747_v40 }
 0x557   : > { %v839_v45 = vpop.f32.mrf.mxu1 }
 0x558   : > { %v842_v46 = vpack.c.bf16 %v839_v45, %v837_v41  ;;  %1178 = vmatmul.msk.bf16.vlgmr.msra.gmra.mxu3 %vm507_vm1, %v752_v43  ;;  %v924_v43 = vperm.slane %v1478_v49, 2  ;;  %v1219_v49 = vld [vmem:[%s1552_s8 + $0x8] sm:$0xff] }
 0x55a   : > { %1181 = vmatmul.msk.bf16.vlgmr.msrb.gmra.mxu2 %vm507_vm1, %v842_v46 }
 0x56e   : > { %v660_v47 = vpop.f32.mrf.mxu3 }
 0x56f   : > { %v681_v50 = vadd.f32 %v1436_v39, %v660_v47 }
 0x576   : > { %v662_v48 = vpop.f32.mrf.mxu3 }
 0x577   : > { %v683_v57 = vadd.f32 %v1442_v44, %v662_v48  ;;  %v1275_v44 = vpop.eup %1274 }
 0x578   : > { %v877_v4 = vmul.f32 32.0, %v1275_v44  ;;  %vm881_vm4 = vweird.f32 %v1275_v44 }
 0x57a   : > { %v878_v5 = vsub.f32 1.0, %v877_v4 }
 0x5db   : > { %v768_v51 = vpop.f32.mrf.mxu3 }
 0x5dc   : > { %v773_v52 = vadd.f32 %v768_v51, %v681_v50 }
 0x5dd   : > { %v858_v54 = vpop.f32.mrf.mxu2 }
 0x5de   : > { %v863_v55 = vadd.f32 %v858_v54, %v773_v52  ;;  %v1221_v52 = vld [vmem:[%s1552_s8 + $0x18] sm:$0xff]  ;;  %v1218_v54 = vld [vmem:[%s1552_s8] sm:$0xff] }
 0x5df   : > { %1010 = vmatpush.bf16.msra.mxu0 %v1221_v52 }
 0x5e0   : > { %v866_v56 = vadd.f32 %v865_v53, %v863_v55 }
 0x5e2   : > { %v868_v58 = vadd.f32 %v866_v56, %v395_v6  ;;  %v879_v6 = vmul.f32 %v1275_v44, %v878_v5  ;;  %v1241_v56 = vld [vmem:[%s1551_s7] ss:$0 sm:$0xff] }
 0x5e3   : > { %v770_v59 = vpop.f32.mrf.mxu3 }
 0x5e4   : > { %v774_v60 = vadd.f32 %v770_v59, %v683_v57  ;;  %v870_v61 = vsel %vm417_vm0, %v868_v58, 0.0  ;;  %v880_v8 = vadd.f32 %v1275_v44, %v879_v6 }
 0x5e5   : > { %871 = vadd.xlane.f32.xlu1 %v870_v61  ;;  %v860_v62 = vpop.f32.mrf.mxu2 }
 0x5e6   : > { %v864_v63 = vadd.f32 %v860_v62, %v774_v60  ;;  %v1489_v9 = vsel %vm881_vm4, %v1275_v44, %v880_v8 }
 0x5e8   : > { %v867_v39 = vadd.f32 %v865_v53, %v864_v63  ;;  %v1220_v53 = vld [vmem:[%s1552_s8 + $0x10] sm:$0xff]  ;;  %v1524_v63 = vld [vmem:[%s1553_s9] sm:$0x7] }
 0x5e9   : > { %1011 = vmatpush.bf16.msra.mxu0 %v1220_v53 }
 0x5ea   : > { %v869_v0 = vadd.f32 %v867_v39, %v396_v7  ;;  %v977_v39 = vperm.slane %v1524_v63, 0 }
 0x5ec   : > { %v873_v1 = vsel %vm417_vm0, %v869_v0, 0.0 }
 0x5ed   : > { %874 = vadd.xlane.f32.xlu0 %v873_v1  ;;  %1012 = vmatpush.bf16.msra.mxu0 %v1219_v49 }
 0x5f1   : > { %1013 = vmatpush.bf16.msra.mxu0 %v1218_v54 }
 0x658   : > { %v872_v10 = vpop.xlane.xlu1 %871 }
 0x659   : > { %v883_v12 = vmul.f32 %v1489_v9, %v872_v10 }
 0x65b   : > { %v885_v13 = vsub.f32 %v868_v58, %v883_v12 }
 0x65d   : > { %v887_v14 = vmul.f32 %v885_v13, %v885_v13 }
 0x65f   : > { %v889_v2 = vsel %vm417_vm0, %v887_v14, 0.0 }
 0x660   : > { %890 = vadd.xlane.f32.xlu1 %v889_v2  ;;  %v875_v7 = vpop.xlane.xlu0 %874 }
 0x661   : > { %v884_v15 = vmul.f32 %v1489_v9, %v875_v7 }
 0x663   : > { %v886_v16 = vsub.f32 %v869_v0, %v884_v15 }
 0x665   : > { %v888_v17 = vmul.f32 %v886_v16, %v886_v16 }
 0x667   : > { %v892_v18 = vsel %vm417_vm0, %v888_v17, 0.0 }
 0x668   : > { %893 = vadd.xlane.f32.xlu1 %v892_v18 }
 0x6d3   : > { %v891_v20 = vpop.xlane.xlu1 %890 }
 0x6d4   : > { %v895_v21 = vmul.f32 %v891_v20, %v1489_v9 }
 0x6d6   : > { %v897_v23 = vadd.f32 1e-05, %v895_v21 }
 0x6d8   : > { %1276 = vrsqrt.f32 %v897_v23  ;;  %vm905_vm6 = vweird.f32 %v897_v23 }
 0x6db   : > { %v894_v24 = vpop.xlane.xlu1 %893 }
 0x6dc   : > { %v896_v25 = vmul.f32 %v894_v24, %v1489_v9 }
 0x6de   : > { %v1277_v11 = vpop.eup %1276  ;;  %v898_v26 = vadd.f32 1e-05, %v896_v25 }
 0x6df   : > { %v900_v27 = vmul.f32 %v1277_v11, %v897_v23  ;;  %vm906_vm5 = vweird.f32 %v1277_v11 }
 0x6e0   : > { %1278 = vrsqrt.f32 %v898_v26  ;;  %vm907_vm7 = vmor %vm905_vm6, %vm906_vm5  ;;  %vm915_vm9 = vweird.f32 %v898_v26 }
 0x6e1   : > { %v901_v28 = vmul.f32 %v1277_v11, %v900_v27 }
 0x6e3   : > { %v902_v29 = vmul.f32 0.5, %v901_v28 }
 0x6e5   : > { %v903_v30 = vsub.f32 1.5, %v902_v29 }
 0x6e6   : > { %v1279_v31 = vpop.eup %1278 }
 0x6e7   : > { %v904_v32 = vmul.f32 %v1277_v11, %v903_v30  ;;  %v910_v33 = vmul.f32 %v1279_v31, %v898_v26  ;;  %vm916_vm8 = vweird.f32 %v1279_v31 }
 0x6e8   : > { %vm917_vm10 = vmor %vm915_vm9, %vm916_vm8 }
 0x6e9   : > { %v911_v34 = vmul.f32 %v1279_v31, %v910_v33  ;;  %v908_v35 = vsel %vm907_vm7, %v1277_v11, %v904_v32  ;;  %v1066_v32 = vperm.slane %v1524_v63, 1 }
 0x6ea   : > { %v919_v40 = vmul.f32 %v908_v35, %v885_v13 }
 0x6eb   : > { %v912_v36 = vmul.f32 0.5, %v911_v34 }
 0x6ec   : > { %v922_v45 = vmul.f32 %v921_v38, %v919_v40 }
 0x6ed   : > { %v913_v37 = vsub.f32 1.5, %v912_v36 }
 0x6ee   : > { %v925_v48 = vadd.f32 %v924_v43, %v922_v45 }
 0x6ef   : > { %v914_v41 = vmul.f32 %v1279_v31, %v913_v37 }
 0x6f1   : > { %v918_v42 = vsel %vm917_vm10, %v1279_v31, %v914_v41 }
 0x6f2   : > { %v920_v46 = vmul.f32 %v918_v42, %v886_v16 }
 0x6f4   : > { %v923_v47 = vmul.f32 %v921_v38, %v920_v46 }
 0x6f6   : > { %v926_v50 = vadd.f32 %v924_v43, %v923_v47 }
 0x6f8   : > { %v941_v51 = vpack.c.bf16 %v926_v50, %v925_v48 }
 0x6fa   : > { %1190 = vmatmul.msk.bf16.vlgmr.msrb.gmra.mxu3 %vm417_vm0, %v941_v51 }
 0x77d   : > { %v969_v55 = vpop.f32.mrf.mxu3 }
 0x77e   : > { %v970_v57 = vadd.f32 %v1241_v56, %v969_v55 }
 0x780   : > { %v974_v60 = vmax.f32 %v970_v57, 0.0 }
 0x785   : > { %v971_v58 = vpop.f32.mrf.mxu3 }
 0x786   : > { %v972_v59 = vadd.f32 %v1241_v56, %v971_v58 }
 0x788   : > { %v975_v61 = vmax.f32 %v972_v59, 0.0 }
 0x78a   : > { %v976_v62 = vpack.c.bf16 %v975_v61, %v974_v60 }
 0x78c   : > { %1207 = vmatmul.msk.bf16.vlgmr.msra.gmra.mxu0 %vm1002_vm11, %v976_v62 }
 0x809   : > { %v1015_v0 = vpop.f32.mrf.mxu0 }
 0x80a   : > { %v1016_v1 = vadd.f32 %v1015_v0, %v977_v39 }
 0x80c   : > { %v1020_v3 = vadd.f32 %v1016_v1, %v925_v48 }
 0x80e   : > { %v1022_v44 = vsel %vm417_vm0, %v1020_v3, 0.0 }
 0x80f   : > { %1023 = vadd.xlane.f32.xlu2 %v1022_v44 }
 0x811   : > { %v1017_v4 = vpop.f32.mrf.mxu0 }
 0x812   : > { %v1018_v5 = vadd.f32 %v1017_v4, %v977_v39 }
 0x814   : > { %v1021_v6 = vadd.f32 %v1018_v5, %v926_v50 }
 0x816   : > { %v1025_v8 = vsel %vm417_vm0, %v1021_v6, 0.0 }
 0x817   : > { %1026 = vadd.xlane.f32.xlu1 %v1025_v8 }
 0x882   : > { %v1024_v10 = vpop.xlane.xlu2 %1023 }
 0x883   : > { %v1028_v12 = vmul.f32 %v1024_v10, %v1489_v9 }
 0x885   : > { %v1030_v13 = vsub.f32 %v1020_v3, %v1028_v12 }
 0x887   : > { %v1032_v14 = vmul.f32 %v1030_v13, %v1030_v13 }
 0x889   : > { %v1034_v2 = vsel %vm417_vm0, %v1032_v14, 0.0 }
 0x88a   : > { %v1027_v7 = vpop.xlane.xlu1 %1026  ;;  %1035 = vadd.xlane.f32.xlu1 %v1034_v2 }
 0x88b   : > { %v1029_v15 = vmul.f32 %v1027_v7, %v1489_v9 }
 0x88d   : > { %v1031_v16 = vsub.f32 %v1021_v6, %v1029_v15 }
 0x88f   : > { %v1033_v17 = vmul.f32 %v1031_v16, %v1031_v16 }
 0x891   : > { %v1037_v18 = vsel %vm417_vm0, %v1033_v17, 0.0  ;;  %vm1074_vm0 = vcmask 257024  }
 0x892   : > { %1038 = vadd.xlane.f32.xlu1 %v1037_v18 }
 0x8fd   : > { %v1036_v19 = vpop.xlane.xlu1 %1035 }
 0x8fe   : > { %v1040_v20 = vmul.f32 %v1036_v19, %v1489_v9 }
 0x900   : > { %v1042_v21 = vadd.f32 1e-05, %v1040_v20 }
 0x902   : > { %1280 = vrsqrt.f32 %v1042_v21  ;;  %vm1050_vm13 = vweird.f32 %v1042_v21 }
 0x905   : > { %v1039_v22 = vpop.xlane.xlu1 %1038 }
 0x906   : > { %v1041_v23 = vmul.f32 %v1039_v22, %v1489_v9  ;;  %v1069_v9 = vperm.slane %v1524_v63, 2 }
 0x908   : > { %v1281_v24 = vpop.eup %1280  ;;  %v1043_v25 = vadd.f32 1e-05, %v1041_v23 }
 0x909   : > { %v1045_v11 = vmul.f32 %v1281_v24, %v1042_v21  ;;  %vm1051_vm12 = vweird.f32 %v1281_v24 }
 0x90a   : > { %1282 = vrsqrt.f32 %v1043_v25  ;;  %vm1052_vm14 = vmor %vm1050_vm13, %vm1051_vm12  ;;  %vm1060_vm1 = vweird.f32 %v1043_v25 }
 0x90b   : > { %v1046_v26 = vmul.f32 %v1281_v24, %v1045_v11 }
 0x90d   : > { %v1047_v27 = vmul.f32 0.5, %v1046_v26 }
 0x90f   : > { %v1048_v28 = vsub.f32 1.5, %v1047_v27 }
 0x910   : > { %v1283_v29 = vpop.eup %1282 }
 0x911   : > { %v1049_v30 = vmul.f32 %v1281_v24, %v1048_v28  ;;  %v1055_v31 = vmul.f32 %v1283_v29, %v1043_v25  ;;  %vm1061_vm15 = vweird.f32 %v1283_v29 }
 0x912   : > { %vm1062_vm2 = vmor %vm1060_vm1, %vm1061_vm15 }
 0x913   : > { %v1053_v33 = vsel %vm1052_vm14, %v1281_v24, %v1049_v30  ;;  %v1056_v34 = vmul.f32 %v1283_v29, %v1055_v31 }
 0x914   : > { %v1064_v35 = vmul.f32 %v1053_v33, %v1030_v13 }
 0x915   : > { %v1057_v36 = vmul.f32 0.5, %v1056_v34 }
 0x916   : > { %v1067_v37 = vmul.f32 %v1066_v32, %v1064_v35 }
 0x917   : > { %v1058_v38 = vsub.f32 1.5, %v1057_v36 }
 0x918   : > { %v1070_v40 = vadd.f32 %v1069_v9, %v1067_v37 }
 0x919   : > { %v1059_v41 = vmul.f32 %v1283_v29, %v1058_v38 }
 0x91a   : > { %v1072_v42 = vpack.c.bf16 %v1070_v40, %v1070_v40 }
 0x91b   : > { %v1063_v43 = vsel %vm1062_vm2, %v1283_v29, %v1059_v41 }
 0x91c   : > { %1075 = vst.msk [vmem:[%s379_s25] sm:$0xf] %vm1074_vm0, %v1072_v42  ;;  %v1065_v45 = vmul.f32 %v1063_v43, %v1031_v16 }
 0x91e   : > { %v1068_v46 = vmul.f32 %v1066_v32, %v1065_v45 }
 0x920   : > { %v1071_v47 = vadd.f32 %v1069_v9, %v1068_v46 }
 0x922   : > { %v1073_v48 = vpack.c.bf16 %v1071_v47, %v1071_v47 }
 0x924   : > { %1076 = vst.msk [vmem:[%s379_s25 + $0x4] sm:$0xf] %vm1074_vm0, %v1073_v48 }
 0x925 PF: > { %s20_s13 = sadd.s32 1, %s1290_s13  }
 0x926   : > { %p17_p4 = scmp.ge.s32.totalorder %s20_s13, 4  }
 0x928   :  { %19 = sbr.rel (!%p17_p4) target bundleno = 1 (0x1), region = 93 }

// kernel: detr_forward.9
= control target key start
LH: loop header
LB: loop body
LE: loop exit
PB: predicated region body
PF: predicated region fallthrough
CT: control target
= control target key end

     0   :  { %s1917_s21 = smov 0   ;;  %s2177_s0 = inlined_call_operand.vmem [shape: bf16[2,8,32], index: 0, kind: input, shape index: {}]   ;;  %s2178_s1 = inlined_call_operand.vmem [shape: bf16[8,32], index: 1, kind: input, shape index: {}]   ;;  %s2179_s2 = inlined_call_operand.vmem [shape: bf16[2,16,32], index: 2, kind: input, shape index: {}]   ;;  %s2180_s3 = inlined_call_operand.vmem [shape: bf16[2,16,32], index: 3, kind: input, shape index: {}]   ;;  %s2181_s4 = inlined_call_operand.vmem [shape: bf16[32,96], index: 4, kind: input, shape index: {}]   ;;  %s2182_s5 = inlined_call_operand.vmem [shape: f32[1,96], index: 5, kind: input, shape index: {}]   ;;  %s2183_s6 = inlined_call_operand.vmem [shape: bf16[32,32], index: 6, kind: input, shape index: {}]   ;;  %s2184_s7 = inlined_call_operand.vmem [shape: f32[3,32], index: 7, kind: input, shape index: {}]   ;;  %s2185_s8 = inlined_call_operand.vmem [shape: bf16[32,96], index: 8, kind: input, shape index: {}]   ;;  %s2186_s9 = inlined_call_operand.vmem [shape: f32[1,96], index: 9, kind: input, shape index: {}]   ;;  %s2187_s10 = inlined_call_operand.vmem [shape: bf16[32,32], index: 10, kind: input, shape index: {}]   ;;  %s2188_s11 = inlined_call_operand.vmem [shape: f32[3,32], index: 11, kind: input, shape index: {}]   ;;  %s2189_s12 = inlined_call_operand.vmem [shape: bf16[32,64], index: 12, kind: input, shape index: {}]   ;;  %s2190_s13 = inlined_call_operand.vmem [shape: f32[1,64], index: 13, kind: input, shape index: {}]   ;;  %s2191_s14 = inlined_call_operand.vmem [shape: bf16[64,32], index: 14, kind: input, shape index: {}]   ;;  %s2192_s15 = inlined_call_operand.vmem [shape: f32[3,32], index: 15, kind: input, shape index: {}]   ;;  %s2193_s16 = inlined_call_operand.vmem [shape: bf16[2,8,32], index: 16, kind: output, shape index: {}]  }
   0x1   :  { %2197 = sst [smem:[#allocation2_spill]] %s2177_s0 }
   0x2 LB: > { %s1655_s22 = sadd.s32 4294967295, %s1824_s21   ;;  %p1659_p0 = scmp.ge.s32.totalorder %s1824_s21, 1  ;;  %s1824_s21 = sphi %s1917_s21, %s26_s21  }
   0x3   : > { %p481_p1 = scmp.lt.s32.totalorder %s1824_s21, 3 }
   0x5   : > { %p482_p2 = pnand %p1659_p0, %p481_p1 }
   0x6   : > { %s1826_s27 = smov (!%p482_p2), 96   ;;  %s1827_s28 = smov (!%p482_p2), 64  }
   0x7   : > { %485 = sbr.rel (%p482_p2) target bundleno = 3891 (0xf33), region = 84  ;;  %p539_p3 = scmp.lt.s32.totalorder (!%p482_p2), %s1655_s22, 1 }
   0x8   : > { %s2198_s17 = sld [smem:[#allocation2_spill]] (!%p482_p2)  ;;  %s1828_s25 = smov (!%p482_p2), 120  }
   0x9   : > { %s1829_s26 = smov (!%p482_p2), 112   ;;  %s2195_s30 = smov (!%p482_p2), 104  }
   0xc   : > { %v1748_v0 = vld [vmem:[%s2181_s4 + $0x8] sm:$0xff]  ;;  %v1747_v1 = vld [vmem:[%s2181_s4] sm:$0xff]  ;;  %s2202_s22 = smov (!%p539_p3, %s1655_s22), 1  ;;  %vm593_vm0 = vcmask 261120   ;;  %vm661_vm1 = vcmask 64512   ;;  %vm696_vm2 = vcmask 1043456  }
   0xd   : > { %613 = vrot.lane.b32.xlu0 %v1748_v0, %s1826_s27  ;;  %603 = vmatpush.bf16.msra.mxu0 %v1748_v0  ;;  %s2194_s29 = sshll.u32 %s2202_s22, 2  ;;  %v1947_v3 = vld [vmem:[%s2178_s1] sm:$0xf]  ;;  %vm1147_vm7 = vcmask 130048   ;;  %vm1531_vm11 = vcmask 523264   ;;  %vm1576_vm15 = vcmask 257024  }
   0xe   : > { %633 = vrot.lane.b32.xlu2 %v1747_v1, %s1827_s28  ;;  %s542_s18 = scalar_lea.vmem %s2198_s17, %s2194_s29  ;;  %v575_v5 = vunpack.c.l.bf16 %v1947_v3  ;;  %v1775_v8 = vld [vmem:[%s2182_s5] ss:$0 sm:$0xff] }
   0xf   : > { %v1942_v2 = vld [vmem:[%s542_s18] sm:$0xf]  ;;  %617 = vrot.lane.b32.xlu1 %v1775_v8, %s1826_s27  ;;  %s1744_s18 = sshll.u32 %s2202_s22, 3 }
  0x10   : > { %v574_v4 = vunpack.c.l.bf16 %v1942_v2  ;;  %v570_v56 = vld [vmem:[%s2183_s6] sm:$0xf]  ;;  %s2058_s23 = scalar_lea.vmem %s2179_s2, %s1744_s18 }
  0x11   : > { %604 = vmatpush.bf16.msra.mxu0 %v1747_v1  ;;  %v803_v57 = vsel %vm696_vm2, %v570_v56, 0  ;;  %v573_v56 = vld [vmem:[%s2183_s6 + $0xc] sm:$0xf] }
  0x12   : > { %v576_v6 = vadd.f32 %v575_v5, %v574_v4 }
  0x14   : > { %v577_v7 = vpack.c.bf16 %v576_v6, %v576_v6 }
  0x15   : > { %611 = vrot.lane.b32.xlu0 %v1747_v1, %s1826_s27 }
  0x16   : > { %1674 = vmatmul.msk.bf16.vlgmr.msra.gmra.mxu0 %vm593_vm0, %v577_v7 }
  0x17   : > { %635 = vrot.lane.b32.xlu1 %v1748_v0, %s1827_s28 }
  0x1f   : > { %639 = vrot.lane.b32.xlu1 %v1775_v8, %s1827_s28 }
  0x68   : > { %v634_v31 = vpop.permute.xlu2 %633 }
  0x7f   : > { %v614_v9 = vpop.permute.xlu0 %613 }
  0x80   : > { %626 = vmatpush.bf16.msra.mxu1 %v614_v9 }
  0x81   : > { %v618_v14 = vpop.permute.xlu1 %617 }
  0x87   : > { %v612_v10 = vpop.permute.xlu0 %611 }
  0x88   : > { %627 = vmatpush.bf16.msra.mxu1 %v612_v10 }
  0x89   : > { %v636_v25 = vpop.permute.xlu1 %635 }
  0x8a   : > { %651 = vmatpush.bf16.msra.mxu2 %v636_v25 }
  0x8b   : > { %1675 = vmatmul.msk.bf16.vlgmr.msra.gmra.mxu1 %vm593_vm0, %v577_v7 }
  0x8e   : > { %652 = vmatpush.bf16.msra.mxu2 %v634_v31 }
  0x91   : > { %v640_v27 = vpop.permute.xlu1 %639  ;;  %1676 = vmatmul.msk.bf16.vlgmr.msra.gmra.mxu2 %vm593_vm0, %v1942_v2  ;;  %v1749_v2 = vld [vmem:[%s2185_s8] sm:$0xff] }
  0x93   : > { %v606_v11 = vpop.f32.mrf.mxu0 }
  0x94   : > { %v607_v13 = vadd.f32 %v1775_v8, %v606_v11 }
  0x96   : > { %v610_v16 = vmul.f32 0.35355338, %v607_v13 }
  0x98   : > { %v658_v19 = vpack.c.bf16 %v610_v16, %v610_v16 }
  0x9a   : > { %v715_v24 = vunpack.c.l.b16 %v658_v19 }
  0x9b   : > { %v608_v12 = vpop.f32.mrf.mxu0 }
  0x9c   : > { %v716_v26 = vpack.c.b16 %v715_v24, %v715_v24 }
 0x108   : > { %v629_v15 = vpop.f32.mrf.mxu1 }
 0x109   : > { %v630_v17 = vadd.f32 %v629_v15, %v618_v14 }
 0x10b   : > { %v659_v18 = vpack.c.bf16 %v630_v17, %v630_v17 }
 0x10d   : > { %v720_v20 = vunpack.c.l.b16 %v659_v18  ;;  %v666_v21 = vsel %vm661_vm1, %v659_v18, 0 }
 0x10e   : > { %675 = vmatpush.bf16.xpose.msra.mxu3 %v666_v21 }
 0x10f   : > { %v721_v22 = vpack.c.b16 %v720_v20, %v720_v20 }
 0x110   : > { %v631_v23 = vpop.f32.mrf.mxu1 }
 0x111   : > { %722 = vrot.lane.b32.xlu1 %v721_v22, %s1828_s25 }
 0x114   : > { %v654_v46 = vpop.f32.mrf.mxu2 }
 0x115   : > { %1677 = vmatmul.msk.bf16.vlgmr.msra.gmra.mxu3 %vm661_vm1, %v658_v19  ;;  %v655_v51 = vadd.f32 %v654_v46, %v640_v27 }
 0x117   : > { %v660_v52 = vpack.c.bf16 %v655_v51, %v655_v51  ;;  %v572_v51 = vld [vmem:[%s2183_s6 + $0x8] sm:$0xf] }
 0x119   : > { %717 = vrot.lane.b32.xlu1 %v716_v26, %s1828_s25  ;;  %v756_v53 = vunpack.c.l.b16 %v660_v52  ;;  %v698_v55 = vsel %vm696_vm2, %v660_v52, 0  ;;  %v879_v52 = vsel %vm696_vm2, %v572_v51, 0 }
 0x11a   : > { %707 = vmatpush.bf16.msrb.mxu0 %v698_v55 }
 0x11b   : > { %v1981_v54 = vpack.c.b16 %v756_v53, %v756_v53 }
 0x11c   : > { %v656_v50 = vpop.f32.mrf.mxu2 }
 0x11e   : > { %812 = vmatpush.bf16.msra.mxu0 %v803_v57  ;;  %v956_v57 = vsel %vm696_vm2, %v573_v56, 0 }
 0x121   : > { %820 = vrot.lane.b32.xlu1 %v721_v22, %s1829_s26 }
 0x129   : > { %818 = vrot.lane.b32.xlu1 %v716_v26, %s1829_s26 }
 0x131   : > { %895 = vrot.lane.b32.xlu1 %v716_v26, %s2195_s30 }
 0x183   : > { %v723_v28 = vpop.permute.xlu1 %722 }
 0x184   : > { %v728_v29 = vsel %vm661_vm1, %v723_v28, 0 }
 0x185   : > { %737 = vmatpush.bf16.xpose.msrb.mxu1 %v728_v29 }
 0x18b   : > { %v718_v30 = vpop.permute.xlu1 %717 }
 0x18c   : > { %1679 = vmatmul.msk.bf16.vlgmr.msrb.gmra.mxu1 %vm661_vm1, %v718_v30 }
 0x193   : > { %v821_v32 = vpop.permute.xlu1 %820 }
 0x194   : > { %v826_v33 = vsel %vm661_vm1, %v821_v32, 0 }
 0x195   : > { %835 = vmatpush.bf16.xpose.msra.mxu1 %v826_v33 }
 0x198   : > { %v677_v34 = vpop.f32.mrf.mxu3 }
 0x199   : > { %v681_v35 = vsel %vm661_vm1, %v677_v34, -inf }
 0x19a   : > { %682 = vmax.xlane.f32.xlu2 %v681_v35 }
 0x19b   : > { %v819_v36 = vpop.permute.xlu1 %818 }
 0x19c   : > { %1683 = vmatmul.msk.bf16.vlgmr.msra.gmra.mxu1 %vm661_vm1, %v819_v36 }
 0x1a0   : > { %v679_v37 = vpop.f32.mrf.mxu3 }
 0x1a3   : > { %v896_v12 = vpop.permute.xlu1 %895 }
 0x1b2   : > { %897 = vrot.lane.b32.xlu2 %v721_v22, %s2195_s30 }
 0x209   : > { %v739_v38 = vpop.f32.mrf.mxu1 }
 0x20a   : > { %v743_v49 = vsel %vm661_vm1, %v739_v38, -inf }
 0x20d   : > { %v683_v39 = vpop.xlane.xlu2 %682 }
 0x20e   : > { %v684_v40 = vsub.f32 %v677_v34, %v683_v39 }
 0x210   : > { %v685_v41 = vmul.f32 1.442695, %v684_v40  ;;  %v571_v40 = vld [vmem:[%s2183_s6 + $0x4] sm:$0xf] }
 0x211   : > { %v741_v42 = vpop.f32.mrf.mxu1 }
 0x212   : > { %1778 = vpow2.f32 %v685_v41  ;;  %v784_v41 = vsel %vm696_vm2, %v571_v40, 0 }
 0x213   : > { %793 = vmatpush.bf16.msrb.mxu3 %v784_v41 }
 0x215   : > { %v898_v62 = vpop.permute.xlu2 %897 }
 0x216   : > { %v903_v6 = vsel %vm661_vm1, %v898_v62, 0 }
 0x217   : > { %888 = vmatpush.bf16.msra.mxu3 %v879_v52 }
 0x218   : > { %v1779_v43 = vpop.eup %1778 }
 0x219   : > { %v837_v44 = vpop.f32.mrf.mxu1  ;;  %v687_v45 = vsel %vm661_vm1, %v1779_v43, 0.0 }
 0x21a   : > { %688 = vadd.xlane.f32.xlu0 %v687_v45  ;;  %v841_v47 = vsel %vm661_vm1, %v837_v44, -inf }
 0x21b   : > { %842 = vmax.xlane.f32.xlu1 %v841_v47 }
 0x221   : > { %v839_v48 = vpop.f32.mrf.mxu1 }
 0x222   : > { %744 = vmax.xlane.f32.xlu0 %v743_v49 }
 0x234   : > { %853 = vrot.lane.b32.xlu1 %v1981_v54, %s1829_s26 }
 0x28d   : > { %v689_v58 = vpop.xlane.xlu0 %688 }
 0x28e   : > { %1780 = vrcp.f32 %v689_v58  ;;  %v843_v18 = vpop.xlane.xlu1 %842 }
 0x28f   : > { %v844_v19 = vsub.f32 %v837_v44, %v843_v18 }
 0x291   : > { %v845_v20 = vmul.f32 1.442695, %v844_v19 }
 0x294   : > { %v1781_v59 = vpop.eup %1780 }
 0x295   : > { %v691_v60 = vmul.f32 %v1781_v59, %v1779_v43  ;;  %v745_v61 = vpop.xlane.xlu0 %744 }
 0x296   : > { %v746_v63 = vsub.f32 %v739_v38, %v745_v61 }
 0x297   : > { %v692_v0 = vpack.c.bf16 %v691_v60, %v691_v60 }
 0x298   : > { %v747_v1 = vmul.f32 1.442695, %v746_v63 }
 0x299   : > { %1678 = vmatmul.msk.bf16.vlgmr.msrb.gmra.mxu0 %vm661_vm1, %v692_v0 }
 0x29a   : > { %1782 = vpow2.f32 %v747_v1  ;;  %912 = vmatpush.bf16.xpose.msrb.mxu0 %v903_v6  ;;  %v2028_v1 = vld [vmem:[%s2184_s7] sm:$0x7] }
 0x29b   : > { %1784 = vpow2.f32 %v845_v20 }
 0x2a0   : > { %v1783_v7 = vpop.eup %1782 }
 0x2a1   : > { %v749_v8 = vsel %vm661_vm1, %v1783_v7, 0.0  ;;  %v1785_v21 = vpop.eup %1784 }
 0x2a2   : > { %750 = vadd.xlane.f32.xlu2 %v749_v8  ;;  %v847_v22 = vsel %vm661_vm1, %v1785_v21, 0.0  ;;  %v972_v8 = vperm.slane %v2028_v1, 0 }
 0x2a6   : > { %v854_v30 = vpop.permute.xlu1 %853 }
 0x2a7   : > { %v859_v34 = vsel %vm696_vm2, %v854_v30, 0  ;;  %v1776_v30 = vld [vmem:[%s2186_s9] ss:$0 sm:$0xff] }
 0x315   : > { %v751_v26 = vpop.xlane.xlu2 %750 }
 0x316   : > { %v709_v9 = vpop.f32.mrf.mxu0 }
 0x317   : > { %v713_v10 = vpack.c.bf16 %v709_v9, %v709_v9 }
 0x319   : > { %1682 = vmatmul.msk.bf16.vlgmr.msra.gmra.mxu0 %vm661_vm1, %v713_v10 }
 0x31e   : > { %v711_v11 = vpop.f32.mrf.mxu0 }
 0x329   : > { %1686 = vmatmul.msk.bf16.vlgmr.msrb.gmra.mxu0 %vm661_vm1, %v896_v12 }
 0x396   : > { %v1995_v13 = vpop.f32.mrf.mxu0 }
 0x39e   : > { %v816_v14 = vpop.f32.mrf.mxu0 }
 0x3a6   : > { %v914_v15 = vpop.f32.mrf.mxu0 }
 0x3a7   : > { %v918_v16 = vsel %vm661_vm1, %v914_v15, -inf }
 0x3a8   : > { %919 = vmax.xlane.f32.xlu0 %v918_v16  ;;  %v1831_v16 = vmov 32.0  }
 0x3ae   : > { %v916_v17 = vpop.f32.mrf.mxu0 }
 0x3af   : > { %v1750_v17 = vld [vmem:[%s2185_s8 + $0x8] sm:$0xff] }
 0x3bc   : > { %758 = vrot.lane.b32.xlu0 %v1981_v54, %s1828_s25 }
 0x3e6   : > { %848 = vadd.xlane.f32.xlu0 %v847_v22 }
 0x41b   : > { %v920_v23 = vpop.xlane.xlu0 %919 }
 0x41c   : > { %v921_v24 = vsub.f32 %v914_v15, %v920_v23 }
 0x41e   : > { %v922_v25 = vmul.f32 1.442695, %v921_v24 }
 0x420   : > { %1786 = vpow2.f32 %v922_v25 }
 0x421   : > { %1788 = vrcp.f32 %v751_v26 }
 0x426   : > { %v1787_v27 = vpop.eup %1786 }
 0x427   : > { %v924_v28 = vsel %vm661_vm1, %v1787_v27, 0.0  ;;  %v1789_v29 = vpop.eup %1788 }
 0x428   : > { %925 = vadd.xlane.f32.xlu2 %v924_v28  ;;  %v753_v31 = vmul.f32 %v1789_v29, %v1783_v7 }
 0x42a   : > { %v754_v35 = vpack.c.bf16 %v753_v31, %v753_v31 }
 0x42e   : > { %v759_v32 = vpop.permute.xlu0 %758 }
 0x42f   : > { %v764_v33 = vsel %vm696_vm2, %v759_v32, 0 }
 0x430   : > { %773 = vmatpush.bf16.msrb.mxu2 %v764_v33 }
 0x433   : > { %1680 = vmatmul.msk.bf16.vlgmr.msrb.gmra.mxu2 %vm661_vm1, %v754_v35 }
 0x434   : > { %868 = vmatpush.bf16.msra.mxu2 %v859_v34  ;;  %v560_v34 = vld [vmem:[%s2058_s23] sm:$0xff]  }
 0x438   : > { %965 = vmatpush.bf16.msrb.mxu2 %v956_v57 }
 0x440   : > { %930 = vrot.lane.b32.xlu2 %v1981_v54, %s2195_s30  ;;  %s552_s30 = scalar_lea.vmem %s2180_s3, %s1744_s18 }
 0x441   : > { %v1758_v32 = vld [vmem:[%s552_s30] sm:$0xff]  }
 0x448   : > { %1061 = vrot.lane.b32.xlu2 %v1749_v2, %s1826_s27 }
 0x450   : > { %1067 = vrot.lane.b32.xlu2 %v1776_v30, %s1826_s27 }
 0x458   : > { %1094 = vrot.lane.b32.xlu2 %v1750_v17, %s1827_s28 }
 0x459   : > { %v849_v36 = vpop.xlane.xlu0 %848 }
 0x45a   : > { %1790 = vrcp.f32 %v849_v36  ;;  %v1759_v36 = vunpack.c.l.bf16 %v1758_v32 }
 0x460   : > { %v1791_v37 = vpop.eup %1790 }
 0x461   : > { %v851_v38 = vmul.f32 %v1791_v37, %v1785_v21  ;;  %v1760_v37 = vunpack.c.h.bf16 %v1758_v32 }
 0x463   : > { %v852_v39 = vpack.c.bf16 %v851_v38, %v851_v38  ;;  %v1022_v38 = vunpack.c.l.bf16 %v560_v34 }
 0x465   : > { %1684 = vmatmul.msk.bf16.vlgmr.msra.gmra.mxu2 %vm661_vm1, %v852_v39  ;;  %v1023_v39 = vunpack.c.h.bf16 %v560_v34 }
 0x49b   : > { %v926_v42 = vpop.xlane.xlu2 %925 }
 0x49c   : > { %1792 = vrcp.f32 %v926_v42 }
 0x49d   : > { %1794 = vrcp.f32 %v1831_v16 }
 0x4a2   : > { %v1793_v43 = vpop.eup %1792 }
 0x4a3   : > { %v928_v44 = vmul.f32 %v1793_v43, %v1787_v27  ;;  %v931_v45 = vpop.permute.xlu2 %930  ;;  %v1026_v43 = vadd.f32 %v1759_v36, %v1022_v38 }
 0x4a4   : > { %v936_v46 = vsel %vm696_vm2, %v931_v45, 0 }
 0x4a5   : > { %v929_v47 = vpack.c.bf16 %v928_v44, %v928_v44  ;;  %945 = vmatpush.bf16.msrb.mxu1 %v936_v46  ;;  %v1027_v44 = vadd.f32 %v1760_v37, %v1023_v39  ;;  %v1004_v46 = vperm.slane %v2028_v1, 1 }
 0x4a7   : > { %v1028_v51 = vpack.c.bf16 %v1027_v44, %v1026_v43 }
 0x4a8   : > { %1687 = vmatmul.msk.bf16.vlgmr.msrb.gmra.mxu1 %vm661_vm1, %v929_v47 }
 0x4ab   : > { %v1062_v47 = vpop.permute.xlu2 %1061 }
 0x4b6   : > { %v775_v48 = vpop.f32.mrf.mxu2 }
 0x4b7   : > { %v779_v49 = vpack.c.bf16 %v775_v48, %v775_v48 }
 0x4b9   : > { %1681 = vmatmul.msk.bf16.vlgmr.msrb.gmra.mxu3 %vm661_vm1, %v779_v49  ;;  %v1006_v49 = vperm.slane %v2028_v1, 2 }
 0x4ba   : > { %1053 = vmatpush.bf16.msrb.mxu3 %v1750_v17 }
 0x4be   : > { %v777_v50 = vpop.f32.mrf.mxu2  ;;  %1054 = vmatpush.bf16.msrb.mxu3 %v1749_v2 }
 0x4e8   : > { %v870_v53 = vpop.f32.mrf.mxu2 }
 0x4e9   : > { %v874_v54 = vpack.c.bf16 %v870_v53, %v870_v53 }
 0x4eb   : > { %1685 = vmatmul.msk.bf16.vlgmr.msra.gmra.mxu3 %vm661_vm1, %v874_v54 }
 0x4f0   : > { %v872_v55 = vpop.f32.mrf.mxu2 }
 0x525   : > { %v947_v58 = vpop.f32.mrf.mxu1 }
 0x526   : > { %v951_v59 = vpack.c.bf16 %v947_v58, %v947_v58 }
 0x528   : > { %1688 = vmatmul.msk.bf16.vlgmr.msrb.gmra.mxu2 %vm661_vm1, %v951_v59  ;;  %v1068_v59 = vpop.permute.xlu2 %1067 }
 0x52d   : > { %v949_v60 = vpop.f32.mrf.mxu1 }
 0x53c   : > { %v795_v61 = vpop.f32.mrf.mxu3 }
 0x53d   : > { %v815_v6 = vadd.f32 %v1995_v13, %v795_v61  ;;  %v1795_v13 = vpop.eup %1794 }
 0x53e   : > { %v979_v18 = vmul.f32 32.0, %v1795_v13  ;;  %vm983_vm3 = vweird.f32 %v1795_v13 }
 0x540   : > { %v980_v19 = vsub.f32 1.0, %v979_v18  ;;  %v1095_v18 = vpop.permute.xlu2 %1094 }
 0x541   : > { %1110 = vmatpush.bf16.msra.mxu1 %v1095_v18 }
 0x542   : > { %v981_v20 = vmul.f32 %v1795_v13, %v980_v19 }
 0x544   : > { %v797_v62 = vpop.f32.mrf.mxu3  ;;  %v982_v21 = vadd.f32 %v1795_v13, %v981_v20  ;;  %v1746_v20 = vld [vmem:[%s2058_s23] sm:$0xff] }
 0x56e   : > { %v890_v63 = vpop.f32.mrf.mxu3 }
 0x56f   : > { %v894_v7 = vadd.f32 %v890_v63, %v815_v6 }
 0x576   : > { %v892_v0 = vpop.f32.mrf.mxu3 }
 0x5ab   : > { %v967_v9 = vpop.f32.mrf.mxu2 }
 0x5ac   : > { %v971_v10 = vadd.f32 %v967_v9, %v894_v7 }
 0x5ae   : > { %v973_v11 = vadd.f32 %v972_v8, %v971_v10 }
 0x5b0   : > { %v974_v12 = vadd.f32 %v973_v11, %v574_v4  ;;  %v2041_v4 = vsel %vm983_vm3, %v1795_v13, %v982_v21 }
 0x5b2   : > { %v975_v14 = vsel %vm593_vm0, %v974_v12, 0.0 }
 0x5b3   : > { %v969_v15 = vpop.f32.mrf.mxu2  ;;  %976 = vadd.xlane.f32.xlu1 %v975_v14 }
 0x5cc   : > { %1098 = vrot.lane.b32.xlu1 %v1776_v30, %s1827_s28 }
 0x626   : > { %v977_v22 = vpop.xlane.xlu1 %976 }
 0x627   : > { %v985_v23 = vmul.f32 %v2041_v4, %v977_v22 }
 0x629   : > { %v986_v24 = vsub.f32 %v974_v12, %v985_v23 }
 0x62b   : > { %v987_v25 = vmul.f32 %v986_v24, %v986_v24 }
 0x62d   : > { %v988_v26 = vsel %vm593_vm0, %v987_v25, 0.0 }
 0x62e   : > { %989 = vadd.xlane.f32.xlu0 %v988_v26 }
 0x63e   : > { %v1099_v15 = vpop.permute.xlu1 %1098 }
 0x642   : > { %1063 = vrot.lane.b32.xlu0 %v1750_v17, %s1826_s27  ;;  %s2199_s27 = smov 104  }
 0x64a   : > { %1092 = vrot.lane.b32.xlu0 %v1749_v2, %s1827_s28  ;;  %s2200_s28 = sshll.u32 %s2202_s22, 2 }
 0x64b   : > { %s556_s0 = scalar_lea.vmem %s2193_s16, %s2200_s28 }
 0x6a1   : > { %v990_v27 = vpop.xlane.xlu0 %989 }
 0x6a2   : > { %v991_v28 = vmul.f32 %v990_v27, %v2041_v4 }
 0x6a4   : > { %v992_v29 = vadd.f32 1e-05, %v991_v28 }
 0x6a6   : > { %1796 = vrsqrt.f32 %v992_v29  ;;  %vm999_vm5 = vweird.f32 %v992_v29 }
 0x6ac   : > { %v1797_v31 = vpop.eup %1796 }
 0x6ad   : > { %v994_v33 = vmul.f32 %v1797_v31, %v992_v29  ;;  %vm1000_vm4 = vweird.f32 %v1797_v31 }
 0x6ae   : > { %vm1001_vm6 = vmor %vm999_vm5, %vm1000_vm4 }
 0x6af   : > { %v995_v35 = vmul.f32 %v1797_v31, %v994_v33 }
 0x6b1   : > { %v996_v40 = vmul.f32 0.5, %v995_v35 }
 0x6b3   : > { %v997_v41 = vsub.f32 1.5, %v996_v40 }
 0x6b4   : > { %v1064_v42 = vpop.permute.xlu0 %1063 }
 0x6b5   : > { %v998_v45 = vmul.f32 %v1797_v31, %v997_v41  ;;  %1079 = vmatpush.bf16.msra.mxu0 %v1064_v42 }
 0x6b7   : > { %v1002_v48 = vsel %vm1001_vm6, %v1797_v31, %v998_v45 }
 0x6b8   : > { %v1003_v50 = vmul.f32 %v1002_v48, %v986_v24 }
 0x6b9   : > { %1080 = vmatpush.bf16.msra.mxu0 %v1062_v47  ;;  %v1014_v47 = vld [vmem:[%s2187_s10] sm:$0xf] }
 0x6ba   : > { %v1005_v52 = vmul.f32 %v1004_v46, %v1003_v50  ;;  %v1264_v48 = vsel %vm696_vm2, %v1014_v47, 0 }
 0x6bc   : > { %v2067_v53 = vadd.f32 %v1006_v49, %v1005_v52  ;;  %1698 = vmatmul.msk.bf16.vlgmr.msra.gmra.mxu0 %vm593_vm0, %v1028_v51  ;;  %v1093_v19 = vpop.permute.xlu0 %1092 }
 0x6bd   : > { %1111 = vmatpush.bf16.msra.mxu1 %v1093_v19 }
 0x6be   : > { %v1018_v54 = vpack.c.bf16 %v2067_v53, %v2067_v53 }
 0x6c0   : > { %v1019_v55 = vunpack.c.l.bf16 %v1018_v54  ;;  %1703 = vmatmul.msk.bf16.vlgmr.msra.gmra.mxu1 %vm593_vm0, %v1746_v20 }
 0x6c2   : > { %v1020_v56 = vadd.f32 %v1019_v55, %v575_v5 }
 0x6c4   : > { %v1021_v57 = vpack.c.bf16 %v1020_v56, %v1020_v56 }
 0x6c6   : > { %1697 = vmatmul.msk.bf16.vlgmr.msrb.gmra.mxu3 %vm593_vm0, %v1021_v57 }
 0x739   : > { %v1082_v58 = vpop.f32.mrf.mxu0 }
 0x73a   : > { %v1083_v60 = vadd.f32 %v1082_v58, %v1068_v59 }
 0x73c   : > { %v1119_v62 = vpack.c.bf16 %v1083_v60, %v1083_v60 }
 0x73d   : > { %v1113_v34 = vpop.f32.mrf.mxu1 }
 0x73e   : > { %v1125_v1 = vunpack.c.l.b16 %v1119_v62  ;;  %v1114_v35 = vadd.f32 %v1113_v34, %v1099_v15 }
 0x740   : > { %v1121_v36 = vpack.c.bf16 %v1114_v35, %v1114_v35 }
 0x741   : > { %v1084_v61 = vpop.f32.mrf.mxu0 }
 0x742   : > { %v1085_v63 = vadd.f32 %v1084_v61, %v1068_v59  ;;  %v1162_v39 = vunpack.c.l.b16 %v1121_v36 }
 0x744   : > { %v1120_v0 = vpack.c.bf16 %v1085_v63, %v1085_v63 }
 0x745   : > { %v1115_v37 = vpop.f32.mrf.mxu1 }
 0x746   : > { %v1126_v6 = vunpack.c.l.b16 %v1120_v0  ;;  %v1116_v38 = vadd.f32 %v1115_v37, %v1099_v15 }
 0x748   : > { %v1127_v7 = vpack.c.b16 %v1126_v6, %v1125_v1  ;;  %v1122_v40 = vpack.c.bf16 %v1116_v38, %v1116_v38 }
 0x749   : > { %v1056_v8 = vpop.f32.mrf.mxu3 }
 0x74a   : > { %v1057_v9 = vadd.f32 %v1776_v30, %v1056_v8  ;;  %1188 = vrot.lane.b32.xlu1 %v1127_v7, %s1828_s25  ;;  %v1132_v3 = vsel %vm661_vm1, %v1127_v7, 0  ;;  %v1163_v41 = vunpack.c.l.b16 %v1122_v40 }
 0x74b   : > { %1141 = vmatpush.bf16.xpose.msra.mxu2 %v1132_v3  ;;  %v1015_v3 = vld [vmem:[%s2187_s10 + $0x4] sm:$0xf] }
 0x74c   : > { %v1060_v5 = vmul.f32 0.35355338, %v1057_v9  ;;  %v2092_v42 = vpack.c.b16 %v1163_v41, %v1162_v39 }
 0x74e   : > { %v1118_v10 = vpack.c.bf16 %v1060_v5, %v1060_v5  ;;  %1176 = vmatpush.bf16.msra.mxu3 %v2092_v42  ;;  %v1245_v5 = vsel %vm696_vm2, %v1015_v3, 0  ;;  %v1755_v3 = vld [vmem:[%s2191_s14 + $0x10] sm:$0xff] }
 0x750   : > { %v1184_v11 = vunpack.c.l.b16 %v1118_v10 }
 0x751   : > { %v1058_v12 = vpop.f32.mrf.mxu3 }
 0x752   : > { %1704 = vmatmul.msk.bf16.vlgmr.msra.gmra.mxu2 %vm661_vm1, %v1118_v10  ;;  %v1185_v14 = vpack.c.b16 %v1184_v11, %v1184_v11  ;;  %1273 = vmatpush.bf16.msrb.mxu3 %v1264_v48 }
 0x753   : > { %1254 = vmatpush.bf16.msrb.mxu2 %v1245_v5 }
 0x754   : > { %1186 = vrot.lane.b32.xlu1 %v1185_v14, %s1828_s25 }
 0x75c   : > { %1279 = vrot.lane.b32.xlu1 %v1185_v14, %s1829_s26 }
 0x764   : > { %1354 = vrot.lane.b32.xlu1 %v1185_v14, %s2199_s27 }
 0x7bc   : > { %v1189_v16 = vpop.permute.xlu1 %1188 }
 0x7bd   : > { %v1194_v17 = vsel %vm661_vm1, %v1189_v16, 0 }
 0x7be   : > { %1203 = vmatpush.bf16.xpose.msrb.mxu0 %v1194_v17 }
 0x7c6   : > { %v1187_v13 = vpop.permute.xlu1 %1186 }
 0x7c7   : > { %1706 = vmatmul.msk.bf16.vlgmr.msrb.gmra.mxu0 %vm661_vm1, %v1187_v13 }
 0x7ce   : > { %v1280_v33 = vpop.permute.xlu1 %1279 }
 0x7d5   : > { %v1143_v21 = vpop.f32.mrf.mxu2 }
 0x7d6   : > { %v1148_v2 = vsel %vm1147_vm7, %v1143_v21, -inf  ;;  %v1355_v43 = vpop.permute.xlu1 %1354 }
 0x7d7   : > { %1149 = vmax.xlane.f32.xlu2 %v1148_v2 }
 0x7dd   : > { %v1145_v22 = vpop.f32.mrf.mxu2 }
 0x7ef   : > { %1281 = vrot.lane.b32.xlu2 %v1127_v7, %s1829_s26 }
 0x844   : > { %v1205_v23 = vpop.f32.mrf.mxu0 }
 0x845   : > { %v1209_v24 = vsel %vm1147_vm7, %v1205_v23, -inf }
 0x846   : > { %1210 = vmax.xlane.f32.xlu1 %v1209_v24 }
 0x84a   : > { %v1150_v25 = vpop.xlane.xlu2 %1149 }
 0x84b   : > { %v1151_v26 = vsub.f32 %v1143_v21, %v1150_v25 }
 0x84c   : > { %v1207_v27 = vpop.f32.mrf.mxu0 }
 0x84d   : > { %v1152_v28 = vmul.f32 1.442695, %v1151_v26 }
 0x84f   : > { %1798 = vpow2.f32 %v1152_v28 }
 0x852   : > { %v1282_v29 = vpop.permute.xlu2 %1281 }
 0x853   : > { %v1287_v30 = vsel %vm661_vm1, %v1282_v29, 0 }
 0x854   : > { %1296 = vmatpush.bf16.xpose.msra.mxu0 %v1287_v30 }
 0x855   : > { %v1799_v31 = vpop.eup %1798 }
 0x856   : > { %v1154_v32 = vsel %vm1147_vm7, %v1799_v31, 0.0 }
 0x857   : > { %1155 = vadd.xlane.f32.xlu0 %v1154_v32 }
 0x85b   : > { %1710 = vmatmul.msk.bf16.vlgmr.msra.gmra.mxu0 %vm661_vm1, %v1280_v33  ;;  %v1016_v33 = vld [vmem:[%s2187_s10 + $0x8] sm:$0xf] }
 0x85c   : > { %v1338_v34 = vsel %vm696_vm2, %v1016_v33, 0 }
 0x85d   : > { %1347 = vmatpush.bf16.msra.mxu2 %v1338_v34 }
 0x86b   : > { %1356 = vrot.lane.b32.xlu0 %v1127_v7, %s2199_s27 }
 0x8b9   : > { %v1211_v44 = vpop.xlane.xlu1 %1210 }
 0x8ba   : > { %v1212_v45 = vsub.f32 %v1205_v23, %v1211_v44 }
 0x8bc   : > { %v1213_v46 = vmul.f32 1.442695, %v1212_v45 }
 0x8be   : > { %1800 = vpow2.f32 %v1213_v46 }
 0x8c4   : > { %v1801_v49 = vpop.eup %1800 }
 0x8c5   : > { %v1215_v50 = vsel %vm1147_vm7, %v1801_v49, 0.0 }
 0x8c6   : > { %1216 = vadd.xlane.f32.xlu1 %v1215_v50 }
 0x8ca   : > { %v1156_v51 = vpop.xlane.xlu0 %1155 }
 0x8cb   : > { %1802 = vrcp.f32 %v1156_v51 }
 0x8d1   : > { %v1803_v52 = vpop.eup %1802 }
 0x8d2   : > { %v1158_v54 = vmul.f32 %v1803_v52, %v1799_v31  ;;  %v1008_v52 = vld [vmem:[%s2188_s11] sm:$0x7] }
 0x8d4   : > { %v1159_v55 = vpack.c.bf16 %v1158_v54, %v1158_v54  ;;  %v1429_v54 = vperm.slane %v1008_v52, 0 }
 0x8d6   : > { %1705 = vmatmul.msk.bf16.vlgmr.msra.gmra.mxu3 %vm1147_vm7, %v1159_v55 }
 0x8d8   : > { %v1298_v56 = vpop.f32.mrf.mxu0 }
 0x8d9   : > { %v1302_v57 = vsel %vm1147_vm7, %v1298_v56, -inf }
 0x8da   : > { %1303 = vmax.xlane.f32.xlu0 %v1302_v57 }
 0x8dd   : > { %v1357_v58 = vpop.permute.xlu0 %1356 }
 0x8de   : > { %v1362_v59 = vsel %vm661_vm1, %v1357_v58, 0 }
 0x8df   : > { %1371 = vmatpush.bf16.xpose.msra.mxu3 %v1362_v59 }
 0x8e0   : > { %v1300_v60 = vpop.f32.mrf.mxu0 }
 0x8ee   : > { %1221 = vrot.lane.b32.xlu0 %v2092_v42, %s1828_s25 }
 0x939   : > { %v1217_v61 = vpop.xlane.xlu1 %1216 }
 0x93a   : > { %1804 = vrcp.f32 %v1217_v61 }
 0x940   : > { %v1805_v1 = vpop.eup %1804 }
 0x941   : > { %v1219_v6 = vmul.f32 %v1805_v1, %v1801_v49 }
 0x943   : > { %v1220_v9 = vpack.c.bf16 %v1219_v6, %v1219_v6  ;;  %v1752_v6 = vld [vmem:[%s2189_s12 + $0x8] sm:$0xff] }
 0x94d   : > { %v1304_v62 = vpop.xlane.xlu0 %1303 }
 0x94e   : > { %v1305_v14 = vsub.f32 %v1298_v56, %v1304_v62 }
 0x950   : > { %v1306_v17 = vmul.f32 1.442695, %v1305_v14 }
 0x952   : > { %1806 = vpow2.f32 %v1306_v17  ;;  %v1454_v17 = vperm.slane %v1008_v52, 1 }
 0x958   : > { %v1807_v19 = vpop.eup %1806 }
 0x959   : > { %v1178_v63 = vpop.f32.mrf.mxu3  ;;  %v1308_v21 = vsel %vm1147_vm7, %v1807_v19, 0.0 }
 0x95a   : > { %v1182_v0 = vpack.c.bf16 %v1178_v63, %v1178_v63 }
 0x95c   : > { %1709 = vmatmul.msk.bf16.vlgmr.msrb.gmra.mxu3 %vm661_vm1, %v1182_v0 }
 0x960   : > { %v1222_v7 = vpop.permute.xlu0 %1221 }
 0x961   : > { %v1180_v8 = vpop.f32.mrf.mxu3  ;;  %1234 = vmatpush.bf16.msrb.mxu1 %v1222_v7  ;;  %v1756_v7 = vld [vmem:[%s2191_s14 + $0x18] sm:$0xff] }
 0x962   : > { %1539 = vmatpush.bf16.msrb.mxu3 %v1756_v7 }
 0x964   : > { %1707 = vmatmul.msk.bf16.vlgmr.msrb.gmra.mxu1 %vm1147_vm7, %v1220_v9 }
 0x966   : > { %1540 = vmatpush.bf16.msrb.mxu3 %v1755_v3 }
 0x96c   : > { %1713 = vmatmul.msk.bf16.vlgmr.msra.gmra.mxu3 %vm661_vm1, %v1355_v43 }
 0x9df   : > { %v1275_v10 = vpop.f32.mrf.mxu3 }
 0x9e1   : > { %v1236_v11 = vpop.f32.mrf.mxu1 }
 0x9e2   : > { %v1240_v12 = vpack.c.bf16 %v1236_v11, %v1236_v11 }
 0x9e4   : > { %1708 = vmatmul.msk.bf16.vlgmr.msrb.gmra.mxu2 %vm661_vm1, %v1240_v12 }
 0x9e5   : > { %1497 = vmatpush.bf16.msrb.mxu2 %v1752_v6 }
 0x9e7   : > { %v1277_v15 = vpop.f32.mrf.mxu3 }
 0x9e9   : > { %v1238_v16 = vpop.f32.mrf.mxu1 }
 0x9ef   : > { %v1373_v13 = vpop.f32.mrf.mxu3 }
 0x9f0   : > { %v1377_v18 = vsel %vm1147_vm7, %v1373_v13, -inf }
 0x9f1   : > { %1378 = vmax.xlane.f32.xlu2 %v1377_v18  ;;  %v1456_v18 = vperm.slane %v1008_v52, 2 }
 0x9f7   : > { %v1375_v20 = vpop.f32.mrf.mxu3 }
 0x9f9   : > { %1309 = vadd.xlane.f32.xlu2 %v1308_v21 }
 0xa11   : > { %1314 = vrot.lane.b32.xlu2 %v2092_v42, %s1829_s26 }
 0xa64   : > { %v1379_v2 = vpop.xlane.xlu2 %1378 }
 0xa65   : > { %v1380_v22 = vsub.f32 %v1373_v13, %v1379_v2 }
 0xa67   : > { %v1381_v23 = vmul.f32 1.442695, %v1380_v22  ;;  %v1256_v24 = vpop.f32.mrf.mxu2  ;;  %v1754_v22 = vld [vmem:[%s2191_s14 + $0x8] sm:$0xff] }
 0xa68   : > { %v1276_v45 = vadd.f32 %v1275_v10, %v1256_v24  ;;  %1541 = vmatpush.bf16.msrb.mxu3 %v1754_v22  ;;  %v1777_v24 = vld [vmem:[%s2190_s13] ss:$0 sm:$0xff] }
 0xa69   : > { %1808 = vpow2.f32 %v1381_v23  ;;  %v1753_v23 = vld [vmem:[%s2191_s14] sm:$0xff] }
 0xa6c   : > { %v1310_v25 = vpop.xlane.xlu2 %1309  ;;  %1542 = vmatpush.bf16.msrb.mxu3 %v1753_v23 }
 0xa6d   : > { %1810 = vrcp.f32 %v1310_v25 }
 0xa6f   : > { %v1809_v26 = vpop.eup %1808  ;;  %v1258_v27 = vpop.f32.mrf.mxu2 }
 0xa70   : > { %v1383_v28 = vsel %vm1147_vm7, %v1809_v26, 0.0 }
 0xa71   : > { %1384 = vadd.xlane.f32.xlu1 %v1383_v28 }
 0xa73   : > { %v1811_v29 = vpop.eup %1810 }
 0xa74   : > { %v1312_v30 = vmul.f32 %v1811_v29, %v1807_v19  ;;  %v1315_v31 = vpop.permute.xlu2 %1314 }
 0xa75   : > { %1327 = vmatpush.bf16.msra.mxu1 %v1315_v31 }
 0xa76   : > { %v1313_v32 = vpack.c.bf16 %v1312_v30, %v1312_v30  ;;  %v1458_v30 = vld [vmem:[%s2192_s15] sm:$0x7] }
 0xa77   : > { %v1506_v31 = vperm.slane %v1458_v30, 0 }
 0xa78   : > { %1711 = vmatmul.msk.bf16.vlgmr.msra.gmra.mxu1 %vm1147_vm7, %v1313_v32 }
 0xa8a   : > { %1389 = vrot.lane.b32.xlu1 %v2092_v42, %s2199_s27  ;;  %v1017_v42 = vld [vmem:[%s2187_s10 + $0xc] sm:$0xf] }
 0xa8b   : > { %v1413_v44 = vsel %vm696_vm2, %v1017_v42, 0 }
 0xa8c   : > { %1422 = vmatpush.bf16.msrb.mxu1 %v1413_v44 }
 0xae4   : > { %v1385_v35 = vpop.xlane.xlu1 %1384 }
 0xae5   : > { %1812 = vrcp.f32 %v1385_v35 }
 0xaeb   : > { %v1813_v38 = vpop.eup %1812 }
 0xaec   : > { %v1387_v39 = vmul.f32 %v1813_v38, %v1809_v26 }
 0xaee   : > { %v1388_v43 = vpack.c.bf16 %v1387_v39, %v1387_v39 }
 0xaf5   : > { %v1329_v36 = vpop.f32.mrf.mxu1 }
 0xaf6   : > { %v1333_v37 = vpack.c.bf16 %v1329_v36, %v1329_v36 }
 0xaf8   : > { %1712 = vmatmul.msk.bf16.vlgmr.msra.gmra.mxu2 %vm661_vm1, %v1333_v37 }
 0xafc   : > { %v1390_v40 = vpop.permute.xlu1 %1389 }
 0xafd   : > { %v1331_v41 = vpop.f32.mrf.mxu1  ;;  %1402 = vmatpush.bf16.msrb.mxu0 %v1390_v40 }
 0xb00   : > { %1714 = vmatmul.msk.bf16.vlgmr.msrb.gmra.mxu0 %vm1147_vm7, %v1388_v43 }
 0xb7b   : > { %v1349_v46 = vpop.f32.mrf.mxu2 }
 0xb7c   : > { %v1353_v47 = vadd.f32 %v1349_v46, %v1276_v45 }
 0xb7d   : > { %v1404_v48 = vpop.f32.mrf.mxu0 }
 0xb7e   : > { %v1408_v49 = vpack.c.bf16 %v1404_v48, %v1404_v48 }
 0xb80   : > { %1715 = vmatmul.msk.bf16.vlgmr.msrb.gmra.mxu1 %vm661_vm1, %v1408_v49 }
 0xb83   : > { %v1351_v50 = vpop.f32.mrf.mxu2 }
 0xb85   : > { %v1406_v51 = vpop.f32.mrf.mxu0 }
 0xb86   : > { %v1571_v51 = vperm.slane %v1458_v30, 1 }
 0xbfd   : > { %v1424_v55 = vpop.f32.mrf.mxu1 }
 0xbfe   : > { %v1428_v56 = vadd.f32 %v1424_v55, %v1353_v47 }
 0xc00   : > { %v1430_v57 = vadd.f32 %v1429_v54, %v1428_v56  ;;  %v1573_v54 = vperm.slane %v1458_v30, 2 }
 0xc02   : > { %v1431_v58 = vadd.f32 %v1430_v57, %v2067_v53  ;;  %v1751_v53 = vld [vmem:[%s2189_s12] sm:$0xff] }
 0xc03   : > { %1498 = vmatpush.bf16.msrb.mxu2 %v1751_v53 }
 0xc04   : > { %v1432_v59 = vsel %vm593_vm0, %v1431_v58, 0.0 }
 0xc05   : > { %v1426_v60 = vpop.f32.mrf.mxu1  ;;  %1433 = vadd.xlane.f32.xlu0 %v1432_v59 }
 0xc78   : > { %v1434_v61 = vpop.xlane.xlu0 %1433 }
 0xc79   : > { %v1435_v62 = vmul.f32 %v1434_v61, %v2041_v4 }
 0xc7b   : > { %v1436_v63 = vsub.f32 %v1431_v58, %v1435_v62 }
 0xc7d   : > { %v1437_v0 = vmul.f32 %v1436_v63, %v1436_v63 }
 0xc7f   : > { %v1438_v1 = vsel %vm593_vm0, %v1437_v0, 0.0 }
 0xc80   : > { %1439 = vadd.xlane.f32.xlu2 %v1438_v1 }
 0xcf3   : > { %v1440_v8 = vpop.xlane.xlu2 %1439 }
 0xcf4   : > { %v1441_v9 = vmul.f32 %v1440_v8, %v2041_v4 }
 0xcf6   : > { %v1442_v5 = vadd.f32 1e-05, %v1441_v9 }
 0xcf8   : > { %1814 = vrsqrt.f32 %v1442_v5  ;;  %vm1449_vm9 = vweird.f32 %v1442_v5 }
 0xcfe   : > { %v1815_v10 = vpop.eup %1814 }
 0xcff   : > { %v1444_v11 = vmul.f32 %v1815_v10, %v1442_v5  ;;  %vm1450_vm8 = vweird.f32 %v1815_v10 }
 0xd00   : > { %vm1451_vm10 = vmor %vm1449_vm9, %vm1450_vm8 }
 0xd01   : > { %v1445_v12 = vmul.f32 %v1815_v10, %v1444_v11 }
 0xd03   : > { %v1446_v14 = vmul.f32 0.5, %v1445_v12 }
 0xd05   : > { %v1447_v15 = vsub.f32 1.5, %v1446_v14 }
 0xd07   : > { %v1448_v16 = vmul.f32 %v1815_v10, %v1447_v15 }
 0xd09   : > { %v1452_v13 = vsel %vm1451_vm10, %v1815_v10, %v1448_v16 }
 0xd0a   : > { %v1453_v19 = vmul.f32 %v1452_v13, %v1436_v63 }
 0xd0c   : > { %v1455_v20 = vmul.f32 %v1454_v17, %v1453_v19 }
 0xd0e   : > { %v1457_v21 = vadd.f32 %v1456_v18, %v1455_v20 }
 0xd10   : > { %v1472_v2 = vpack.c.bf16 %v1457_v21, %v1457_v21 }
 0xd12   : > { %1724 = vmatmul.msk.bf16.vlgmr.msrb.gmra.mxu2 %vm593_vm0, %v1472_v2 }
 0xd95   : > { %v1500_v25 = vpop.f32.mrf.mxu2 }
 0xd96   : > { %v1501_v26 = vadd.f32 %v1777_v24, %v1500_v25 }
 0xd98   : > { %v1504_v27 = vmax.f32 %v1501_v26, 0.0 }
 0xd9a   : > { %v1505_v28 = vpack.c.bf16 %v1504_v27, %v1504_v27 }
 0xd9c   : > { %1741 = vmatmul.msk.bf16.vlgmr.msrb.gmra.mxu3 %vm1531_vm11, %v1505_v28 }
 0xd9d   : > { %v1502_v29 = vpop.f32.mrf.mxu2 }
 0xe1f   : > { %v1544_v32 = vpop.f32.mrf.mxu3 }
 0xe20   : > { %v1545_v33 = vadd.f32 %v1544_v32, %v1506_v31 }
 0xe22   : > { %v1548_v34 = vadd.f32 %v1545_v33, %v1457_v21 }
 0xe24   : > { %v1549_v35 = vsel %vm593_vm0, %v1548_v34, 0.0 }
 0xe25   : > { %1550 = vadd.xlane.f32.xlu1 %v1549_v35 }
 0xe27   : > { %v1546_v36 = vpop.f32.mrf.mxu3 }
 0xe98   : > { %v1551_v37 = vpop.xlane.xlu1 %1550 }
 0xe99   : > { %v1552_v38 = vmul.f32 %v1551_v37, %v2041_v4 }
 0xe9b   : > { %v1553_v39 = vsub.f32 %v1548_v34, %v1552_v38 }
 0xe9d   : > { %v1554_v40 = vmul.f32 %v1553_v39, %v1553_v39 }
 0xe9f   : > { %v1555_v41 = vsel %vm593_vm0, %v1554_v40, 0.0 }
 0xea0   : > { %1556 = vadd.xlane.f32.xlu0 %v1555_v41 }
 0xf13   : > { %v1557_v43 = vpop.xlane.xlu0 %1556 }
 0xf14   : > { %v1558_v42 = vmul.f32 %v1557_v43, %v2041_v4 }
 0xf16   : > { %v1559_v44 = vadd.f32 1e-05, %v1558_v42 }
 0xf18   : > { %1816 = vrsqrt.f32 %v1559_v44  ;;  %vm1566_vm13 = vweird.f32 %v1559_v44 }
 0xf1e   : > { %v1817_v45 = vpop.eup %1816 }
 0xf1f   : > { %v1561_v46 = vmul.f32 %v1817_v45, %v1559_v44  ;;  %vm1567_vm12 = vweird.f32 %v1817_v45 }
 0xf20   : > { %vm1568_vm14 = vmor %vm1566_vm13, %vm1567_vm12 }
 0xf21   : > { %v1562_v47 = vmul.f32 %v1817_v45, %v1561_v46 }
 0xf23   : > { %v1563_v48 = vmul.f32 0.5, %v1562_v47 }
 0xf25   : > { %v1564_v49 = vsub.f32 1.5, %v1563_v48 }
 0xf27   : > { %v1565_v50 = vmul.f32 %v1817_v45, %v1564_v49 }
 0xf29   : > { %v1569_v52 = vsel %vm1568_vm14, %v1817_v45, %v1565_v50 }
 0xf2a   : > { %v1570_v55 = vmul.f32 %v1569_v52, %v1553_v39 }
 0xf2c   : > { %v1572_v56 = vmul.f32 %v1571_v51, %v1570_v55 }
 0xf2e   : > { %v1574_v57 = vadd.f32 %v1573_v54, %v1572_v56 }
 0xf30   : > { %v1575_v4 = vpack.c.bf16 %v1574_v57, %v1574_v57 }
 0xf32   : > { %1577 = vst.msk [vmem:[%s556_s0] sm:$0xf] %vm1576_vm15, %v1575_v4 }
 0xf33 PF: > { %s26_s21 = sadd.s32 1, %s1824_s21  }
 0xf34   : > { %p23_p4 = scmp.ge.s32.totalorder %s26_s21, 4  }
 0xf36   :  { %25 = sbr.rel (!%p23_p4) target bundleno = 2 (0x2), region = 120 }

// kernel: detr_forward.10
= control target key start
LH: loop header
LB: loop body
LE: loop exit
PB: predicated region body
PF: predicated region fallthrough
CT: control target
= control target key end

     0   :  { %s2413_s0 = inlined_call_operand.vmem [shape: bf16[2,8,32], index: 0, kind: input, shape index: {}]   ;;  %s2414_s1 = inlined_call_operand.vmem [shape: bf16[8,32], index: 1, kind: input, shape index: {}]   ;;  %s2415_s2 = inlined_call_operand.vmem [shape: bf16[2,16,32], index: 2, kind: input, shape index: {}]   ;;  %s2416_s3 = inlined_call_operand.vmem [shape: bf16[2,16,32], index: 3, kind: input, shape index: {}]   ;;  %s2417_s4 = inlined_call_operand.vmem [shape: bf16[32,96], index: 4, kind: input, shape index: {}]   ;;  %s2418_s5 = inlined_call_operand.hbm [shape: f32[1,96], index: 5, kind: input, shape index: {}]   ;;  %s2419_s6 = inlined_call_operand.vmem [shape: bf16[32,32], index: 6, kind: input, shape index: {}]   ;;  %s2420_s7 = inlined_call_operand.vmem [shape: f32[3,32], index: 7, kind: input, shape index: {}]   ;;  %s2421_s8 = inlined_call_operand.vmem [shape: bf16[32,96], index: 8, kind: input, shape index: {}]   ;;  %s2422_s9 = inlined_call_operand.hbm [shape: f32[1,96], index: 9, kind: input, shape index: {}]   ;;  %s2423_s10 = inlined_call_operand.vmem [shape: bf16[32,32], index: 10, kind: input, shape index: {}]   ;;  %s2424_s11 = inlined_call_operand.vmem [shape: f32[3,32], index: 11, kind: input, shape index: {}]   ;;  %s2425_s12 = inlined_call_operand.vmem [shape: bf16[32,64], index: 12, kind: input, shape index: {}]   ;;  %s2426_s13 = inlined_call_operand.hbm [shape: f32[1,64], index: 13, kind: input, shape index: {}]   ;;  %s2427_s14 = inlined_call_operand.vmem [shape: bf16[64,32], index: 14, kind: input, shape index: {}]   ;;  %s2428_s15 = inlined_call_operand.vmem [shape: f32[3,32], index: 15, kind: input, shape index: {}]   ;;  %s2429_s16 = inlined_call_operand.vmem [shape: bf16[2,8,32], index: 16, kind: output, shape index: {}]  }
   0x1   :  { %2430 = sst [smem:[#allocation9_spill]] %s2413_s0 }
   0x2   :  { %21 = vsyncpa [#allocation3], 0 }
   0x3   :  { %22 = vsyncpa [#allocation5], 0  ;;  %s2130_s21 = smov 0  }
   0x4 LB: > { %s449_s24 = sshll.u32 %s2422_s9, 4  ;;  %s2139_s25 = sadd.s32 4294967295, %s2034_s21   ;;  %s2034_s21 = sphi %s2130_s21, %s28_s21   ;;  %s450_s24 = int_to_ptr.hbm [resolvable:$true] %s449_s24 }
   0x5   : > { %p1732_p0 = scmp.ge.s32.totalorder %s2034_s21, 1  ;;  %p410_p1 = scmp.lt.s32.totalorder %s2034_s21, 3 }
   0x6   : > { %p1864_p2 = scmp.eq.s32.totalorder %s2139_s25, 0  ;;  %s2036_s27 = smov [#allocation4]  }
   0x7   : > { %p2144_p3 = pnand %p1732_p0, %p410_p1  ;;  %s451_s28 = sshll.u32 %s2036_s27, 4  ;;  %s452_s28 = int_to_ptr.vmem [resolvable:$true] %s451_s28 }
   0x8   : > { %s428_s0 = sshll.u32 %s2418_s5, 4  ;;  %s470_s19 = sshll.u32 %s2426_s13, 4  ;;  %s429_s0 = int_to_ptr.hbm [resolvable:$true] %s428_s0  ;;  %s471_s19 = int_to_ptr.hbm [resolvable:$true] %s470_s19 }
   0x9   : > { %p1854_p4 = pneg %p2144_p3  ;;  %s2037_s20 = smov [#allocation2]  }
   0xa   : > { %s430_s22 = sshll.u32 %s2037_s20, 4  ;;  %s2038_s23 = smov [#allocation6]   ;;  %s431_s22 = int_to_ptr.vmem [resolvable:$true] %s430_s22 }
   0xb   : > { %p1855_p5 = pnand %p1864_p2, %p1854_p4  ;;  %s472_s27 = sshll.u32 %s2038_s23, 4  ;;  %s473_s27 = int_to_ptr.vmem [resolvable:$true] %s472_s27 }
   0xc   : > { %514 = sbr.rel (%p2144_p3) target bundleno = 3899 (0xf3b), region = 84 }
   0xd   : > { %1860 = dma.hbm_to_vmem [thread:$0]  (!%p1855_p5), %s450_s24, 16, %s452_s28, [#allocation5]  }
   0xe   : > { %1857 = dma.hbm_to_vmem [thread:$0]  (!%p1855_p5), %s429_s0, 16, %s431_s22, [#allocation3]  }
   0xf   : > { %1863 = dma.hbm_to_vmem [thread:$0]  (!%p1855_p5), %s471_s19, 16, %s473_s27, [#allocation5]  }
  0x11   : > { %2025 = dma.done.wait (%p1864_p2), [#allocation3], 16  }
  0x12   : > { %2027 = vsyncadd (%p1864_p2), [#allocation3], 4294967280 }
  0x13   : > { %2029 = dma.done.wait (%p1864_p2), [#allocation5], 32  }
  0x14   : > { %2031 = vsyncadd (%p1864_p2), [#allocation5], 4294967264  ;;  %v1829_v0 = vld [vmem:[%s2417_s4 + $0x8] sm:$0xff]  ;;  %v1828_v1 = vld [vmem:[%s2417_s4] sm:$0xff]  ;;  %s2039_s30 = smov 96   ;;  %s2040_s0 = smov 64  }
  0x15   : > { %657 = vrot.lane.b32.xlu0 %v1829_v0, %s2039_s30  ;;  %647 = vmatpush.bf16.msra.mxu0 %v1829_v0  ;;  %p583_p6 = scmp.lt.s32.totalorder %s2139_s25, 1  ;;  %s2432_s20 = sld [smem:[#allocation9_spill]]  ;;  %v2192_v3 = vld [vmem:[%s2414_s1] sm:$0xf]  ;;  %vm637_vm0 = vcmask 261120   ;;  %vm705_vm1 = vcmask 64512  }
  0x16   : > { %677 = vrot.lane.b32.xlu2 %v1828_v1, %s2040_s0  ;;  %v619_v5 = vunpack.c.l.bf16 %v2192_v3  ;;  %v1887_v8 = vld [vmem:[#allocation2] ss:$0 sm:$0xff]  ;;  %s2041_s24 = smov 120   ;;  %s2042_s28 = smov 112   ;;  %vm740_vm2 = vcmask 1043456   ;;  %vm1191_vm7 = vcmask 130048  }
  0x17   : > { %s2434_s25 = smov (!%p583_p6, %s2139_s25), 1  ;;  %661 = vrot.lane.b32.xlu1 %v1887_v8, %s2039_s30  ;;  %s2043_s26 = smov 104   ;;  %v614_v56 = vld [vmem:[%s2419_s6] sm:$0xf]  ;;  %vm1575_vm11 = vcmask 523264   ;;  %vm1620_vm15 = vcmask 257024  }
  0x18   : > { %s1741_s17 = sshll.u32 %s2434_s25, 2  ;;  %v847_v57 = vsel %vm740_vm2, %v614_v56, 0  ;;  %v617_v56 = vld [vmem:[%s2419_s6 + $0xc] sm:$0xf]  ;;  %s1825_s29 = sshll.u32 %s2434_s25, 3 }
  0x19   : > { %648 = vmatpush.bf16.msra.mxu0 %v1828_v1  ;;  %s596_s27 = scalar_lea.vmem %s2416_s3, %s1825_s29 }
  0x1b   : > { %s586_s22 = scalar_lea.vmem %s2432_s20, %s1741_s17  ;;  %s2297_s20 = scalar_lea.vmem %s2415_s2, %s1825_s29 }
  0x1c   : > { %v2187_v2 = vld [vmem:[%s586_s22] sm:$0xf]  ;;  %s600_s29 = scalar_lea.vmem %s2429_s16, %s1741_s17 }
  0x1d   : > { %655 = vrot.lane.b32.xlu0 %v1828_v1, %s2039_s30  ;;  %v618_v4 = vunpack.c.l.bf16 %v2187_v2 }
  0x1f   : > { %v620_v6 = vadd.f32 %v619_v5, %v618_v4  ;;  %679 = vrot.lane.b32.xlu1 %v1829_v0, %s2040_s0 }
  0x21   : > { %v621_v7 = vpack.c.bf16 %v620_v6, %v620_v6 }
  0x23   : > { %1755 = vmatmul.msk.bf16.vlgmr.msra.gmra.mxu0 %vm637_vm0, %v621_v7 }
  0x27   : > { %683 = vrot.lane.b32.xlu1 %v1887_v8, %s2040_s0 }
  0x70   : > { %v678_v31 = vpop.permute.xlu2 %677 }
  0x87   : > { %v658_v9 = vpop.permute.xlu0 %657 }
  0x88   : > { %670 = vmatpush.bf16.msra.mxu1 %v658_v9 }
  0x89   : > { %v662_v14 = vpop.permute.xlu1 %661 }
  0x8f   : > { %v656_v10 = vpop.permute.xlu0 %655 }
  0x90   : > { %671 = vmatpush.bf16.msra.mxu1 %v656_v10 }
  0x91   : > { %v680_v25 = vpop.permute.xlu1 %679 }
  0x92   : > { %695 = vmatpush.bf16.msra.mxu2 %v680_v25 }
  0x93   : > { %1756 = vmatmul.msk.bf16.vlgmr.msra.gmra.mxu1 %vm637_vm0, %v621_v7 }
  0x96   : > { %696 = vmatpush.bf16.msra.mxu2 %v678_v31 }
  0x99   : > { %v684_v27 = vpop.permute.xlu1 %683  ;;  %1757 = vmatmul.msk.bf16.vlgmr.msra.gmra.mxu2 %vm637_vm0, %v2187_v2  ;;  %v1830_v2 = vld [vmem:[%s2421_s8] sm:$0xff] }
  0xa0   : > { %v650_v11 = vpop.f32.mrf.mxu0 }
  0xa1   : > { %v651_v13 = vadd.f32 %v1887_v8, %v650_v11 }
  0xa3   : > { %v654_v16 = vmul.f32 0.35355338, %v651_v13 }
  0xa5   : > { %v702_v19 = vpack.c.bf16 %v654_v16, %v654_v16 }
  0xa7   : > { %v759_v24 = vunpack.c.l.b16 %v702_v19 }
  0xa8   : > { %v652_v12 = vpop.f32.mrf.mxu0 }
  0xa9   : > { %v760_v26 = vpack.c.b16 %v759_v24, %v759_v24 }
 0x110   : > { %v673_v15 = vpop.f32.mrf.mxu1 }
 0x111   : > { %v674_v17 = vadd.f32 %v673_v15, %v662_v14 }
 0x113   : > { %v703_v18 = vpack.c.bf16 %v674_v17, %v674_v17 }
 0x115   : > { %v764_v20 = vunpack.c.l.b16 %v703_v18  ;;  %v710_v21 = vsel %vm705_vm1, %v703_v18, 0 }
 0x116   : > { %719 = vmatpush.bf16.xpose.msra.mxu3 %v710_v21 }
 0x117   : > { %v765_v22 = vpack.c.b16 %v764_v20, %v764_v20 }
 0x118   : > { %v675_v23 = vpop.f32.mrf.mxu1 }
 0x119   : > { %766 = vrot.lane.b32.xlu1 %v765_v22, %s2041_s24 }
 0x11c   : > { %v698_v46 = vpop.f32.mrf.mxu2 }
 0x11d   : > { %1758 = vmatmul.msk.bf16.vlgmr.msra.gmra.mxu3 %vm705_vm1, %v702_v19  ;;  %v699_v51 = vadd.f32 %v698_v46, %v684_v27 }
 0x11f   : > { %v704_v52 = vpack.c.bf16 %v699_v51, %v699_v51  ;;  %v616_v51 = vld [vmem:[%s2419_s6 + $0x8] sm:$0xf] }
 0x121   : > { %761 = vrot.lane.b32.xlu1 %v760_v26, %s2041_s24  ;;  %v800_v53 = vunpack.c.l.b16 %v704_v52  ;;  %v742_v55 = vsel %vm740_vm2, %v704_v52, 0  ;;  %v923_v52 = vsel %vm740_vm2, %v616_v51, 0 }
 0x122   : > { %751 = vmatpush.bf16.msrb.mxu0 %v742_v55 }
 0x123   : > { %v2223_v54 = vpack.c.b16 %v800_v53, %v800_v53 }
 0x124   : > { %v700_v50 = vpop.f32.mrf.mxu2 }
 0x126   : > { %856 = vmatpush.bf16.msra.mxu0 %v847_v57  ;;  %v1000_v57 = vsel %vm740_vm2, %v617_v56, 0 }
 0x129   : > { %864 = vrot.lane.b32.xlu1 %v765_v22, %s2042_s28 }
 0x131   : > { %862 = vrot.lane.b32.xlu1 %v760_v26, %s2042_s28 }
 0x139   : > { %939 = vrot.lane.b32.xlu1 %v760_v26, %s2043_s26 }
 0x18b   : > { %v767_v28 = vpop.permute.xlu1 %766 }
 0x18c   : > { %v772_v29 = vsel %vm705_vm1, %v767_v28, 0 }
 0x18d   : > { %781 = vmatpush.bf16.xpose.msrb.mxu1 %v772_v29 }
 0x193   : > { %v762_v30 = vpop.permute.xlu1 %761 }
 0x194   : > { %1760 = vmatmul.msk.bf16.vlgmr.msrb.gmra.mxu1 %vm705_vm1, %v762_v30 }
 0x19b   : > { %v865_v32 = vpop.permute.xlu1 %864 }
 0x19c   : > { %v870_v33 = vsel %vm705_vm1, %v865_v32, 0 }
 0x19d   : > { %879 = vmatpush.bf16.xpose.msra.mxu1 %v870_v33 }
 0x1a0   : > { %v721_v34 = vpop.f32.mrf.mxu3 }
 0x1a1   : > { %v725_v35 = vsel %vm705_vm1, %v721_v34, -inf }
 0x1a2   : > { %726 = vmax.xlane.f32.xlu2 %v725_v35 }
 0x1a3   : > { %v863_v36 = vpop.permute.xlu1 %862 }
 0x1a4   : > { %1764 = vmatmul.msk.bf16.vlgmr.msra.gmra.mxu1 %vm705_vm1, %v863_v36 }
 0x1a8   : > { %v723_v37 = vpop.f32.mrf.mxu3 }
 0x1ab   : > { %v940_v12 = vpop.permute.xlu1 %939 }
 0x1ba   : > { %941 = vrot.lane.b32.xlu2 %v765_v22, %s2043_s26 }
 0x211   : > { %v783_v38 = vpop.f32.mrf.mxu1 }
 0x212   : > { %v787_v49 = vsel %vm705_vm1, %v783_v38, -inf }
 0x215   : > { %v727_v39 = vpop.xlane.xlu2 %726 }
 0x216   : > { %v728_v40 = vsub.f32 %v721_v34, %v727_v39 }
 0x218   : > { %v729_v41 = vmul.f32 1.442695, %v728_v40  ;;  %v615_v40 = vld [vmem:[%s2419_s6 + $0x4] sm:$0xf] }
 0x219   : > { %v785_v42 = vpop.f32.mrf.mxu1 }
 0x21a   : > { %1890 = vpow2.f32 %v729_v41  ;;  %v828_v41 = vsel %vm740_vm2, %v615_v40, 0 }
 0x21b   : > { %837 = vmatpush.bf16.msrb.mxu3 %v828_v41 }
 0x21d   : > { %v942_v62 = vpop.permute.xlu2 %941 }
 0x21e   : > { %v947_v6 = vsel %vm705_vm1, %v942_v62, 0 }
 0x21f   : > { %932 = vmatpush.bf16.msra.mxu3 %v923_v52 }
 0x220   : > { %v1891_v43 = vpop.eup %1890 }
 0x221   : > { %v881_v44 = vpop.f32.mrf.mxu1  ;;  %v731_v45 = vsel %vm705_vm1, %v1891_v43, 0.0 }
 0x222   : > { %732 = vadd.xlane.f32.xlu0 %v731_v45  ;;  %v885_v47 = vsel %vm705_vm1, %v881_v44, -inf }
 0x223   : > { %886 = vmax.xlane.f32.xlu1 %v885_v47 }
 0x229   : > { %v883_v48 = vpop.f32.mrf.mxu1 }
 0x22a   : > { %788 = vmax.xlane.f32.xlu0 %v787_v49 }
 0x23c   : > { %897 = vrot.lane.b32.xlu1 %v2223_v54, %s2042_s28 }
 0x295   : > { %v733_v58 = vpop.xlane.xlu0 %732 }
 0x296   : > { %1892 = vrcp.f32 %v733_v58  ;;  %v887_v18 = vpop.xlane.xlu1 %886 }
 0x297   : > { %v888_v19 = vsub.f32 %v881_v44, %v887_v18 }
 0x299   : > { %v889_v20 = vmul.f32 1.442695, %v888_v19 }
 0x29c   : > { %v1893_v59 = vpop.eup %1892 }
 0x29d   : > { %v735_v60 = vmul.f32 %v1893_v59, %v1891_v43  ;;  %v789_v61 = vpop.xlane.xlu0 %788 }
 0x29e   : > { %v790_v63 = vsub.f32 %v783_v38, %v789_v61 }
 0x29f   : > { %v736_v0 = vpack.c.bf16 %v735_v60, %v735_v60 }
 0x2a0   : > { %v791_v1 = vmul.f32 1.442695, %v790_v63 }
 0x2a1   : > { %1759 = vmatmul.msk.bf16.vlgmr.msrb.gmra.mxu0 %vm705_vm1, %v736_v0 }
 0x2a2   : > { %1894 = vpow2.f32 %v791_v1  ;;  %956 = vmatpush.bf16.xpose.msrb.mxu0 %v947_v6  ;;  %v2270_v1 = vld [vmem:[%s2420_s7] sm:$0x7] }
 0x2a3   : > { %1896 = vpow2.f32 %v889_v20 }
 0x2a8   : > { %v1895_v7 = vpop.eup %1894 }
 0x2a9   : > { %v793_v8 = vsel %vm705_vm1, %v1895_v7, 0.0  ;;  %v1897_v21 = vpop.eup %1896 }
 0x2aa   : > { %794 = vadd.xlane.f32.xlu2 %v793_v8  ;;  %v891_v22 = vsel %vm705_vm1, %v1897_v21, 0.0  ;;  %v1016_v8 = vperm.slane %v2270_v1, 0 }
 0x2ae   : > { %v898_v30 = vpop.permute.xlu1 %897 }
 0x2af   : > { %v903_v34 = vsel %vm740_vm2, %v898_v30, 0  ;;  %v1888_v30 = vld [vmem:[#allocation4] ss:$0 sm:$0xff] }
 0x31d   : > { %v795_v26 = vpop.xlane.xlu2 %794 }
 0x31e   : > { %v753_v9 = vpop.f32.mrf.mxu0 }
 0x31f   : > { %v757_v10 = vpack.c.bf16 %v753_v9, %v753_v9 }
 0x321   : > { %1763 = vmatmul.msk.bf16.vlgmr.msra.gmra.mxu0 %vm705_vm1, %v757_v10 }
 0x326   : > { %v755_v11 = vpop.f32.mrf.mxu0 }
 0x331   : > { %1767 = vmatmul.msk.bf16.vlgmr.msrb.gmra.mxu0 %vm705_vm1, %v940_v12 }
 0x39e   : > { %v2237_v13 = vpop.f32.mrf.mxu0 }
 0x3a6   : > { %v860_v14 = vpop.f32.mrf.mxu0 }
 0x3ae   : > { %v958_v15 = vpop.f32.mrf.mxu0 }
 0x3af   : > { %v962_v16 = vsel %vm705_vm1, %v958_v15, -inf }
 0x3b0   : > { %963 = vmax.xlane.f32.xlu0 %v962_v16  ;;  %v2044_v16 = vmov 32.0  }
 0x3b6   : > { %v960_v17 = vpop.f32.mrf.mxu0 }
 0x3b7   : > { %v1831_v17 = vld [vmem:[%s2421_s8 + $0x8] sm:$0xff] }
 0x3c4   : > { %802 = vrot.lane.b32.xlu0 %v2223_v54, %s2041_s24 }
 0x3ee   : > { %892 = vadd.xlane.f32.xlu0 %v891_v22 }
 0x423   : > { %v964_v23 = vpop.xlane.xlu0 %963 }
 0x424   : > { %v965_v24 = vsub.f32 %v958_v15, %v964_v23 }
 0x426   : > { %v966_v25 = vmul.f32 1.442695, %v965_v24 }
 0x428   : > { %1898 = vpow2.f32 %v966_v25 }
 0x429   : > { %1900 = vrcp.f32 %v795_v26 }
 0x42e   : > { %v1899_v27 = vpop.eup %1898 }
 0x42f   : > { %v968_v28 = vsel %vm705_vm1, %v1899_v27, 0.0  ;;  %v1901_v29 = vpop.eup %1900 }
 0x430   : > { %969 = vadd.xlane.f32.xlu2 %v968_v28  ;;  %v797_v31 = vmul.f32 %v1901_v29, %v1895_v7 }
 0x432   : > { %v798_v35 = vpack.c.bf16 %v797_v31, %v797_v31 }
 0x436   : > { %v803_v32 = vpop.permute.xlu0 %802 }
 0x437   : > { %v808_v33 = vsel %vm740_vm2, %v803_v32, 0  ;;  %v1839_v32 = vld [vmem:[%s596_s27] sm:$0xff]  }
 0x438   : > { %817 = vmatpush.bf16.msrb.mxu2 %v808_v33 }
 0x43b   : > { %1761 = vmatmul.msk.bf16.vlgmr.msrb.gmra.mxu2 %vm705_vm1, %v798_v35 }
 0x43c   : > { %912 = vmatpush.bf16.msra.mxu2 %v903_v34  ;;  %v604_v34 = vld [vmem:[%s2297_s20] sm:$0xff]  }
 0x440   : > { %1009 = vmatpush.bf16.msrb.mxu2 %v1000_v57 }
 0x448   : > { %974 = vrot.lane.b32.xlu2 %v2223_v54, %s2043_s26 }
 0x450   : > { %1105 = vrot.lane.b32.xlu2 %v1830_v2, %s2039_s30 }
 0x458   : > { %1111 = vrot.lane.b32.xlu2 %v1888_v30, %s2039_s30 }
 0x460   : > { %1138 = vrot.lane.b32.xlu2 %v1831_v17, %s2040_s0 }
 0x461   : > { %v893_v36 = vpop.xlane.xlu0 %892 }
 0x462   : > { %1902 = vrcp.f32 %v893_v36  ;;  %v1840_v36 = vunpack.c.l.bf16 %v1839_v32 }
 0x468   : > { %v1903_v37 = vpop.eup %1902 }
 0x469   : > { %v895_v38 = vmul.f32 %v1903_v37, %v1897_v21  ;;  %v1841_v37 = vunpack.c.h.bf16 %v1839_v32 }
 0x46b   : > { %v896_v39 = vpack.c.bf16 %v895_v38, %v895_v38  ;;  %v1066_v38 = vunpack.c.l.bf16 %v604_v34 }
 0x46d   : > { %1765 = vmatmul.msk.bf16.vlgmr.msra.gmra.mxu2 %vm705_vm1, %v896_v39  ;;  %v1067_v39 = vunpack.c.h.bf16 %v604_v34 }
 0x4a3   : > { %v970_v42 = vpop.xlane.xlu2 %969 }
 0x4a4   : > { %1904 = vrcp.f32 %v970_v42 }
 0x4a5   : > { %1906 = vrcp.f32 %v2044_v16 }
 0x4aa   : > { %v1905_v43 = vpop.eup %1904 }
 0x4ab   : > { %v972_v44 = vmul.f32 %v1905_v43, %v1899_v27  ;;  %v975_v45 = vpop.permute.xlu2 %974  ;;  %v1070_v43 = vadd.f32 %v1840_v36, %v1066_v38 }
 0x4ac   : > { %v980_v46 = vsel %vm740_vm2, %v975_v45, 0 }
 0x4ad   : > { %v973_v47 = vpack.c.bf16 %v972_v44, %v972_v44  ;;  %989 = vmatpush.bf16.msrb.mxu1 %v980_v46  ;;  %v1071_v44 = vadd.f32 %v1841_v37, %v1067_v39  ;;  %v1048_v46 = vperm.slane %v2270_v1, 1 }
 0x4af   : > { %v1072_v51 = vpack.c.bf16 %v1071_v44, %v1070_v43 }
 0x4b0   : > { %1768 = vmatmul.msk.bf16.vlgmr.msrb.gmra.mxu1 %vm705_vm1, %v973_v47 }
 0x4b3   : > { %v1106_v47 = vpop.permute.xlu2 %1105 }
 0x4be   : > { %v819_v48 = vpop.f32.mrf.mxu2 }
 0x4bf   : > { %v823_v49 = vpack.c.bf16 %v819_v48, %v819_v48 }
 0x4c1   : > { %1762 = vmatmul.msk.bf16.vlgmr.msrb.gmra.mxu3 %vm705_vm1, %v823_v49  ;;  %v1050_v49 = vperm.slane %v2270_v1, 2 }
 0x4c2   : > { %1097 = vmatpush.bf16.msrb.mxu3 %v1831_v17 }
 0x4c6   : > { %v821_v50 = vpop.f32.mrf.mxu2  ;;  %1098 = vmatpush.bf16.msrb.mxu3 %v1830_v2 }
 0x4f0   : > { %v914_v53 = vpop.f32.mrf.mxu2 }
 0x4f1   : > { %v918_v54 = vpack.c.bf16 %v914_v53, %v914_v53 }
 0x4f3   : > { %1766 = vmatmul.msk.bf16.vlgmr.msra.gmra.mxu3 %vm705_vm1, %v918_v54 }
 0x4f8   : > { %v916_v55 = vpop.f32.mrf.mxu2 }
 0x52d   : > { %v991_v58 = vpop.f32.mrf.mxu1 }
 0x52e   : > { %v995_v59 = vpack.c.bf16 %v991_v58, %v991_v58 }
 0x530   : > { %1769 = vmatmul.msk.bf16.vlgmr.msrb.gmra.mxu2 %vm705_vm1, %v995_v59  ;;  %v1112_v59 = vpop.permute.xlu2 %1111 }
 0x535   : > { %v993_v60 = vpop.f32.mrf.mxu1 }
 0x544   : > { %v839_v61 = vpop.f32.mrf.mxu3 }
 0x545   : > { %v859_v6 = vadd.f32 %v2237_v13, %v839_v61  ;;  %v1907_v13 = vpop.eup %1906 }
 0x546   : > { %v1023_v18 = vmul.f32 32.0, %v1907_v13  ;;  %vm1027_vm3 = vweird.f32 %v1907_v13 }
 0x548   : > { %v1024_v19 = vsub.f32 1.0, %v1023_v18  ;;  %v1139_v18 = vpop.permute.xlu2 %1138 }
 0x549   : > { %1154 = vmatpush.bf16.msra.mxu1 %v1139_v18 }
 0x54a   : > { %v1025_v20 = vmul.f32 %v1907_v13, %v1024_v19 }
 0x54c   : > { %v841_v62 = vpop.f32.mrf.mxu3  ;;  %v1026_v21 = vadd.f32 %v1907_v13, %v1025_v20  ;;  %v1827_v20 = vld [vmem:[%s2297_s20] sm:$0xff] }
 0x576   : > { %v934_v63 = vpop.f32.mrf.mxu3 }
 0x577   : > { %v938_v7 = vadd.f32 %v934_v63, %v859_v6 }
 0x57e   : > { %v936_v0 = vpop.f32.mrf.mxu3 }
 0x5b3   : > { %v1011_v9 = vpop.f32.mrf.mxu2 }
 0x5b4   : > { %v1015_v10 = vadd.f32 %v1011_v9, %v938_v7 }
 0x5b6   : > { %v1017_v11 = vadd.f32 %v1016_v8, %v1015_v10 }
 0x5b8   : > { %v1018_v12 = vadd.f32 %v1017_v11, %v618_v4  ;;  %v2283_v4 = vsel %vm1027_vm3, %v1907_v13, %v1026_v21 }
 0x5ba   : > { %v1019_v14 = vsel %vm637_vm0, %v1018_v12, 0.0 }
 0x5bb   : > { %v1013_v15 = vpop.f32.mrf.mxu2  ;;  %1020 = vadd.xlane.f32.xlu1 %v1019_v14 }
 0x5d4   : > { %1142 = vrot.lane.b32.xlu1 %v1888_v30, %s2040_s0 }
 0x62e   : > { %v1021_v22 = vpop.xlane.xlu1 %1020 }
 0x62f   : > { %v1029_v23 = vmul.f32 %v2283_v4, %v1021_v22 }
 0x631   : > { %v1030_v24 = vsub.f32 %v1018_v12, %v1029_v23 }
 0x633   : > { %v1031_v25 = vmul.f32 %v1030_v24, %v1030_v24 }
 0x635   : > { %v1032_v26 = vsel %vm637_vm0, %v1031_v25, 0.0 }
 0x636   : > { %1033 = vadd.xlane.f32.xlu0 %v1032_v26 }
 0x646   : > { %v1143_v15 = vpop.permute.xlu1 %1142 }
 0x64a   : > { %1107 = vrot.lane.b32.xlu0 %v1831_v17, %s2039_s30 }
 0x652   : > { %1136 = vrot.lane.b32.xlu0 %v1830_v2, %s2040_s0 }
 0x6a9   : > { %v1034_v27 = vpop.xlane.xlu0 %1033 }
 0x6aa   : > { %v1035_v28 = vmul.f32 %v1034_v27, %v2283_v4 }
 0x6ac   : > { %v1036_v29 = vadd.f32 1e-05, %v1035_v28 }
 0x6ae   : > { %1908 = vrsqrt.f32 %v1036_v29  ;;  %vm1043_vm5 = vweird.f32 %v1036_v29 }
 0x6b4   : > { %v1909_v31 = vpop.eup %1908 }
 0x6b5   : > { %v1038_v33 = vmul.f32 %v1909_v31, %v1036_v29  ;;  %vm1044_vm4 = vweird.f32 %v1909_v31 }
 0x6b6   : > { %vm1045_vm6 = vmor %vm1043_vm5, %vm1044_vm4 }
 0x6b7   : > { %v1039_v35 = vmul.f32 %v1909_v31, %v1038_v33 }
 0x6b9   : > { %v1040_v40 = vmul.f32 0.5, %v1039_v35 }
 0x6bb   : > { %v1041_v41 = vsub.f32 1.5, %v1040_v40 }
 0x6bc   : > { %v1108_v42 = vpop.permute.xlu0 %1107 }
 0x6bd   : > { %v1042_v45 = vmul.f32 %v1909_v31, %v1041_v41  ;;  %1123 = vmatpush.bf16.msra.mxu0 %v1108_v42 }
 0x6bf   : > { %v1046_v48 = vsel %vm1045_vm6, %v1909_v31, %v1042_v45 }
 0x6c0   : > { %v1047_v50 = vmul.f32 %v1046_v48, %v1030_v24 }
 0x6c1   : > { %1124 = vmatpush.bf16.msra.mxu0 %v1106_v47  ;;  %v1058_v47 = vld [vmem:[%s2423_s10] sm:$0xf] }
 0x6c2   : > { %v1049_v52 = vmul.f32 %v1048_v46, %v1047_v50  ;;  %v1308_v48 = vsel %vm740_vm2, %v1058_v47, 0 }
 0x6c4   : > { %v2306_v53 = vadd.f32 %v1050_v49, %v1049_v52  ;;  %1779 = vmatmul.msk.bf16.vlgmr.msra.gmra.mxu0 %vm637_vm0, %v1072_v51  ;;  %v1137_v19 = vpop.permute.xlu0 %1136 }
 0x6c5   : > { %1155 = vmatpush.bf16.msra.mxu1 %v1137_v19 }
 0x6c6   : > { %v1062_v54 = vpack.c.bf16 %v2306_v53, %v2306_v53 }
 0x6c8   : > { %v1063_v55 = vunpack.c.l.bf16 %v1062_v54  ;;  %1784 = vmatmul.msk.bf16.vlgmr.msra.gmra.mxu1 %vm637_vm0, %v1827_v20 }
 0x6ca   : > { %v1064_v56 = vadd.f32 %v1063_v55, %v619_v5 }
 0x6cc   : > { %v1065_v57 = vpack.c.bf16 %v1064_v56, %v1064_v56 }
 0x6ce   : > { %1778 = vmatmul.msk.bf16.vlgmr.msrb.gmra.mxu3 %vm637_vm0, %v1065_v57 }
 0x741   : > { %v1126_v58 = vpop.f32.mrf.mxu0 }
 0x742   : > { %v1127_v60 = vadd.f32 %v1126_v58, %v1112_v59 }
 0x744   : > { %v1163_v62 = vpack.c.bf16 %v1127_v60, %v1127_v60 }
 0x745   : > { %v1157_v34 = vpop.f32.mrf.mxu1 }
 0x746   : > { %v1169_v1 = vunpack.c.l.b16 %v1163_v62  ;;  %v1158_v35 = vadd.f32 %v1157_v34, %v1143_v15 }
 0x748   : > { %v1165_v36 = vpack.c.bf16 %v1158_v35, %v1158_v35 }
 0x749   : > { %v1128_v61 = vpop.f32.mrf.mxu0 }
 0x74a   : > { %v1129_v63 = vadd.f32 %v1128_v61, %v1112_v59  ;;  %v1206_v39 = vunpack.c.l.b16 %v1165_v36 }
 0x74c   : > { %v1164_v0 = vpack.c.bf16 %v1129_v63, %v1129_v63 }
 0x74d   : > { %v1159_v37 = vpop.f32.mrf.mxu1 }
 0x74e   : > { %v1170_v6 = vunpack.c.l.b16 %v1164_v0  ;;  %v1160_v38 = vadd.f32 %v1159_v37, %v1143_v15 }
 0x750   : > { %v1171_v7 = vpack.c.b16 %v1170_v6, %v1169_v1  ;;  %v1166_v40 = vpack.c.bf16 %v1160_v38, %v1160_v38 }
 0x751   : > { %v1100_v8 = vpop.f32.mrf.mxu3 }
 0x752   : > { %v1101_v9 = vadd.f32 %v1888_v30, %v1100_v8  ;;  %1232 = vrot.lane.b32.xlu1 %v1171_v7, %s2041_s24  ;;  %v1176_v3 = vsel %vm705_vm1, %v1171_v7, 0  ;;  %v1207_v41 = vunpack.c.l.b16 %v1166_v40 }
 0x753   : > { %1185 = vmatpush.bf16.xpose.msra.mxu2 %v1176_v3  ;;  %v1059_v3 = vld [vmem:[%s2423_s10 + $0x4] sm:$0xf] }
 0x754   : > { %v1104_v5 = vmul.f32 0.35355338, %v1101_v9  ;;  %v2331_v42 = vpack.c.b16 %v1207_v41, %v1206_v39 }
 0x756   : > { %v1162_v10 = vpack.c.bf16 %v1104_v5, %v1104_v5  ;;  %1220 = vmatpush.bf16.msra.mxu3 %v2331_v42  ;;  %v1289_v5 = vsel %vm740_vm2, %v1059_v3, 0  ;;  %v1836_v3 = vld [vmem:[%s2427_s14 + $0x10] sm:$0xff] }
 0x758   : > { %v1228_v11 = vunpack.c.l.b16 %v1162_v10 }
 0x759   : > { %v1102_v12 = vpop.f32.mrf.mxu3 }
 0x75a   : > { %1785 = vmatmul.msk.bf16.vlgmr.msra.gmra.mxu2 %vm705_vm1, %v1162_v10  ;;  %v1229_v14 = vpack.c.b16 %v1228_v11, %v1228_v11  ;;  %1317 = vmatpush.bf16.msrb.mxu3 %v1308_v48 }
 0x75b   : > { %1298 = vmatpush.bf16.msrb.mxu2 %v1289_v5 }
 0x75c   : > { %1230 = vrot.lane.b32.xlu1 %v1229_v14, %s2041_s24 }
 0x764   : > { %1323 = vrot.lane.b32.xlu1 %v1229_v14, %s2042_s28 }
 0x76c   : > { %1398 = vrot.lane.b32.xlu1 %v1229_v14, %s2043_s26 }
 0x7c4   : > { %v1233_v16 = vpop.permute.xlu1 %1232 }
 0x7c5   : > { %v1238_v17 = vsel %vm705_vm1, %v1233_v16, 0 }
 0x7c6   : > { %1247 = vmatpush.bf16.xpose.msrb.mxu0 %v1238_v17 }
 0x7ce   : > { %v1231_v13 = vpop.permute.xlu1 %1230 }
 0x7cf   : > { %1787 = vmatmul.msk.bf16.vlgmr.msrb.gmra.mxu0 %vm705_vm1, %v1231_v13 }
 0x7d6   : > { %v1324_v33 = vpop.permute.xlu1 %1323 }
 0x7dd   : > { %v1187_v21 = vpop.f32.mrf.mxu2 }
 0x7de   : > { %v1192_v2 = vsel %vm1191_vm7, %v1187_v21, -inf  ;;  %v1399_v43 = vpop.permute.xlu1 %1398 }
 0x7df   : > { %1193 = vmax.xlane.f32.xlu2 %v1192_v2 }
 0x7e5   : > { %v1189_v22 = vpop.f32.mrf.mxu2 }
 0x7f7   : > { %1325 = vrot.lane.b32.xlu2 %v1171_v7, %s2042_s28 }
 0x84c   : > { %v1249_v23 = vpop.f32.mrf.mxu0 }
 0x84d   : > { %v1253_v24 = vsel %vm1191_vm7, %v1249_v23, -inf }
 0x84e   : > { %1254 = vmax.xlane.f32.xlu1 %v1253_v24 }
 0x852   : > { %v1194_v25 = vpop.xlane.xlu2 %1193 }
 0x853   : > { %v1195_v26 = vsub.f32 %v1187_v21, %v1194_v25 }
 0x854   : > { %v1251_v27 = vpop.f32.mrf.mxu0 }
 0x855   : > { %v1196_v28 = vmul.f32 1.442695, %v1195_v26 }
 0x857   : > { %1910 = vpow2.f32 %v1196_v28 }
 0x85a   : > { %v1326_v29 = vpop.permute.xlu2 %1325 }
 0x85b   : > { %v1331_v30 = vsel %vm705_vm1, %v1326_v29, 0 }
 0x85c   : > { %1340 = vmatpush.bf16.xpose.msra.mxu0 %v1331_v30 }
 0x85d   : > { %v1911_v31 = vpop.eup %1910 }
 0x85e   : > { %v1198_v32 = vsel %vm1191_vm7, %v1911_v31, 0.0 }
 0x85f   : > { %1199 = vadd.xlane.f32.xlu0 %v1198_v32 }
 0x863   : > { %1791 = vmatmul.msk.bf16.vlgmr.msra.gmra.mxu0 %vm705_vm1, %v1324_v33  ;;  %v1060_v33 = vld [vmem:[%s2423_s10 + $0x8] sm:$0xf] }
 0x864   : > { %v1382_v34 = vsel %vm740_vm2, %v1060_v33, 0 }
 0x865   : > { %1391 = vmatpush.bf16.msra.mxu2 %v1382_v34 }
 0x873   : > { %1400 = vrot.lane.b32.xlu0 %v1171_v7, %s2043_s26 }
 0x8c1   : > { %v1255_v44 = vpop.xlane.xlu1 %1254 }
 0x8c2   : > { %v1256_v45 = vsub.f32 %v1249_v23, %v1255_v44 }
 0x8c4   : > { %v1257_v46 = vmul.f32 1.442695, %v1256_v45 }
 0x8c6   : > { %1912 = vpow2.f32 %v1257_v46 }
 0x8cc   : > { %v1913_v49 = vpop.eup %1912 }
 0x8cd   : > { %v1259_v50 = vsel %vm1191_vm7, %v1913_v49, 0.0 }
 0x8ce   : > { %1260 = vadd.xlane.f32.xlu1 %v1259_v50 }
 0x8d2   : > { %v1200_v51 = vpop.xlane.xlu0 %1199 }
 0x8d3   : > { %1914 = vrcp.f32 %v1200_v51 }
 0x8d9   : > { %v1915_v52 = vpop.eup %1914 }
 0x8da   : > { %v1202_v54 = vmul.f32 %v1915_v52, %v1911_v31  ;;  %v1052_v52 = vld [vmem:[%s2424_s11] sm:$0x7] }
 0x8dc   : > { %v1203_v55 = vpack.c.bf16 %v1202_v54, %v1202_v54  ;;  %v1473_v54 = vperm.slane %v1052_v52, 0 }
 0x8de   : > { %1786 = vmatmul.msk.bf16.vlgmr.msra.gmra.mxu3 %vm1191_vm7, %v1203_v55 }
 0x8e0   : > { %v1342_v56 = vpop.f32.mrf.mxu0 }
 0x8e1   : > { %v1346_v57 = vsel %vm1191_vm7, %v1342_v56, -inf }
 0x8e2   : > { %1347 = vmax.xlane.f32.xlu0 %v1346_v57 }
 0x8e5   : > { %v1401_v58 = vpop.permute.xlu0 %1400 }
 0x8e6   : > { %v1406_v59 = vsel %vm705_vm1, %v1401_v58, 0 }
 0x8e7   : > { %1415 = vmatpush.bf16.xpose.msra.mxu3 %v1406_v59 }
 0x8e8   : > { %v1344_v60 = vpop.f32.mrf.mxu0 }
 0x8f6   : > { %1265 = vrot.lane.b32.xlu0 %v2331_v42, %s2041_s24 }
 0x941   : > { %v1261_v61 = vpop.xlane.xlu1 %1260 }
 0x942   : > { %1916 = vrcp.f32 %v1261_v61 }
 0x948   : > { %v1917_v1 = vpop.eup %1916 }
 0x949   : > { %v1263_v6 = vmul.f32 %v1917_v1, %v1913_v49 }
 0x94b   : > { %v1264_v9 = vpack.c.bf16 %v1263_v6, %v1263_v6  ;;  %v1833_v6 = vld [vmem:[%s2425_s12 + $0x8] sm:$0xff] }
 0x955   : > { %v1348_v62 = vpop.xlane.xlu0 %1347 }
 0x956   : > { %v1349_v14 = vsub.f32 %v1342_v56, %v1348_v62 }
 0x958   : > { %v1350_v17 = vmul.f32 1.442695, %v1349_v14 }
 0x95a   : > { %1918 = vpow2.f32 %v1350_v17  ;;  %v1498_v17 = vperm.slane %v1052_v52, 1 }
 0x960   : > { %v1919_v19 = vpop.eup %1918 }
 0x961   : > { %v1222_v63 = vpop.f32.mrf.mxu3  ;;  %v1352_v21 = vsel %vm1191_vm7, %v1919_v19, 0.0 }
 0x962   : > { %v1226_v0 = vpack.c.bf16 %v1222_v63, %v1222_v63 }
 0x964   : > { %1790 = vmatmul.msk.bf16.vlgmr.msrb.gmra.mxu3 %vm705_vm1, %v1226_v0 }
 0x968   : > { %v1266_v7 = vpop.permute.xlu0 %1265 }
 0x969   : > { %v1224_v8 = vpop.f32.mrf.mxu3  ;;  %1278 = vmatpush.bf16.msrb.mxu1 %v1266_v7  ;;  %v1837_v7 = vld [vmem:[%s2427_s14 + $0x18] sm:$0xff] }
 0x96a   : > { %1583 = vmatpush.bf16.msrb.mxu3 %v1837_v7 }
 0x96c   : > { %1788 = vmatmul.msk.bf16.vlgmr.msrb.gmra.mxu1 %vm1191_vm7, %v1264_v9 }
 0x96e   : > { %1584 = vmatpush.bf16.msrb.mxu3 %v1836_v3 }
 0x974   : > { %1794 = vmatmul.msk.bf16.vlgmr.msra.gmra.mxu3 %vm705_vm1, %v1399_v43 }
 0x9e7   : > { %v1319_v10 = vpop.f32.mrf.mxu3 }
 0x9e9   : > { %v1280_v11 = vpop.f32.mrf.mxu1 }
 0x9ea   : > { %v1284_v12 = vpack.c.bf16 %v1280_v11, %v1280_v11 }
 0x9ec   : > { %1789 = vmatmul.msk.bf16.vlgmr.msrb.gmra.mxu2 %vm705_vm1, %v1284_v12 }
 0x9ed   : > { %1541 = vmatpush.bf16.msrb.mxu2 %v1833_v6 }
 0x9ef   : > { %v1321_v15 = vpop.f32.mrf.mxu3 }
 0x9f1   : > { %v1282_v16 = vpop.f32.mrf.mxu1 }
 0x9f7   : > { %v1417_v13 = vpop.f32.mrf.mxu3 }
 0x9f8   : > { %v1421_v18 = vsel %vm1191_vm7, %v1417_v13, -inf }
 0x9f9   : > { %1422 = vmax.xlane.f32.xlu2 %v1421_v18  ;;  %v1500_v18 = vperm.slane %v1052_v52, 2 }
 0x9ff   : > { %v1419_v20 = vpop.f32.mrf.mxu3 }
 0xa01   : > { %1353 = vadd.xlane.f32.xlu2 %v1352_v21 }
 0xa19   : > { %1358 = vrot.lane.b32.xlu2 %v2331_v42, %s2042_s28 }
 0xa6c   : > { %v1423_v2 = vpop.xlane.xlu2 %1422 }
 0xa6d   : > { %v1424_v22 = vsub.f32 %v1417_v13, %v1423_v2 }
 0xa6f   : > { %v1425_v23 = vmul.f32 1.442695, %v1424_v22  ;;  %v1300_v24 = vpop.f32.mrf.mxu2  ;;  %v1835_v22 = vld [vmem:[%s2427_s14 + $0x8] sm:$0xff] }
 0xa70   : > { %v1320_v45 = vadd.f32 %v1319_v10, %v1300_v24  ;;  %1585 = vmatpush.bf16.msrb.mxu3 %v1835_v22  ;;  %v1889_v24 = vld [vmem:[#allocation6] ss:$0 sm:$0xff] }
 0xa71   : > { %1920 = vpow2.f32 %v1425_v23  ;;  %v1834_v23 = vld [vmem:[%s2427_s14] sm:$0xff] }
 0xa74   : > { %v1354_v25 = vpop.xlane.xlu2 %1353  ;;  %1586 = vmatpush.bf16.msrb.mxu3 %v1834_v23 }
 0xa75   : > { %1922 = vrcp.f32 %v1354_v25 }
 0xa77   : > { %v1921_v26 = vpop.eup %1920  ;;  %v1302_v27 = vpop.f32.mrf.mxu2 }
 0xa78   : > { %v1427_v28 = vsel %vm1191_vm7, %v1921_v26, 0.0 }
 0xa79   : > { %1428 = vadd.xlane.f32.xlu1 %v1427_v28 }
 0xa7b   : > { %v1923_v29 = vpop.eup %1922 }
 0xa7c   : > { %v1356_v30 = vmul.f32 %v1923_v29, %v1919_v19  ;;  %v1359_v31 = vpop.permute.xlu2 %1358 }
 0xa7d   : > { %1371 = vmatpush.bf16.msra.mxu1 %v1359_v31 }
 0xa7e   : > { %v1357_v32 = vpack.c.bf16 %v1356_v30, %v1356_v30  ;;  %v1502_v30 = vld [vmem:[%s2428_s15] sm:$0x7] }
 0xa7f   : > { %v1550_v31 = vperm.slane %v1502_v30, 0 }
 0xa80   : > { %1792 = vmatmul.msk.bf16.vlgmr.msra.gmra.mxu1 %vm1191_vm7, %v1357_v32 }
 0xa92   : > { %1433 = vrot.lane.b32.xlu1 %v2331_v42, %s2043_s26  ;;  %v1061_v42 = vld [vmem:[%s2423_s10 + $0xc] sm:$0xf] }
 0xa93   : > { %v1457_v44 = vsel %vm740_vm2, %v1061_v42, 0 }
 0xa94   : > { %1466 = vmatpush.bf16.msrb.mxu1 %v1457_v44 }
 0xaec   : > { %v1429_v35 = vpop.xlane.xlu1 %1428 }
 0xaed   : > { %1924 = vrcp.f32 %v1429_v35 }
 0xaf3   : > { %v1925_v38 = vpop.eup %1924 }
 0xaf4   : > { %v1431_v39 = vmul.f32 %v1925_v38, %v1921_v26 }
 0xaf6   : > { %v1432_v43 = vpack.c.bf16 %v1431_v39, %v1431_v39 }
 0xafd   : > { %v1373_v36 = vpop.f32.mrf.mxu1 }
 0xafe   : > { %v1377_v37 = vpack.c.bf16 %v1373_v36, %v1373_v36 }
 0xb00   : > { %1793 = vmatmul.msk.bf16.vlgmr.msra.gmra.mxu2 %vm705_vm1, %v1377_v37 }
 0xb04   : > { %v1434_v40 = vpop.permute.xlu1 %1433 }
 0xb05   : > { %v1375_v41 = vpop.f32.mrf.mxu1  ;;  %1446 = vmatpush.bf16.msrb.mxu0 %v1434_v40 }
 0xb08   : > { %1795 = vmatmul.msk.bf16.vlgmr.msrb.gmra.mxu0 %vm1191_vm7, %v1432_v43 }
 0xb83   : > { %v1393_v46 = vpop.f32.mrf.mxu2 }
 0xb84   : > { %v1397_v47 = vadd.f32 %v1393_v46, %v1320_v45 }
 0xb85   : > { %v1448_v48 = vpop.f32.mrf.mxu0 }
 0xb86   : > { %v1452_v49 = vpack.c.bf16 %v1448_v48, %v1448_v48 }
 0xb88   : > { %1796 = vmatmul.msk.bf16.vlgmr.msrb.gmra.mxu1 %vm705_vm1, %v1452_v49 }
 0xb8b   : > { %v1395_v50 = vpop.f32.mrf.mxu2 }
 0xb8d   : > { %v1450_v51 = vpop.f32.mrf.mxu0 }
 0xb8e   : > { %v1615_v51 = vperm.slane %v1502_v30, 1 }
 0xc05   : > { %v1468_v55 = vpop.f32.mrf.mxu1 }
 0xc06   : > { %v1472_v56 = vadd.f32 %v1468_v55, %v1397_v47 }
 0xc08   : > { %v1474_v57 = vadd.f32 %v1473_v54, %v1472_v56  ;;  %v1617_v54 = vperm.slane %v1502_v30, 2 }
 0xc0a   : > { %v1475_v58 = vadd.f32 %v1474_v57, %v2306_v53  ;;  %v1832_v53 = vld [vmem:[%s2425_s12] sm:$0xff] }
 0xc0b   : > { %1542 = vmatpush.bf16.msrb.mxu2 %v1832_v53 }
 0xc0c   : > { %v1476_v59 = vsel %vm637_vm0, %v1475_v58, 0.0 }
 0xc0d   : > { %v1470_v60 = vpop.f32.mrf.mxu1  ;;  %1477 = vadd.xlane.f32.xlu0 %v1476_v59 }
 0xc80   : > { %v1478_v61 = vpop.xlane.xlu0 %1477 }
 0xc81   : > { %v1479_v62 = vmul.f32 %v1478_v61, %v2283_v4 }
 0xc83   : > { %v1480_v63 = vsub.f32 %v1475_v58, %v1479_v62 }
 0xc85   : > { %v1481_v0 = vmul.f32 %v1480_v63, %v1480_v63 }
 0xc87   : > { %v1482_v1 = vsel %vm637_vm0, %v1481_v0, 0.0 }
 0xc88   : > { %1483 = vadd.xlane.f32.xlu2 %v1482_v1 }
 0xcfb   : > { %v1484_v8 = vpop.xlane.xlu2 %1483 }
 0xcfc   : > { %v1485_v9 = vmul.f32 %v1484_v8, %v2283_v4 }
 0xcfe   : > { %v1486_v5 = vadd.f32 1e-05, %v1485_v9 }
 0xd00   : > { %1926 = vrsqrt.f32 %v1486_v5  ;;  %vm1493_vm9 = vweird.f32 %v1486_v5 }
 0xd06   : > { %v1927_v10 = vpop.eup %1926 }
 0xd07   : > { %v1488_v11 = vmul.f32 %v1927_v10, %v1486_v5  ;;  %vm1494_vm8 = vweird.f32 %v1927_v10 }
 0xd08   : > { %vm1495_vm10 = vmor %vm1493_vm9, %vm1494_vm8 }
 0xd09   : > { %v1489_v12 = vmul.f32 %v1927_v10, %v1488_v11 }
 0xd0b   : > { %v1490_v14 = vmul.f32 0.5, %v1489_v12 }
 0xd0d   : > { %v1491_v15 = vsub.f32 1.5, %v1490_v14 }
 0xd0f   : > { %v1492_v16 = vmul.f32 %v1927_v10, %v1491_v15 }
 0xd11   : > { %v1496_v13 = vsel %vm1495_vm10, %v1927_v10, %v1492_v16 }
 0xd12   : > { %v1497_v19 = vmul.f32 %v1496_v13, %v1480_v63 }
 0xd14   : > { %v1499_v20 = vmul.f32 %v1498_v17, %v1497_v19 }
 0xd16   : > { %v1501_v21 = vadd.f32 %v1500_v18, %v1499_v20 }
 0xd18   : > { %v1516_v2 = vpack.c.bf16 %v1501_v21, %v1501_v21 }
 0xd1a   : > { %1805 = vmatmul.msk.bf16.vlgmr.msrb.gmra.mxu2 %vm637_vm0, %v1516_v2 }
 0xd9d   : > { %v1544_v25 = vpop.f32.mrf.mxu2 }
 0xd9e   : > { %v1545_v26 = vadd.f32 %v1889_v24, %v1544_v25 }
 0xda0   : > { %v1548_v27 = vmax.f32 %v1545_v26, 0.0 }
 0xda2   : > { %v1549_v28 = vpack.c.bf16 %v1548_v27, %v1548_v27 }
 0xda4   : > { %1822 = vmatmul.msk.bf16.vlgmr.msrb.gmra.mxu3 %vm1575_vm11, %v1549_v28 }
 0xda5   : > { %v1546_v29 = vpop.f32.mrf.mxu2 }
 0xe27   : > { %v1588_v32 = vpop.f32.mrf.mxu3 }
 0xe28   : > { %v1589_v33 = vadd.f32 %v1588_v32, %v1550_v31 }
 0xe2a   : > { %v1592_v34 = vadd.f32 %v1589_v33, %v1501_v21 }
 0xe2c   : > { %v1593_v35 = vsel %vm637_vm0, %v1592_v34, 0.0 }
 0xe2d   : > { %1594 = vadd.xlane.f32.xlu1 %v1593_v35 }
 0xe2f   : > { %v1590_v36 = vpop.f32.mrf.mxu3 }
 0xea0   : > { %v1595_v37 = vpop.xlane.xlu1 %1594 }
 0xea1   : > { %v1596_v38 = vmul.f32 %v1595_v37, %v2283_v4 }
 0xea3   : > { %v1597_v39 = vsub.f32 %v1592_v34, %v1596_v38 }
 0xea5   : > { %v1598_v40 = vmul.f32 %v1597_v39, %v1597_v39 }
 0xea7   : > { %v1599_v41 = vsel %vm637_vm0, %v1598_v40, 0.0 }
 0xea8   : > { %1600 = vadd.xlane.f32.xlu0 %v1599_v41 }
 0xf1b   : > { %v1601_v43 = vpop.xlane.xlu0 %1600 }
 0xf1c   : > { %v1602_v42 = vmul.f32 %v1601_v43, %v2283_v4 }
 0xf1e   : > { %v1603_v44 = vadd.f32 1e-05, %v1602_v42 }
 0xf20   : > { %1928 = vrsqrt.f32 %v1603_v44  ;;  %vm1610_vm13 = vweird.f32 %v1603_v44 }
 0xf26   : > { %v1929_v45 = vpop.eup %1928 }
 0xf27   : > { %v1605_v46 = vmul.f32 %v1929_v45, %v1603_v44  ;;  %vm1611_vm12 = vweird.f32 %v1929_v45 }
 0xf28   : > { %vm1612_vm14 = vmor %vm1610_vm13, %vm1611_vm12 }
 0xf29   : > { %v1606_v47 = vmul.f32 %v1929_v45, %v1605_v46 }
 0xf2b   : > { %v1607_v48 = vmul.f32 0.5, %v1606_v47 }
 0xf2d   : > { %v1608_v49 = vsub.f32 1.5, %v1607_v48 }
 0xf2f   : > { %v1609_v50 = vmul.f32 %v1929_v45, %v1608_v49 }
 0xf31   : > { %v1613_v52 = vsel %vm1612_vm14, %v1929_v45, %v1609_v50 }
 0xf32   : > { %v1614_v55 = vmul.f32 %v1613_v52, %v1597_v39 }
 0xf34   : > { %v1616_v56 = vmul.f32 %v1615_v51, %v1614_v55 }
 0xf36   : > { %v1618_v57 = vadd.f32 %v1617_v54, %v1616_v56 }
 0xf38   : > { %v1619_v4 = vpack.c.bf16 %v1618_v57, %v1618_v57 }
 0xf3a   : > { %1621 = vst.msk [vmem:[%s600_s29] sm:$0xf] %vm1620_vm15, %v1619_v4 }
 0xf3b PF: > { %s28_s21 = sadd.s32 1, %s2034_s21  }
 0xf3c   : > { %p25_p7 = scmp.ge.s32.totalorder %s28_s21, 4  }
 0xf3e   :  { %27 = sbr.rel (!%p25_p7) target bundleno = 4 (0x4), region = 133 }
 0xf43   :  { %1641 = vsyncpa [#allocation3], 1 }
 0xf44   :  { %1643 = vsyncpa [#allocation3 + $0x1], 1 }
 0xf45   :  { %1644 = vsyncpa [#allocation5], 1 }

</bundles_post_ra>
